<compile_context>
chip_gen: v5e
topology: v5e:2x2
jax: 0.10.0
libtpu: 0.0.40
codegen_flags: <defaults>
</compile_context>

<pallas_src>
import jax
import jax.numpy as jnp
from jax.experimental import pallas as pl
from jax.experimental.pallas import tpu as pltpu


# ------------------------------- Pallas kernel -------------------------------

def _aggregation_kernel(xp_ref, w1_ref, b1_ref, w2_ref, b2_ref, wct_ref,
                        prelu_ref, o_ref):
    # xp_ref  : (1, H+2, W+2, Cin)   reflection-padded input, channels-last
    # w1_ref  : (Cin, Ck)   b1_ref : (1, Ck)      SE linear1 (transposed)
    # w2_ref  : (Ck, Cin)   b2_ref : (1, Cin)     SE linear2 (transposed)
    # wct_ref : (3, Cout, 3*Cin)    conv weight, kh-major, K index = kw*Cin + cin
    # prelu_ref : (1,) SMEM scalar  PReLU slope
    # o_ref   : (1, Cout, H*W)      channels-major (NCHW-flat) output
    Hp, Wp, Cin = xp_ref.shape[1], xp_ref.shape[2], xp_ref.shape[3]
    H, W = Hp - 2, Wp - 2
    Cout = o_ref.shape[1]
    HW = H * W
    inv_hw = 1.0 / HW

    # --- SelfAttention: global average pool over the interior + 2-layer MLP ---
    x_in = xp_ref[0, 1:H + 1, 1:W + 1, :].astype(jnp.float32).reshape(HW, Cin)
    pooled = jnp.sum(x_in, axis=0, keepdims=True) * inv_hw          # (1, Cin)
    h = jnp.dot(pooled, w1_ref[...], preferred_element_type=jnp.float32) + b1_ref[...]
    h = jnp.maximum(h, 0.0)                                         # ReLU
    z = jnp.dot(h, w2_ref[...], preferred_element_type=jnp.float32) + b2_ref[...]
    s = 1.0 / (1.0 + jnp.exp(-z))                                   # sigmoid gate (1, Cin)
    s3 = jnp.concatenate([s, s, s], axis=1)                         # (1, 3*Cin) along K

    # --- fold the gate into the conv weights (lane-aligned broadcast, tiny) ---
    # wct_g[kh, o, kw*Cin + c] = W[o, c, kh, kw] * s[c]
    wct_g = wct_ref[...].astype(jnp.float32) * s3[None, :, :]       # (3, Cout, 3*Cin)

    # --- dense 3x3 conv: 3 MXU matmuls with K = 3*Cin (column taps packed on K) ---
    acc = jnp.zeros((HW, Cout), jnp.float32)
    for kh in range(3):
        band = xp_ref[0, kh:kh + H, :, :].astype(jnp.float32)       # (H, W+2, Cin)
        big = jnp.concatenate(
            [band[:, 0:W, :], band[:, 1:W + 1, :], band[:, 2:W + 2, :]],
            axis=-1).reshape(HW, 3 * Cin)                           # (H*W, 3*Cin)
        acc = acc + jnp.dot(big, jnp.transpose(wct_g[kh]),
                            preferred_element_type=jnp.float32)
    # conv bias dropped: per-channel constants cancel under InstanceNorm(affine=False)

    # --- channels-major for lane-dense norm / activation / store ---
    acc_t = jnp.transpose(acc)                                      # (Cout, H*W)

    # InstanceNorm2d (affine=False, eps=1e-5): stats over H*W per channel
    mean = jnp.sum(acc_t, axis=1, keepdims=True) * inv_hw
    d = acc_t - mean
    var = jnp.sum(d * d, axis=1, keepdims=True) * inv_hw
    y = d * jax.lax.rsqrt(var + 1e-5)                               # rsqrt -> EUP

    # PReLU (single shared slope from SMEM)
    a = prelu_ref[0]
    y = jnp.where(y > 0, y, a * y)

    o_ref[0] = y.astype(o_ref.dtype)


# -------------------------------- wrapper -------------------------------------

def aggregation_forward(x, params):
    """x: (B, Cin, H, W) float32 -> (B, Cout, H, W), matching Aggreation.forward."""
    B, Cin, H, W = x.shape
    Ck = params['w1'].shape[1]
    Cout = params['wc_raw'].shape[0]
    HW = H * W

    # channels-last + reflection pad (pad=1) done once in XLA; everything else fused.
    x_cl = x.transpose(0, 2, 3, 1)                                       # (B, H, W, Cin)
    xp = jnp.pad(x_cl, ((0, 0), (1, 1), (1, 1), (0, 0)), mode='reflect')  # (B, H+2, W+2, Cin)

    # conv weight (Cout, Cin, kh, kw) -> (kh, Cout, kw*Cin + c): K = 3*Cin packing
    wct = params['wc_raw'].transpose(2, 0, 3, 1).reshape(3, Cout, 3 * Cin)

    flops = B * (2 * 9 * HW * Cin * Cout + 2 * (Cin * Ck + Ck * Cin))
    bytes_accessed = (xp.size + B * Cout * HW) * 4 + (wct.size + Cin * Ck * 2 + Cin + Ck) * 4
    cost = pl.CostEstimate(flops=int(flops),
                           transcendentals=int(B * (Cin + Cout)),
                           bytes_accessed=int(bytes_accessed))

    out = pl.pallas_call(
        _aggregation_kernel,
        out_shape=jax.ShapeDtypeStruct((B, Cout, HW), x.dtype),
        grid=(B,),
        in_specs=[
            pl.BlockSpec((1, H + 2, W + 2, Cin), lambda b: (b, 0, 0, 0)),
            pl.BlockSpec((Cin, Ck), lambda b: (0, 0)),
            pl.BlockSpec((1, Ck), lambda b: (0, 0)),
            pl.BlockSpec((Ck, Cin), lambda b: (0, 0)),
            pl.BlockSpec((1, Cin), lambda b: (0, 0)),
            pl.BlockSpec((3, Cout, 3 * Cin), lambda b: (0, 0, 0)),
            pl.BlockSpec(memory_space=pltpu.MemorySpace.SMEM),      # PReLU scalar
        ],
        out_specs=pl.BlockSpec((1, Cout, HW), lambda b: (b, 0, 0)),
        compiler_params=pltpu.CompilerParams(
            dimension_semantics=("parallel",),
            vmem_limit_bytes=32 * 1024 * 1024),
        cost_estimate=cost,
    )(xp,
      params['w1'], params['b1'].reshape(1, Ck),
      params['w2'], params['b2'].reshape(1, Cin),
      wct,
      params['prelu'])

    # output is already channels-major; this reshape is free (contiguous)
    return out.reshape(B, Cout, H, W)


# ---------------------------- pure-JAX reference ------------------------------

def reference(x, params):
    pooled = jnp.mean(x, axis=(2, 3))                                   # (B, Cin)
    h = jnp.maximum(pooled @ params['w1'] + params['b1'], 0.0)
    s = 1.0 / (1.0 + jnp.exp(-(h @ params['w2'] + params['b2'])))
    xs = x * s[:, :, None, None]
    xp = jnp.pad(xs, ((0, 0), (0, 0), (1, 1), (1, 1)), mode='reflect')
    y = jax.lax.conv_general_dilated(
        xp, params['wc_raw'], window_strides=(1, 1), padding='VALID',
        dimension_numbers=('NCHW', 'OIHW', 'NCHW'))
    y = y + params['bc'][None, :, None, None]
    mean = jnp.mean(y, axis=(2, 3), keepdims=True)
    var = jnp.mean((y - mean) ** 2, axis=(2, 3), keepdims=True)
    y = (y - mean) / jnp.sqrt(var + 1e-5)
    a = params['prelu'][0]
    return jnp.where(y > 0, y, a * y)


# ----------------------------------- main --------------------------------------

if __name__ == "__main__":
    B, Cin, Cout, H, W = 2, 32, 32, 16, 16        # SelfAttention k=8 -> Cin//8 = 4
    Ck = Cin // 8

    key = jax.random.PRNGKey(0)
    k1, k2, k3, k4, k5, k6, kx = jax.random.split(key, 7)
    params = {
        # SE MLP weights stored pre-transposed (in, out) relative to nn.Linear (out, in)
        'w1': 0.1 * jax.random.normal(k1, (Cin, Ck), jnp.float32),
        'b1': 0.1 * jax.random.normal(k2, (Ck,), jnp.float32),
        'w2': 0.1 * jax.random.normal(k3, (Ck, Cin), jnp.float32),
        'b2': 0.1 * jax.random.normal(k4, (Cin,), jnp.float32),
        # conv weight kept in PyTorch (Cout, Cin, 3, 3) layout; wrapper re-packs it
        'wc_raw': 0.1 * jax.random.normal(k5, (Cout, Cin, 3, 3), jnp.float32),
        # bias kept for the reference only: it cancels exactly under InstanceNorm,
        # so the Pallas kernel neither loads nor adds it.
        'bc': 0.1 * jax.random.normal(k6, (Cout,), jnp.float32),
        'prelu': jnp.full((1,), 0.25, jnp.float32),   # nn.PReLU() default init
    }
    x = jax.random.normal(kx, (B, Cin, H, W), jnp.float32)

    out = jax.block_until_ready(jax.jit(aggregation_forward)(x, params))
    assert out.shape == (B, Cout, H, W), out.shape

    ref = jax.block_until_ready(reference(x, params))
    max_err = float(jnp.max(jnp.abs(out - ref)))
    assert max_err < 5e-3, f"mismatch vs reference: {max_err}"

    print("KERNEL_OK")
</pallas_src>

<mosaic_0001>
module attributes {stable_mosaic.version = 11 : i64} {
  func.func @_aggregation_kernel(%arg0: i32, %arg1: memref<1x18x18x32xf32, #tpu.memory_space<vmem>>, %arg2: memref<32x4xf32, #tpu.memory_space<vmem>>, %arg3: memref<1x4xf32, #tpu.memory_space<vmem>>, %arg4: memref<4x32xf32, #tpu.memory_space<vmem>>, %arg5: memref<1x32xf32, #tpu.memory_space<vmem>>, %arg6: memref<3x32x96xf32, #tpu.memory_space<vmem>>, %arg7: memref<1xf32, #tpu.memory_space<smem>>, %arg8: memref<1x32x256xf32, #tpu.memory_space<vmem>>) attributes {dimension_semantics = [#tpu.dimension_semantics<parallel>], iteration_bounds = array<i64: 2>, scalar_prefetch = 0 : i64, scratch_operands = 0 : i64, tpu.core_type = #tpu.core_type<tc>, window_params = [{transform_indices = @transform_0, window_bounds = array<i64: 1, 18, 18, 32>}, {pipeline_mode = #tpu.pipeline_mode<synchronous>, transform_indices = @transform_1, window_bounds = array<i64: 32, 4>}, {pipeline_mode = #tpu.pipeline_mode<synchronous>, transform_indices = @transform_2, window_bounds = array<i64: 1, 4>}, {pipeline_mode = #tpu.pipeline_mode<synchronous>, transform_indices = @transform_3, window_bounds = array<i64: 4, 32>}, {pipeline_mode = #tpu.pipeline_mode<synchronous>, transform_indices = @transform_4, window_bounds = array<i64: 1, 32>}, {pipeline_mode = #tpu.pipeline_mode<synchronous>, transform_indices = @transform_5, window_bounds = array<i64: 3, 32, 96>}, {transform_indices = @transform_6, window_bounds = array<i64: 1>}, {transform_indices = @transform_7, window_bounds = array<i64: 1, 32, 256>}]} {
    %c0 = arith.constant 0 : index
    %c1 = arith.constant 1 : index
    %c1_0 = arith.constant 1 : index
    %c0_1 = arith.constant 0 : index
    %0 = vector.load %arg1[%c0, %c1, %c1_0, %c0_1] : memref<1x18x18x32xf32, #tpu.memory_space<vmem>>, vector<1x16x16x32xf32>
    %1 = vector.shape_cast %0 : vector<1x16x16x32xf32> to vector<16x16x32xf32>
    %2 = vector.shape_cast %1 : vector<16x16x32xf32> to vector<256x32xf32>
    %cst = arith.constant dense<0.000000e+00> : vector<32xf32>
    %3 = vector.multi_reduction <add>, %2, %cst [0] : vector<256x32xf32> to vector<32xf32>
    %4 = vector.shape_cast %3 : vector<32xf32> to vector<1x32xf32>
    %cst_2 = arith.constant 3.906250e-03 : f32
    %5 = vector.broadcast %cst_2 : f32 to vector<1x32xf32>
    %6 = arith.mulf %4, %5 : vector<1x32xf32>
    %c0_3 = arith.constant 0 : index
    %c0_4 = arith.constant 0 : index
    %7 = vector.load %arg2[%c0_3, %c0_4] : memref<32x4xf32, #tpu.memory_space<vmem>>, vector<32x4xf32>
    %cst_5 = arith.constant dense<0.000000e+00> : vector<1x4xf32>
    %8 = tpu.matmul %6, %7, %cst_5 {dimension_numbers = #tpu.dot_dimension_numbers<[1], [0], [0], [1], [0, 0, 1, 1], [], []>} : vector<1x32xf32>, vector<32x4xf32>, vector<1x4xf32> -> vector<1x4xf32>
    %c0_6 = arith.constant 0 : index
    %c0_7 = arith.constant 0 : index
    %9 = vector.load %arg3[%c0_6, %c0_7] : memref<1x4xf32, #tpu.memory_space<vmem>>, vector<1x4xf32>
    %10 = arith.addf %8, %9 : vector<1x4xf32>
    %cst_8 = arith.constant 0.000000e+00 : f32
    %11 = vector.broadcast %cst_8 : f32 to vector<1x4xf32>
    %12 = arith.maximumf %10, %11 : vector<1x4xf32>
    %c0_9 = arith.constant 0 : index
    %c0_10 = arith.constant 0 : index
    %13 = vector.load %arg4[%c0_9, %c0_10] : memref<4x32xf32, #tpu.memory_space<vmem>>, vector<4x32xf32>
    %cst_11 = arith.constant dense<0.000000e+00> : vector<1x32xf32>
    %14 = tpu.matmul %12, %13, %cst_11 {dimension_numbers = #tpu.dot_dimension_numbers<[1], [0], [0], [1], [0, 0, 1, 1], [], []>} : vector<1x4xf32>, vector<4x32xf32>, vector<1x32xf32> -> vector<1x32xf32>
    %c0_12 = arith.constant 0 : index
    %c0_13 = arith.constant 0 : index
    %15 = vector.load %arg5[%c0_12, %c0_13] : memref<1x32xf32, #tpu.memory_space<vmem>>, vector<1x32xf32>
    %16 = arith.addf %14, %15 : vector<1x32xf32>
    %cst_14 = arith.constant 0.000000e+00 : f32
    %17 = vector.broadcast %cst_14 : f32 to vector<1x32xf32>
    %18 = arith.subf %17, %16 : vector<1x32xf32>
    %19 = math.exp %18 : vector<1x32xf32>
    %cst_15 = arith.constant 1.000000e+00 : f32
    %20 = vector.broadcast %cst_15 : f32 to vector<1x32xf32>
    %21 = arith.addf %20, %19 : vector<1x32xf32>
    %cst_16 = arith.constant 1.000000e+00 : f32
    %22 = vector.broadcast %cst_16 : f32 to vector<1x32xf32>
    %23 = arith.divf %22, %21 : vector<1x32xf32>
    %24 = tpu.concatenate %23, %23, %23 in 1 : vector<1x32xf32>, vector<1x32xf32>, vector<1x32xf32> -> vector<1x96xf32>
    %c0_17 = arith.constant 0 : index
    %c0_18 = arith.constant 0 : index
    %c0_19 = arith.constant 0 : index
    %25 = vector.load %arg6[%c0_17, %c0_18, %c0_19] : memref<3x32x96xf32, #tpu.memory_space<vmem>>, vector<3x32x96xf32>
    %26 = vector.shape_cast %24 : vector<1x96xf32> to vector<1x1x96xf32>
    %27 = vector.broadcast %26 : vector<1x1x96xf32> to vector<3x32x96xf32>
    %28 = arith.mulf %25, %27 : vector<3x32x96xf32>
    %cst_20 = arith.constant 0.000000e+00 : f32
    %29 = vector.broadcast %cst_20 : f32 to vector<256x32xf32>
    %c0_21 = arith.constant 0 : index
    %c0_22 = arith.constant 0 : index
    %c0_23 = arith.constant 0 : index
    %c0_24 = arith.constant 0 : index
    %30 = vector.load %arg1[%c0_21, %c0_22, %c0_23, %c0_24] : memref<1x18x18x32xf32, #tpu.memory_space<vmem>>, vector<1x16x18x32xf32>
    %31 = vector.shape_cast %30 : vector<1x16x18x32xf32> to vector<16x18x32xf32>
    %32 = vector.extract_strided_slice %31 {offsets = [0, 0, 0], sizes = [16, 16, 32], strides = [1, 1, 1]} : vector<16x18x32xf32> to vector<16x16x32xf32>
    %33 = vector.extract_strided_slice %31 {offsets = [0, 1, 0], sizes = [16, 16, 32], strides = [1, 1, 1]} : vector<16x18x32xf32> to vector<16x16x32xf32>
    %34 = vector.extract_strided_slice %31 {offsets = [0, 2, 0], sizes = [16, 16, 32], strides = [1, 1, 1]} : vector<16x18x32xf32> to vector<16x16x32xf32>
    %35 = tpu.concatenate %32, %33, %34 in 2 : vector<16x16x32xf32>, vector<16x16x32xf32>, vector<16x16x32xf32> -> vector<16x16x96xf32>
    %36 = vector.shape_cast %35 : vector<16x16x96xf32> to vector<256x96xf32>
    %37 = vector.extract_strided_slice %28 {offsets = [0, 0, 0], sizes = [1, 32, 96], strides = [1, 1, 1]} : vector<3x32x96xf32> to vector<1x32x96xf32>
    %38 = vector.shape_cast %37 : vector<1x32x96xf32> to vector<32x96xf32>
    %39 = tpu.transpose %38, [1, 0] : vector<32x96xf32> -> vector<96x32xf32>
    %cst_25 = arith.constant dense<0.000000e+00> : vector<256x32xf32>
    %40 = tpu.matmul %36, %39, %cst_25 {dimension_numbers = #tpu.dot_dimension_numbers<[1], [0], [0], [1], [0, 0, 1, 1], [], []>} : vector<256x96xf32>, vector<96x32xf32>, vector<256x32xf32> -> vector<256x32xf32>
    %41 = arith.addf %29, %40 : vector<256x32xf32>
    %c0_26 = arith.constant 0 : index
    %c1_27 = arith.constant 1 : index
    %c0_28 = arith.constant 0 : index
    %c0_29 = arith.constant 0 : index
    %42 = vector.load %arg1[%c0_26, %c1_27, %c0_28, %c0_29] : memref<1x18x18x32xf32, #tpu.memory_space<vmem>>, vector<1x16x18x32xf32>
    %43 = vector.shape_cast %42 : vector<1x16x18x32xf32> to vector<16x18x32xf32>
    %44 = vector.extract_strided_slice %43 {offsets = [0, 0, 0], sizes = [16, 16, 32], strides = [1, 1, 1]} : vector<16x18x32xf32> to vector<16x16x32xf32>
    %45 = vector.extract_strided_slice %43 {offsets = [0, 1, 0], sizes = [16, 16, 32], strides = [1, 1, 1]} : vector<16x18x32xf32> to vector<16x16x32xf32>
    %46 = vector.extract_strided_slice %43 {offsets = [0, 2, 0], sizes = [16, 16, 32], strides = [1, 1, 1]} : vector<16x18x32xf32> to vector<16x16x32xf32>
    %47 = tpu.concatenate %44, %45, %46 in 2 : vector<16x16x32xf32>, vector<16x16x32xf32>, vector<16x16x32xf32> -> vector<16x16x96xf32>
    %48 = vector.shape_cast %47 : vector<16x16x96xf32> to vector<256x96xf32>
    %49 = vector.extract_strided_slice %28 {offsets = [1, 0, 0], sizes = [1, 32, 96], strides = [1, 1, 1]} : vector<3x32x96xf32> to vector<1x32x96xf32>
    %50 = vector.shape_cast %49 : vector<1x32x96xf32> to vector<32x96xf32>
    %51 = tpu.transpose %50, [1, 0] : vector<32x96xf32> -> vector<96x32xf32>
    %cst_30 = arith.constant dense<0.000000e+00> : vector<256x32xf32>
    %52 = tpu.matmul %48, %51, %cst_30 {dimension_numbers = #tpu.dot_dimension_numbers<[1], [0], [0], [1], [0, 0, 1, 1], [], []>} : vector<256x96xf32>, vector<96x32xf32>, vector<256x32xf32> -> vector<256x32xf32>
    %53 = arith.addf %41, %52 : vector<256x32xf32>
    %c0_31 = arith.constant 0 : index
    %c2 = arith.constant 2 : index
    %c0_32 = arith.constant 0 : index
    %c0_33 = arith.constant 0 : index
    %54 = vector.load %arg1[%c0_31, %c2, %c0_32, %c0_33] : memref<1x18x18x32xf32, #tpu.memory_space<vmem>>, vector<1x16x18x32xf32>
    %55 = vector.shape_cast %54 : vector<1x16x18x32xf32> to vector<16x18x32xf32>
    %56 = vector.extract_strided_slice %55 {offsets = [0, 0, 0], sizes = [16, 16, 32], strides = [1, 1, 1]} : vector<16x18x32xf32> to vector<16x16x32xf32>
    %57 = vector.extract_strided_slice %55 {offsets = [0, 1, 0], sizes = [16, 16, 32], strides = [1, 1, 1]} : vector<16x18x32xf32> to vector<16x16x32xf32>
    %58 = vector.extract_strided_slice %55 {offsets = [0, 2, 0], sizes = [16, 16, 32], strides = [1, 1, 1]} : vector<16x18x32xf32> to vector<16x16x32xf32>
    %59 = tpu.concatenate %56, %57, %58 in 2 : vector<16x16x32xf32>, vector<16x16x32xf32>, vector<16x16x32xf32> -> vector<16x16x96xf32>
    %60 = vector.shape_cast %59 : vector<16x16x96xf32> to vector<256x96xf32>
    %61 = vector.extract_strided_slice %28 {offsets = [2, 0, 0], sizes = [1, 32, 96], strides = [1, 1, 1]} : vector<3x32x96xf32> to vector<1x32x96xf32>
    %62 = vector.shape_cast %61 : vector<1x32x96xf32> to vector<32x96xf32>
    %63 = tpu.transpose %62, [1, 0] : vector<32x96xf32> -> vector<96x32xf32>
    %cst_34 = arith.constant dense<0.000000e+00> : vector<256x32xf32>
    %64 = tpu.matmul %60, %63, %cst_34 {dimension_numbers = #tpu.dot_dimension_numbers<[1], [0], [0], [1], [0, 0, 1, 1], [], []>} : vector<256x96xf32>, vector<96x32xf32>, vector<256x32xf32> -> vector<256x32xf32>
    %65 = arith.addf %53, %64 : vector<256x32xf32>
    %66 = tpu.transpose %65, [1, 0] : vector<256x32xf32> -> vector<32x256xf32>
    %cst_35 = arith.constant dense<0.000000e+00> : vector<32xf32>
    %67 = vector.multi_reduction <add>, %66, %cst_35 [1] : vector<32x256xf32> to vector<32xf32>
    %68 = vector.shape_cast %67 : vector<32xf32> to vector<32x1xf32>
    %cst_36 = arith.constant 3.906250e-03 : f32
    %69 = vector.broadcast %cst_36 : f32 to vector<32x1xf32>
    %70 = arith.mulf %68, %69 : vector<32x1xf32>
    %71 = vector.broadcast %70 : vector<32x1xf32> to vector<32x256xf32>
    %72 = arith.subf %66, %71 : vector<32x256xf32>
    %73 = arith.mulf %72, %72 : vector<32x256xf32>
    %cst_37 = arith.constant dense<0.000000e+00> : vector<32xf32>
    %74 = vector.multi_reduction <add>, %73, %cst_37 [1] : vector<32x256xf32> to vector<32xf32>
    %75 = vector.shape_cast %74 : vector<32xf32> to vector<32x1xf32>
    %cst_38 = arith.constant 3.906250e-03 : f32
    %76 = vector.broadcast %cst_38 : f32 to vector<32x1xf32>
    %77 = arith.mulf %75, %76 : vector<32x1xf32>
    %cst_39 = arith.constant 9.99999974E-6 : f32
    %78 = vector.broadcast %cst_39 : f32 to vector<32x1xf32>
    %79 = arith.addf %77, %78 : vector<32x1xf32>
    %80 = math.rsqrt %79 : vector<32x1xf32>
    %81 = vector.broadcast %80 : vector<32x1xf32> to vector<32x256xf32>
    %82 = arith.mulf %72, %81 : vector<32x256xf32>
    %c0_40 = arith.constant 0 : index
    %83 = memref.load %arg7[%c0_40] : memref<1xf32, #tpu.memory_space<smem>>
    %cst_41 = arith.constant 0.000000e+00 : f32
    %84 = vector.broadcast %cst_41 : f32 to vector<32x256xf32>
    %85 = arith.cmpf ogt, %82, %84 : vector<32x256xf32>
    %86 = vector.broadcast %83 : f32 to vector<32x256xf32>
    %87 = arith.mulf %86, %82 : vector<32x256xf32>
    %88 = arith.select %85, %82, %87 : vector<32x256xi1>, vector<32x256xf32>
    %c0_42 = arith.constant 0 : index
    %c0_43 = arith.constant 0 : index
    %c0_44 = arith.constant 0 : index
    %89 = vector.load %arg8[%c0_42, %c0_43, %c0_44] : memref<1x32x256xf32, #tpu.memory_space<vmem>>, vector<1x32x256xf32>
    %90 = vector.shape_cast %89 : vector<1x32x256xf32> to vector<32x256xf32>
    %91 = vector.shape_cast %88 : vector<32x256xf32> to vector<1x32x256xf32>
    tpu.vector_store %arg8[%c0_42, %c0_43, %c0_44], %91 {strides = array<i32>} : memref<1x32x256xf32, #tpu.memory_space<vmem>>, vector<1x32x256xf32>,
    return
  }
  func.func @transform_0(%arg0: i32) -> (i32, i32, i32, i32) {
    %c0_i32 = arith.constant 0 : i32
    %c0_i32_0 = arith.constant 0 : i32
    %c0_i32_1 = arith.constant 0 : i32
    %c0_i32_2 = arith.constant 0 : i32
    return %arg0, %c0_i32, %c0_i32_0, %c0_i32_1 : i32, i32, i32, i32
  }
  func.func @transform_1(%arg0: i32) -> (i32, i32) {
    %c0_i32 = arith.constant 0 : i32
    %c0_i32_0 = arith.constant 0 : i32
    %c0_i32_1 = arith.constant 0 : i32
    return %c0_i32, %c0_i32_0 : i32, i32
  }
  func.func @transform_2(%arg0: i32) -> (i32, i32) {
    %c0_i32 = arith.constant 0 : i32
    %c0_i32_0 = arith.constant 0 : i32
    %c0_i32_1 = arith.constant 0 : i32
    return %c0_i32, %c0_i32_0 : i32, i32
  }
  func.func @transform_3(%arg0: i32) -> (i32, i32) {
    %c0_i32 = arith.constant 0 : i32
    %c0_i32_0 = arith.constant 0 : i32
    %c0_i32_1 = arith.constant 0 : i32
    return %c0_i32, %c0_i32_0 : i32, i32
  }
  func.func @transform_4(%arg0: i32) -> (i32, i32) {
    %c0_i32 = arith.constant 0 : i32
    %c0_i32_0 = arith.constant 0 : i32
    %c0_i32_1 = arith.constant 0 : i32
    return %c0_i32, %c0_i32_0 : i32, i32
  }
  func.func @transform_5(%arg0: i32) -> (i32, i32, i32) {
    %c0_i32 = arith.constant 0 : i32
    %c0_i32_0 = arith.constant 0 : i32
    %c0_i32_1 = arith.constant 0 : i32
    %c0_i32_2 = arith.constant 0 : i32
    return %c0_i32, %c0_i32_0, %c0_i32_1 : i32, i32, i32
  }
  func.func @transform_6(%arg0: i32) -> i32 {
    %c0_i32 = arith.constant 0 : i32
    %c0_i32_0 = arith.constant 0 : i32
    return %c0_i32 : i32
  }
  func.func @transform_7(%arg0: i32) -> (i32, i32, i32) {
    %c0_i32 = arith.constant 0 : i32
    %c0_i32_0 = arith.constant 0 : i32
    %c0_i32_1 = arith.constant 0 : i32
    return %arg0, %c0_i32, %c0_i32_0 : i32, i32, i32
  }
}

</mosaic_0001>

<bundles_post_ra>
// kernel: aggregation_forward.1
= control target key start
LH: loop header
LB: loop body
LE: loop exit
PB: predicated region body
PF: predicated region fallthrough
CT: control target
= control target key end

     0   :  { %s3360_s26 = smov 0   ;;  %s5654_s0 = inlined_call_operand.vmem [shape: f32[2,18,18,32], index: 0, kind: input, shape index: {}]   ;;  %s5655_s1 = inlined_call_operand.vmem [shape: f32[32,4], index: 1, kind: input, shape index: {}]   ;;  %s5656_s2 = inlined_call_operand.vmem [shape: f32[1,4], index: 2, kind: input, shape index: {}]   ;;  %s5657_s3 = inlined_call_operand.vmem [shape: f32[4,32], index: 3, kind: input, shape index: {}]   ;;  %s5658_s4 = inlined_call_operand.vmem [shape: f32[1,32], index: 4, kind: input, shape index: {}]   ;;  %s5659_s5 = inlined_call_operand.vmem [shape: f32[3,32,96], index: 5, kind: input, shape index: {}]   ;;  %s5660_s6 = inlined_call_operand.<no memory space> [shape: f32[1], index: 6, kind: input, shape index: {}]   ;;  %s5661_s7 = inlined_call_operand.vmem [shape: f32[2,32,256], index: 7, kind: output, shape index: {}]  }
   0x1   :  { %12 = sst [smem:[#allocation2]] %s5660_s6 }
   0x2 LB: > { %s2985_s27 = sadd.s32 4294967295, %s3313_s26   ;;  %p2989_p0 = scmp.ge.s32.totalorder %s3313_s26, 1  ;;  %s3313_s26 = sphi %s3360_s26, %s18_s26  }
   0x3   : > { %p238_p1 = scmp.lt.s32.totalorder %s3313_s26, 3 }
   0x5   : > { %p239_p2 = pnand %p2989_p0, %p238_p1 }
   0x7   : > { %242 = sbr.rel (%p239_p2) target bundleno = 1227 (0x4cb), region = 48 }
   0xc   : > { %p270_p3 = scmp.lt.s32.totalorder %s2985_s27, 1  ;;  %vm593_vm0 = vcmask 1046528   ;;  %s3315_s8 = smov 32   ;;  %vm313_vm1 = vcmask 261120   ;;  %vm770_vm2 = vcmask 1045504   ;;  %vm419_vm3 = vcmask 1043456  }
   0xd   : > { %s3316_s17 = smov 64   ;;  %vm415_vm4 = vcmask 31744   ;;  %vm470_vm5 = vcmask 523264   ;;  %vm1523_vm10 = vcmask 785408  }
   0xe   : > { %s5932_s27 = smov (!%p270_p3, %s2985_s27), 1 }
   0xf   : > { %s3247_s6 = smul.u32 432, %s5932_s27 }
  0x11   : > { %s3374_s30 = scalar_lea.vmem %s5654_s0, %s3247_s6 }
  0x12   : > { %v3377_v0 = vld [vmem:[%s3374_s30 + $0x30] sm:$0xff]  ;;  %v3380_v1 = vld [vmem:[%s3374_s30 + $0x38] sm:$0xff]  ;;  %v3383_v2 = vld [vmem:[%s3374_s30] sm:$0xff] }
  0x13   : > { %v604_v3 = vrot.slane %v3377_v0, 1  ;;  %v3387_v4 = vrot.slane %v3380_v1, 1  ;;  %v3390_v5 = vld [vmem:[%s3374_s30 + $0x8] sm:$0xff]  ;;  %v594_v6 = vrot.slane %v3383_v2, 1  ;;  %v3394_v7 = vld [vmem:[%s3374_s30 + $0x18] sm:$0xff]  ;;  %v3398_v9 = vld [vmem:[%s3374_s30 + $0x50] sm:$0xff] }
  0x14   : > { %v595_v8 = vrot.slane %v3390_v5, 1  ;;  %v3401_v10 = vld [vmem:[%s3374_s30 + $0x58] sm:$0x3]  ;;  %v3408_v12 = vld [vmem:[%s3374_s30 + $0x10] sm:$0x3]  ;;  %v3411_v13 = vld [vmem:[%s3374_s30 + $0x20] sm:$0xff] }
  0x15   : > { %5710 = vst [vmem:[#allocation3_spill] sm:$0xff] %v3387_v4  ;;  %v3405_v11 = vsel %vm593_vm0, %v604_v3, %v3387_v4  ;;  %v599_v14 = vrot.slane %v3394_v7, 1  ;;  %v3418_v16 = vrot.slane %v3411_v13, 1  ;;  %v3422_v17 = vrot.slane %v3398_v9, 1  ;;  %v3426_v19 = vld [vmem:[%s3374_s30 + $0x28] sm:$0x3] }
  0x16   : > { %5711 = vst [vmem:[#allocation4_spill] sm:$0xff] %v3405_v11  ;;  %682 = vrot.lane.b32.xlu0 %v3405_v11, %s3315_s8  ;;  %v596_v15 = vsel %vm593_vm0, %v594_v6, %v595_v8  ;;  %v612_v18 = vrot.slane %v3401_v10, 1  ;;  %v597_v20 = vrot.slane %v3408_v12, 1  ;;  %v602_v22 = vrot.slane %v3426_v19, 1  ;;  %v3439_v24 = vld [vmem:[%s3374_s30 + $0x78] sm:$0xff]  ;;  %v3442_v25 = vld [vmem:[%s3374_s30 + $0x80] sm:$0xff] }
  0x17   : > { %5712 = vst [vmem:[#allocation5_spill] sm:$0xff] %v3418_v16  ;;  %674 = vrot.lane.b32.xlu1 %v596_v15, %s3315_s8  ;;  %v3431_v21 = vsel %vm593_vm0, %v599_v14, %v3418_v16  ;;  %v2993_v27 = vld [vmem:[%s3374_s30 + $0x19] sm:$0xff]  ;;  %v2994_v28 = vld [vmem:[%s3374_s30 + $0x21] sm:$0xff]  ;;  %v2995_v29 = vld [vmem:[%s3374_s30 + $0x31] sm:$0xff]  ;;  %v619_v36 = vrot.slane %v3439_v24, 1  ;;  %v3461_v37 = vrot.slane %v3442_v25, 1 }
  0x18   : > { %5713 = vst [vmem:[#allocation6_spill] sm:$0xff] %v3422_v17  ;;  %678 = vrot.lane.b32.xlu2 %v3431_v21, %s3315_s8  ;;  %v613_v23 = vsel %vm593_vm0, %v3422_v17, %v612_v18  ;;  %v598_v26 = vsel %vm593_vm0, %v595_v8, %v597_v20  ;;  %v3449_v30 = vld [vmem:[%s3374_s30 + $0x40] sm:$0x3]  ;;  %v314_v32 = vsel %vm313_vm1, %v2993_v27, 0.0  ;;  %v603_v33 = vsel %vm593_vm0, %v3418_v16, %v602_v22  ;;  %v3464_v38 = vld [vmem:[%s3374_s30 + $0x48] sm:$0xff]  ;;  %v2998_v43 = vld [vmem:[%s3374_s30 + $0x51] sm:$0xff] }
  0x19   : > { %v2996_v31 = vld [vmem:[%s3374_s30 + $0x39] sm:$0xff]  ;;  %v315_v34 = vsel %vm313_vm1, %v2994_v28, 0.0  ;;  %v317_v35 = vsel %vm313_vm1, %v2995_v29, 0.0  ;;  %5714 = vst [vmem:[#allocation7_spill] sm:$0xff] %v3461_v37  ;;  %v2997_v39 = vld [vmem:[%s3374_s30 + $0x49] sm:$0xff]  ;;  %v607_v41 = vrot.slane %v3449_v30, 1  ;;  %v621_v47 = vsel %vm593_vm0, %v619_v36, %v3461_v37 }
  0x1a   : > { %v316_v40 = vadd.f32 %v315_v34, %v314_v32  ;;  %v319_v42 = vsel %vm313_vm1, %v2996_v31, 0.0  ;;  %v609_v45 = vrot.slane %v3464_v38, 1  ;;  %v321_v46 = vsel %vm313_vm1, %v2997_v39, 0.0  ;;  %v2999_v48 = vld [vmem:[%s3374_s30 + $0x61] sm:$0xff]  ;;  %v3479_v51 = vld [vmem:[%s3374_s30 + $0x98] sm:$0xff]  ;;  %v3000_v56 = vld [vmem:[%s3374_s30 + $0x69] sm:$0xff] }
  0x1b   : > { %v608_v50 = vsel %vm593_vm0, %v3387_v4, %v607_v41  ;;  %v3482_v52 = vld [vmem:[%s3374_s30 + $0xa0] sm:$0x3]  ;;  %v323_v53 = vsel %vm313_vm1, %v2998_v43, 0.0  ;;  %v3489_v55 = vld [vmem:[%s3374_s30 + $0x68] sm:$0xff]  ;;  %v325_v59 = vsel %vm313_vm1, %v2999_v48, 0.0  ;;  %v3500_v60 = vrot.slane %v3479_v51, 1 }
  0x1c   : > { %v318_v44 = vadd.f32 %v317_v35, %v316_v40  ;;  %v3486_v54 = vld [vmem:[%s3374_s30 + $0x60] sm:$0xff]  ;;  %v3495_v58 = vsel %vm593_vm0, %v609_v45, %v3422_v17  ;;  %v627_v61 = vrot.slane %v3482_v52, 1  ;;  %v3504_v62 = vld [vmem:[%s3374_s30 + $0x70] sm:$0x3]  ;;  %v3509_v8 = vrot.slane %v3489_v55, 1  ;;  %v3528_v31 = vld [vmem:[%s3374_s30 + $0xc8] sm:$0xff] }
  0x1d   : > { %5715 = vst [vmem:[#allocation8_spill] sm:$0xff] %v3495_v58  ;;  %v3001_v63 = vld [vmem:[%s3374_s30 + $0x79] sm:$0xff]  ;;  %v614_v6 = vrot.slane %v3486_v54, 1  ;;  %v327_v14 = vsel %vm313_vm1, %v3000_v56, 0.0  ;;  %v3002_v15 = vld [vmem:[%s3374_s30 + $0x81] sm:$0xff]  ;;  %v617_v20 = vrot.slane %v3504_v62, 1 }
  0x1e   : > { %688 = vrot.lane.b32.xlu0 %v613_v23, %s3315_s8  ;;  %v320_v49 = vadd.f32 %v319_v42, %v318_v44  ;;  %5716 = vst [vmem:[#allocation9_spill] sm:$0xff] %v3500_v60  ;;  %v329_v22 = vsel %vm313_vm1, %v3001_v63, 0.0  ;;  %v628_v23 = vsel %vm593_vm0, %v3500_v60, %v627_v61  ;;  %v3525_v29 = vld [vmem:[%s3374_s30 + $0xc0] sm:$0xff]  ;;  %v331_v32 = vsel %vm313_vm1, %v3002_v15, 0.0  ;;  %v3546_v42 = vld [vmem:[%s3374_s30 + $0x90] sm:$0xff] }
  0x1f   : > { %676 = vrot.lane.b32.xlu1 %v598_v26, %s3315_s8  ;;  %5717 = vst [vmem:[#allocation10_spill] sm:$0xff] %v3509_v8  ;;  %v3003_v26 = vld [vmem:[%s3374_s30 + $0x91] sm:$0xff]  ;;  %v3522_v28 = vsel %vm593_vm0, %v614_v6, %v3509_v8  ;;  %v3004_v34 = vld [vmem:[%s3374_s30 + $0x99] sm:$0xff]  ;;  %v618_v36 = vsel %vm593_vm0, %v3509_v8, %v617_v20  ;;  %v634_v40 = vrot.slane %v3525_v29, 1  ;;  %v3543_v41 = vrot.slane %v3528_v31, 1  ;;  %v3005_v43 = vld [vmem:[%s3374_s30 + $0xa9] sm:$0xff] }
  0x20   : > { %680 = vrot.lane.b32.xlu2 %v603_v33, %s3315_s8  ;;  %v322_v57 = vadd.f32 %v321_v46, %v320_v49  ;;  %5718 = vst [vmem:[#allocation11_spill] sm:$0xff] %v3522_v28  ;;  %v3532_v33 = vld [vmem:[%s3374_s30 + $0x88] sm:$0x3]  ;;  %v333_v39 = vsel %vm313_vm1, %v3003_v26, 0.0  ;;  %v335_v46 = vsel %vm313_vm1, %v3004_v34, 0.0  ;;  %v624_v49 = vrot.slane %v3546_v42, 1 }
  0x21   : > { %5719 = vst [vmem:[#allocation12_spill] sm:$0xff] %v3543_v41  ;;  %v622_v45 = vrot.slane %v3532_v33, 1  ;;  %v3007_v56 = vld [vmem:[%s3374_s30 + $0xc1] sm:$0xff]  ;;  %v3008_v15 = vld [vmem:[%s3374_s30 + $0xc9] sm:$0xff]  ;;  %v387_v34 = vld [vmem:[%s5655_s1 + $0x18] sm:$0xff] }
  0x22   : > { %v324_v3 = vadd.f32 %v323_v53, %v322_v57  ;;  %v3557_v53 = vsel %vm593_vm0, %v634_v40, %v3543_v41  ;;  %v3563_v61 = vld [vmem:[%s3374_s30 + $0xe0] sm:$0xff]  ;;  %v3566_v63 = vld [vmem:[%s3374_s30 + $0xe8] sm:$0x3]  ;;  %v3580_v20 = vsel %vm593_vm0, %v624_v49, %v3500_v60  ;;  %404 = vmatpush.msra.mxu0 %v387_v34  ;;  %v3688_v8 = vld [vmem:[%s3374_s30 + $0x150] sm:$0xff] }
  0x23   : > { %5720 = vst [vmem:[#allocation13_spill] sm:$0xff] %v3557_v53  ;;  %v3570_v6 = vld [vmem:[%s3374_s30 + $0xa8] sm:$0xff]  ;;  %v640_v26 = vrot.slane %v3563_v61, 1  ;;  %v3706_v17 = vld [vmem:[%s3374_s30 + $0x120] sm:$0xff] }
  0x24   : > { %v326_v18 = vadd.f32 %v325_v59, %v324_v3  ;;  %v623_v59 = vsel %vm593_vm0, %v3461_v37, %v622_v45  ;;  %5721 = vst [vmem:[#allocation14_spill] sm:$0xff] %v3580_v20  ;;  %v3010_v45 = vld [vmem:[%s3374_s30 + $0xe1] sm:$0xff] }
  0x26   : > { %694 = vrot.lane.b32.xlu0 %v621_v47, %s3315_s8  ;;  %v328_v27 = vadd.f32 %v327_v14, %v326_v18  ;;  %v3006_v47 = vld [vmem:[%s3374_s30 + $0xb1] sm:$0xff] }
  0x27   : > { %684 = vrot.lane.b32.xlu1 %v608_v50, %s3315_s8  ;;  %v337_v50 = vsel %vm313_vm1, %v3005_v43, 0.0  ;;  %v339_v3 = vsel %vm313_vm1, %v3006_v47, 0.0  ;;  %v3573_v14 = vld [vmem:[%s3374_s30 + $0xb0] sm:$0xff]  ;;  %v343_v43 = vsel %vm313_vm1, %v3008_v15, 0.0  ;;  %v347_v15 = vsel %vm313_vm1, %v3010_v45, 0.0 }
  0x28   : > { %686 = vrot.lane.b32.xlu2 %v3495_v58, %s3315_s8  ;;  %v330_v35 = vadd.f32 %v329_v22, %v328_v27  ;;  %v3009_v22 = vld [vmem:[%s3374_s30 + $0xd9] sm:$0xff]  ;;  %v642_v27 = vrot.slane %v3566_v63, 1  ;;  %v3598_v40 = vrot.slane %v3573_v14, 1 }
  0x29   : > { %v3691_v58 = vld [vmem:[%s3374_s30 + $0x158] sm:$0xff] }
  0x2a   : > { %v332_v44 = vadd.f32 %v331_v32, %v330_v35  ;;  %v3588_v32 = vld [vmem:[%s3374_s30 + $0xb8] sm:$0x3]  ;;  %v386_v35 = vld [vmem:[%s5655_s1 + $0x10] sm:$0xff]  ;;  %5722 = vst [vmem:[#allocation15_spill] sm:$0xff] %v3598_v40  ;;  %v643_v49 = vsel %vm593_vm0, %v640_v26, %v642_v27 }
  0x2b   : > { %v632_v47 = vrot.slane %v3588_v32, 1  ;;  %405 = vmatpush.msra.mxu0 %v386_v35 }
  0x2c   : > { %v334_v48 = vadd.f32 %v333_v39, %v332_v44  ;;  %v629_v39 = vrot.slane %v3570_v6, 1  ;;  %v385_v44 = vld [vmem:[%s5655_s1 + $0x8] sm:$0xff] }
  0x2d   : > { %406 = vmatpush.msra.mxu0 %v385_v44  ;;  %v633_v27 = vsel %vm593_vm0, %v3598_v40, %v632_v47  ;;  %v3013_v44 = vld [vmem:[%s3374_s30 + $0x109] sm:$0xff] }
  0x2e   : > { %700 = vrot.lane.b32.xlu0 %v628_v23, %s3315_s8  ;;  %v336_v57 = vadd.f32 %v335_v46, %v334_v48  ;;  %v341_v23 = vsel %vm313_vm1, %v3007_v56, 0.0  ;;  %v345_v48 = vsel %vm313_vm1, %v3009_v22, 0.0  ;;  %v3012_v22 = vld [vmem:[%s3374_s30 + $0xf9] sm:$0xff] }
  0x2f   : > { %690 = vrot.lane.b32.xlu1 %v3522_v28, %s3315_s8  ;;  %v351_v47 = vsel %vm313_vm1, %v3012_v22, 0.0  ;;  %v3654_v22 = vld [vmem:[%s3374_s30 + $0x128] sm:$0xff]  ;;  %v3720_v28 = vld [vmem:[%s3374_s30 + $0x170] sm:$0xff] }
  0x30   : > { %692 = vrot.lane.b32.xlu2 %v618_v36, %s3315_s8  ;;  %v338_v18 = vadd.f32 %v337_v50, %v336_v57  ;;  %v3011_v50 = vld [vmem:[%s3374_s30 + $0xf1] sm:$0xff]  ;;  %v3613_v57 = vsel %vm593_vm0, %v629_v39, %v3598_v40 }
  0x31   : > { %5723 = vst [vmem:[#allocation16_spill] sm:$0xff] %v3613_v57  ;;  %v349_v34 = vsel %vm313_vm1, %v3011_v50, 0.0  ;;  %v3635_v39 = vld [vmem:[%s3374_s30 + $0xd8] sm:$0xff] }
  0x32   : > { %v340_v36 = vadd.f32 %v339_v3, %v338_v18  ;;  %v3619_v3 = vld [vmem:[%s3374_s30 + $0x110] sm:$0xff]  ;;  %v639_v50 = vrot.slane %v3635_v39, 1 }
  0x33   : > { %v3623_v18 = vld [vmem:[%s3374_s30 + $0xd0] sm:$0x3]  ;;  %v5724_v37 = vrot.slane %v3619_v3, 1 }
  0x34   : > { %v342_v46 = vadd.f32 %v341_v23, %v340_v36  ;;  %v5665_v36 = vrot.slane %v3619_v3, 1 }
  0x36   : > { %706 = vrot.lane.b32.xlu0 %v3557_v53, %s3315_s8  ;;  %v344_v56 = vadd.f32 %v343_v43, %v342_v46  ;;  %v384_v43 = vld [vmem:[%s5655_s1] sm:$0xff]  ;;  %v637_v46 = vrot.slane %v3623_v18, 1 }
  0x37   : > { %696 = vrot.lane.b32.xlu1 %v623_v59, %s3315_s8  ;;  %v3616_v59 = vld [vmem:[%s3374_s30 + $0x108] sm:$0xff]  ;;  %407 = vmatpush.msra.mxu0 %v384_v43 }
  0x38   : > { %698 = vrot.lane.b32.xlu2 %v3580_v20, %s3315_s8  ;;  %v346_v23 = vadd.f32 %v345_v48, %v344_v56  ;;  %v649_v35 = vrot.slane %v3616_v59, 1  ;;  %v3014_v48 = vld [vmem:[%s3374_s30 + $0x111] sm:$0xff]  ;;  %v353_v56 = vsel %vm313_vm1, %v3013_v44, 0.0  ;;  %v638_v43 = vsel %vm593_vm0, %v3543_v41, %v637_v46  ;;  %v3016_v20 = vld [vmem:[%s3374_s30 + $0x129] sm:$0xff]  ;;  %v3017_v41 = vld [vmem:[%s3374_s30 + $0x139] sm:$0xff] }
  0x39   : > { %v3664_v44 = vld [vmem:[%s3374_s30 + $0xf8] sm:$0xff]  ;;  %v655_v46 = vrot.slane %v3654_v22, 1 }
  0x3a   : > { %v348_v45 = vadd.f32 %v347_v15, %v346_v23  ;;  %v651_v15 = vsel %vm593_vm0, %v649_v35, %v5665_v36  ;;  %v3015_v23 = vld [vmem:[%s3374_s30 + $0x121] sm:$0xff] }
  0x3b   : > { %v3674_v36 = vld [vmem:[%s3374_s30 + $0x100] sm:$0x3] }
  0x3e   : > { %712 = vrot.lane.b32.xlu0 %v643_v49, %s3315_s8  ;;  %v350_v49 = vadd.f32 %v349_v34, %v348_v45  ;;  %v355_v34 = vsel %vm313_vm1, %v3014_v48, 0.0  ;;  %v3661_v45 = vld [vmem:[%s3374_s30 + $0xf0] sm:$0xff] }
  0x3f   : > { %702 = vrot.lane.b32.xlu1 %v3613_v57, %s3315_s8 }
  0x40   : > { %704 = vrot.lane.b32.xlu2 %v633_v27, %s3315_s8  ;;  %v352_v40 = vadd.f32 %v351_v47, %v350_v49  ;;  %v3657_v27 = vld [vmem:[%s3374_s30 + $0x130] sm:$0x3]  ;;  %v641_v47 = vsel %vm593_vm0, %v639_v50, %v640_v26  ;;  %v357_v49 = vsel %vm313_vm1, %v3015_v23, 0.0  ;;  %v645_v26 = vrot.slane %v3664_v44, 1 }
  0x41   : > { %v657_v48 = vrot.slane %v3657_v27, 1  ;;  %v359_v50 = vsel %vm313_vm1, %v3016_v20, 0.0  ;;  %v647_v23 = vrot.slane %v3674_v36, 1 }
  0x42   : > { %v354_v35 = vadd.f32 %v353_v56, %v352_v40  ;;  %v644_v40 = vrot.slane %v3661_v45, 1  ;;  %v3018_v56 = vld [vmem:[%s3374_s30 + $0x141] sm:$0xff] }
  0x43   : > { %v658_v53 = vsel %vm593_vm0, %v655_v46, %v657_v48  ;;  %v363_v20 = vsel %vm313_vm1, %v3018_v56, 0.0  ;;  %v3021_v56 = vld [vmem:[%s3374_s30 + $0x169] sm:$0xff] }
  0x44   : > { %v356_v60 = vadd.f32 %v355_v34, %v354_v35  ;;  %v3019_v34 = vld [vmem:[%s3374_s30 + $0x151] sm:$0xff]  ;;  %v646_v57 = vsel %vm593_vm0, %v644_v40, %v645_v26  ;;  %v664_v40 = vrot.slane %v3688_v8, 1 }
  0x45   : > { %v365_v48 = vsel %vm313_vm1, %v3019_v34, 0.0  ;;  %v654_v34 = vrot.slane %v3706_v17, 1 }
  0x46   : > { %718 = vrot.lane.b32.xlu0 %v651_v15, %s3315_s8  ;;  %v358_v15 = vadd.f32 %v357_v49, %v356_v60  ;;  %v3695_v60 = vld [vmem:[%s3374_s30 + $0x118] sm:$0x3] }
  0x47   : > { %708 = vrot.lane.b32.xlu1 %v638_v43, %s3315_s8  ;;  %v361_v43 = vsel %vm313_vm1, %v3017_v41, 0.0  ;;  %v648_v41 = vsel %vm593_vm0, %v645_v26, %v647_v23 }
  0x48   : > { %710 = vrot.lane.b32.xlu2 %v641_v47, %s3315_s8  ;;  %v360_v35 = vadd.f32 %v359_v50, %v358_v15  ;;  %v3020_v47 = vld [vmem:[%s3374_s30 + $0x159] sm:$0xff]  ;;  %v665_v50 = vrot.slane %v3691_v58, 1 }
  0x49   : > { %v367_v26 = vsel %vm313_vm1, %v3020_v47, 0.0  ;;  %v3723_v47 = vld [vmem:[%s3374_s30 + $0x178] sm:$0x3] }
  0x4a   : > { %v362_v49 = vadd.f32 %v361_v43, %v360_v35  ;;  %v369_v43 = vsel %vm313_vm1, %v3021_v56, 0.0  ;;  %v666_v35 = vsel %vm593_vm0, %v664_v40, %v665_v50  ;;  %5725 = vst [vmem:[#allocation17_spill] sm:$0xff] %v3723_v47  ;;  %v3730_v56 = vld [vmem:[%s3374_s30 + $0x140] sm:$0xff] }
  0x4c   : > { %v364_v15 = vadd.f32 %v363_v20, %v362_v49  ;;  %v3023_v20 = vld [vmem:[%s3374_s30 + $0x181] sm:$0xff] }
  0x4d   : > { %v373_v40 = vsel %vm313_vm1, %v3023_v20, 0.0 }
  0x4e   : > { %724 = vrot.lane.b32.xlu0 %v658_v53, %s3315_s8  ;;  %v652_v53 = vrot.slane %v3695_v60, 1  ;;  %v366_v23 = vadd.f32 %v365_v48, %v364_v15  ;;  %v3727_v48 = vld [vmem:[%s3374_s30 + $0x138] sm:$0xff]  ;;  %v3024_v15 = vld [vmem:[%s3374_s30 + $0x189] sm:$0xff] }
  0x4f   : > { %714 = vrot.lane.b32.xlu1 %v646_v57, %s3315_s8  ;;  %v3022_v57 = vld [vmem:[%s3374_s30 + $0x171] sm:$0xff]  ;;  %v659_v4 = vrot.slane %v3727_v48, 1 }
  0x50   : > { %716 = vrot.lane.b32.xlu2 %v648_v41, %s3315_s8  ;;  %v368_v49 = vadd.f32 %v367_v26, %v366_v23  ;;  %v653_v11 = vsel %vm593_vm0, %v5724_v37, %v652_v53  ;;  %v371_v41 = vsel %vm313_vm1, %v3022_v57, 0.0  ;;  %v656_v26 = vsel %vm593_vm0, %v654_v34, %v655_v46  ;;  %v3740_v23 = vld [vmem:[%s3374_s30 + $0x148] sm:$0x3] }
  0x51   : > { %v670_v37 = vrot.slane %v3720_v28, 1  ;;  %v672_v53 = vrot.slane %v3723_v47, 1  ;;  %v662_v46 = vrot.slane %v3740_v23, 1 }
  0x52   : > { %v370_v16 = vadd.f32 %v369_v43, %v368_v49  ;;  %v660_v43 = vrot.slane %v3730_v56, 1 }
  0x54   : > { %v372_v57 = vadd.f32 %v371_v41, %v370_v16  ;;  %v661_v49 = vsel %vm593_vm0, %v659_v4, %v660_v43  ;;  %v3750_v41 = vld [vmem:[%s3374_s30 + $0x160] sm:$0x3]  ;;  %v663_v47 = vsel %vm593_vm0, %v660_v43, %v662_v46 }
  0x55   : > { %v667_v4 = vrot.slane %v3750_v41, 1 }
  0x56   : > { %730 = vrot.lane.b32.xlu0 %v666_v35, %s3315_s8  ;;  %v375_v35 = vsel %vm313_vm1, %v3024_v15, 0.0  ;;  %v374_v20 = vadd.f32 %v373_v40, %v372_v57  ;;  %v776_v40 = vrot.slane %v3394_v7, 2  ;;  %v3760_v57 = vld [vmem:[%s3374_s30 + $0x168] sm:$0xff] }
  0x57   : > { %720 = vrot.lane.b32.xlu1 %v653_v11, %s3315_s8  ;;  %v673_v11 = vsel %vm593_vm0, %v670_v37, %v672_v53  ;;  %v668_v7 = vsel %vm593_vm0, %v665_v50, %v667_v4 }
  0x58   : > { %722 = vrot.lane.b32.xlu2 %v656_v26, %s3315_s8  ;;  %v376_v34 = vadd.f32 %v375_v35, %v374_v20  ;;  %v3757_v26 = vrot.slane %v3411_v13, 2  ;;  %v669_v35 = vrot.slane %v3760_v57, 1 }
  0x5a   : > { %v377_v16 = vrot.slane %v376_v34, 4  ;;  %v3767_v43 = vsel %vm770_vm2, %v776_v40, %v3757_v26  ;;  %v671_v13 = vsel %vm593_vm0, %v669_v35, %v670_v37 }
  0x5c   : > { %v378_v15 = vadd.f32 %v377_v16, %v376_v34  ;;  %v784_v34 = vrot.slane %v3449_v30, 2  ;;  %v772_v16 = vrot.slane %v3390_v5, 2  ;;  %v3791_v5 = vrot.slane %v3489_v55, 2 }
  0x5d   : > { %v781_v30 = vrot.slane %v3377_v0, 2  ;;  %v3812_v0 = vrot.slane %v3442_v25, 2  ;;  %v786_v55 = vrot.slane %v3464_v38, 2  ;;  %v806_v38 = vrot.slane %v3570_v6, 2 }
  0x5e   : > { %736 = vrot.lane.b32.xlu0 %v673_v11, %s3315_s8  ;;  %v379_v53 = vrot.slane %v378_v15, 2 }
  0x5f   : > { %726 = vrot.lane.b32.xlu1 %v661_v49, %s3315_s8  ;;  %v771_v49 = vrot.slane %v3383_v2, 2  ;;  %v791_v2 = vrot.slane %v3486_v54, 2 }
  0x60   : > { %728 = vrot.lane.b32.xlu2 %v663_v47, %s3315_s8  ;;  %v380_v20 = vadd.f32 %v379_v53, %v378_v15  ;;  %v3775_v47 = vrot.slane %v3380_v1, 2  ;;  %v774_v15 = vrot.slane %v3408_v12, 2  ;;  %v779_v12 = vrot.slane %v3426_v19, 2 }
  0x61   : > { %v773_v40 = vsel %vm770_vm2, %v771_v49, %v772_v16  ;;  %v3798_v4 = vsel %vm770_vm2, %v791_v2, %v3791_v5  ;;  %v799_v19 = vrot.slane %v3532_v33, 2  ;;  %v794_v33 = vrot.slane %v3504_v62, 2 }
  0x62   : > { %v381_v46 = vrot.slane %v380_v20, 1  ;;  %v785_v37 = vsel %vm770_vm2, %v3775_v47, %v784_v34  ;;  %v775_v1 = vsel %vm770_vm2, %v772_v16, %v774_v15  ;;  %v780_v35 = vsel %vm770_vm2, %v3757_v26, %v779_v12 }
  0x63   : > { %v3808_v54 = vsel %vm770_vm2, %v781_v30, %v3775_v47  ;;  %v795_v16 = vsel %vm770_vm2, %v3791_v5, %v794_v33  ;;  %v3856_v62 = vrot.slane %v3528_v31, 2  ;;  %v3863_v15 = vrot.slane %v3479_v51, 2 }
  0x64   : > { %v382_v11 = vadd.f32 %v381_v46, %v380_v20  ;;  %v3817_v20 = vrot.slane %v3398_v9, 2  ;;  %v800_v46 = vsel %vm770_vm2, %v3812_v0, %v799_v19  ;;  %v821_v2 = vrot.slane %v3661_v45, 2 }
  0x65   : > { %v809_v30 = vrot.slane %v3588_v32, 2  ;;  %v811_v19 = vrot.slane %v3525_v29, 2  ;;  %v827_v32 = vrot.slane %v3619_v3, 2 }
  0x66   : > { %855 = vrot.lane.b32.xlu0 %v3767_v43, %s3316_s17  ;;  %v383_v50 = vmul.f32 0.00390625, %v382_v11  ;;  %v3828_v25 = vsel %vm770_vm2, %v786_v55, %v3817_v20  ;;  %v796_v11 = vrot.slane %v3439_v24, 2  ;;  %v814_v24 = vrot.slane %v3623_v18, 2 }
  0x67   : > { %732 = vrot.lane.b32.xlu1 %v668_v7, %s3315_s8  ;;  %v789_v7 = vrot.slane %v3401_v10, 2  ;;  %v3837_v10 = vrot.slane %v3573_v14, 2  ;;  %v3899_v45 = vsel %vm770_vm2, %v811_v19, %v3856_v62  ;;  %v832_v19 = vrot.slane %v3654_v22, 2 }
  0x68   : > { %734 = vrot.lane.b32.xlu2 %v671_v13, %s3315_s8  ;;  %3025 = vmatmul.msk.f32.vlgmr.msra.gmra.mxu0 %vm313_vm1, %v383_v50  ;;  %v798_v6 = vsel %vm770_vm2, %v796_v11, %v3812_v0  ;;  %v801_v50 = vrot.slane %v3546_v42, 2  ;;  %v819_v11 = vrot.slane %v3566_v63, 2  ;;  %v824_v63 = vrot.slane %v3674_v36, 2 }
  0x69   : > { %v790_v9 = vsel %vm770_vm2, %v3817_v20, %v789_v7  ;;  %v3844_v34 = vsel %vm770_vm2, %v806_v38, %v3837_v10  ;;  %v817_v38 = vrot.slane %v3563_v61, 2  ;;  %v836_v61 = vrot.slane %v3727_v48, 2 }
  0x6a   : > { %v3875_v18 = vsel %vm770_vm2, %v801_v50, %v3863_v15  ;;  %v842_v36 = vrot.slane %v3691_v58, 2  ;;  %v839_v22 = vrot.slane %v3740_v23, 2 }
  0x6e   : > { %861 = vrot.lane.b32.xlu0 %v785_v37, %s3316_s17 }
  0x6f   : > { %851 = vrot.lane.b32.xlu1 %v773_v40, %s3316_s17  ;;  %v804_v40 = vrot.slane %v3482_v52, 2  ;;  %v822_v52 = vrot.slane %v3664_v44, 2  ;;  %v829_v44 = vrot.slane %v3695_v60, 2  ;;  %v820_v60 = vsel %vm770_vm2, %v817_v38, %v819_v11  ;;  %v3964_v11 = vld [vmem:[%s3374_s30 + $0x40] sm:$0x3] }
  0x70   : > { %853 = vrot.lane.b32.xlu2 %v775_v1, %s3316_s17  ;;  %v815_v1 = vsel %vm770_vm2, %v3856_v62, %v814_v24  ;;  %v1115_v23 = vrot.slane %v3964_v11, 1 }
  0x71   : > { %v805_v51 = vsel %vm770_vm2, %v3863_v15, %v804_v40  ;;  %v823_v55 = vsel %vm770_vm2, %v821_v2, %v822_v52  ;;  %v826_v40 = vrot.slane %v3616_v59, 2  ;;  %v825_v2 = vsel %vm770_vm2, %v822_v52, %v824_v63 }
  0x72   : > { %v3800_v53 = vpop.permute.xlu2 %678  ;;  %v831_v59 = vrot.slane %v3706_v17, 2  ;;  %v834_v52 = vrot.slane %v3657_v27, 2  ;;  %v841_v27 = vrot.slane %v3688_v8, 2  ;;  %v846_v8 = vrot.slane %v3760_v57, 2 }
  0x73   : > { %5726 = vst [vmem:[#allocation18_spill] sm:$0xff] %v3800_v53  ;;  %v828_v48 = vsel %vm770_vm2, %v826_v40, %v827_v32  ;;  %v3271_v53 = vld [vmem:[%s3374_s30 + $0x38] sm:$0xff] }
  0x74   : > { %v833_v58 = vsel %vm770_vm2, %v831_v59, %v832_v19 }
  0x76   : > { %867 = vrot.lane.b32.xlu0 %v3798_v4, %s3316_s17 }
  0x77   : > { %857 = vrot.lane.b32.xlu1 %v780_v35, %s3316_s17 }
  0x78   : > { %859 = vrot.lane.b32.xlu2 %v3808_v54, %s3316_s17 }
  0x7a   : > { %v3824_v13 = vpop.permute.xlu2 %680 }
  0x7b   : > { %5727 = vst [vmem:[#allocation19_spill] sm:$0xff] %v3824_v13 }
  0x7e   : > { %873 = vrot.lane.b32.xlu0 %v800_v46, %s3316_s17  ;;  %v810_v46 = vsel %vm770_vm2, %v3837_v10, %v809_v30 }
  0x7f   : > { %863 = vrot.lane.b32.xlu1 %v3828_v25, %s3316_s17 }
  0x80   : > { %865 = vrot.lane.b32.xlu2 %v790_v9, %s3316_s17  ;;  %v816_v9 = vrot.slane %v3635_v39, 2  ;;  %v837_v39 = vrot.slane %v3730_v56, 2  ;;  %v844_v56 = vrot.slane %v3750_v41, 2  ;;  %v835_v41 = vsel %vm770_vm2, %v832_v19, %v834_v52  ;;  %v5750_v19 = vld [vmem:[#allocation5_spill] sm:$0xff] }
  0x82   : > { %v3846_v49 = vpop.permute.xlu2 %686  ;;  %v818_v3 = vsel %vm770_vm2, %v816_v9, %v817_v38  ;;  %v840_v38 = vsel %vm770_vm2, %v837_v39, %v839_v22 }
  0x83   : > { %5728 = vst [vmem:[#allocation20_spill] sm:$0xff] %v3846_v49 }
  0x86   : > { %879 = vrot.lane.b32.xlu0 %v3844_v34, %s3316_s17 }
  0x87   : > { %869 = vrot.lane.b32.xlu1 %v795_v16, %s3316_s17  ;;  %v830_v16 = vsel %vm770_vm2, %v827_v32, %v829_v44 }
  0x88   : > { %v3859_v14 = vpop.permute.xlu0 %682  ;;  %871 = vrot.lane.b32.xlu2 %v798_v6, %s3316_s17 }
  0x89   : > { %5729 = vst [vmem:[#allocation21_spill] sm:$0xff] %v3859_v14  ;;  %v3865_v37 = vpop.permute.xlu1 %674 }
  0x8a   : > { %5730 = vst [vmem:[#allocation22_spill] sm:$0xff] %v3865_v37  ;;  %v3871_v31 = vpop.permute.xlu2 %692 }
  0x8e   : > { %885 = vrot.lane.b32.xlu0 %v815_v1, %s3316_s17  ;;  %v838_v1 = vsel %vm770_vm2, %v836_v61, %v837_v39  ;;  %v5744_v39 = vld [vmem:[#allocation17_spill] sm:$0xff] }
  0x8f   : > { %875 = vrot.lane.b32.xlu1 %v3875_v18, %s3316_s17  ;;  %v849_v63 = vrot.slane %v5744_v39, 2  ;;  %v4021_v39 = vld [vmem:[%s3374_s30 + $0x58] sm:$0x3] }
  0x90   : > { %v3884_v12 = vpop.permute.xlu0 %688  ;;  %877 = vrot.lane.b32.xlu2 %v805_v51, %s3316_s17 }
  0x91   : > { %v3887_v35 = vpop.permute.xlu1 %676 }
  0x92   : > { %5731 = vst [vmem:[#allocation23_spill] sm:$0xff] %v3887_v35  ;;  %v3892_v7 = vpop.permute.xlu2 %698 }
  0x93   : > { %5732 = vst [vmem:[#allocation24_spill] sm:$0xff] %v3892_v7 }
  0x96   : > { %891 = vrot.lane.b32.xlu0 %v823_v55, %s3316_s17 }
  0x97   : > { %881 = vrot.lane.b32.xlu1 %v810_v46, %s3316_s17  ;;  %v845_v46 = vsel %vm770_vm2, %v842_v36, %v844_v56 }
  0x98   : > { %v3904_v29 = vpop.permute.xlu0 %694  ;;  %883 = vrot.lane.b32.xlu2 %v3899_v45, %s3316_s17 }
  0x99   : > { %v3908_v33 = vpop.permute.xlu1 %684 }
  0x9a   : > { %5733 = vst [vmem:[#allocation25_spill] sm:$0xff] %v3908_v33  ;;  %v3914_v6 = vpop.permute.xlu2 %704 }
  0x9b   : > { %5734 = vst [vmem:[#allocation26_spill] sm:$0xff] %v3914_v6 }
  0x9e   : > { %897 = vrot.lane.b32.xlu0 %v830_v16, %s3316_s17  ;;  %v843_v16 = vsel %vm770_vm2, %v841_v27, %v842_v36 }
  0x9f   : > { %887 = vrot.lane.b32.xlu1 %v818_v3, %s3316_s17 }
  0xa0   : > { %v3922_v24 = vpop.permute.xlu0 %700  ;;  %889 = vrot.lane.b32.xlu2 %v820_v60, %s3316_s17  ;;  %v847_v60 = vrot.slane %v3720_v28, 2 }
  0xa1   : > { %5735 = vst [vmem:[#allocation27_spill] sm:$0xff] %v3922_v24  ;;  %v3925_v50 = vpop.permute.xlu1 %690 }
  0xa2   : > { %v3930_v51 = vpop.permute.xlu2 %710  ;;  %v850_v28 = vsel %vm770_vm2, %v847_v60, %v849_v63  ;;  %v1120_v63 = vrot.slane %v4021_v39, 1 }
  0xa3   : > { %5736 = vst [vmem:[#allocation28_spill] sm:$0xff] %v3930_v51 }
  0xa6   : > { %903 = vrot.lane.b32.xlu0 %v838_v1, %s3316_s17 }
  0xa7   : > { %893 = vrot.lane.b32.xlu1 %v825_v2, %s3316_s17  ;;  %v848_v2 = vsel %vm770_vm2, %v846_v8, %v847_v60  ;;  %v413_v60 = vld [vmem:[%s5657_s3] sm:$0xf] }
  0xa8   : > { %v3938_v30 = vpop.permute.xlu0 %706  ;;  %895 = vrot.lane.b32.xlu2 %v828_v48, %s3316_s17  ;;  %v3985_v48 = vld [vmem:[%s3374_s30 + $0x28] sm:$0x3]  ;;  %3026 = vmatpush.msk.msra.mxu1 %vm419_vm3, %v413_v60 }
  0xa9   : > { %5737 = vst [vmem:[#allocation29_spill] sm:$0xff] %v3938_v30  ;;  %v3942_v55 = vpop.permute.xlu1 %696  ;;  %v1110_v36 = vrot.slane %v3985_v48, 1 }
  0xaa   : > { %v3947_v32 = vpop.permute.xlu2 %716 }
  0xab   : > { %5738 = vst [vmem:[#allocation30_spill] sm:$0xff] %v3947_v32  ;;  %v1111_v52 = vsel %vm593_vm0, %v5750_v19, %v1110_v36  ;;  %v4031_v36 = vld [vmem:[%s3374_s30 + $0x78] sm:$0xff] }
  0xae   : > { %909 = vrot.lane.b32.xlu0 %v845_v46, %s3316_s17  ;;  %v4001_v46 = vld [vmem:[%s3374_s30 + $0x88] sm:$0x3] }
  0xaf   : > { %899 = vrot.lane.b32.xlu1 %v833_v58, %s3316_s17  ;;  %v5751_v58 = vld [vmem:[#allocation11_spill] sm:$0xff] }
  0xb0   : > { %v3953_v17 = vpop.permute.xlu0 %712  ;;  %901 = vrot.lane.b32.xlu2 %v835_v41, %s3316_s17  ;;  %v1130_v41 = vrot.slane %v4001_v46, 1 }
  0xb1   : > { %5739 = vst [vmem:[#allocation31_spill] sm:$0xff] %v3953_v17  ;;  %v3956_v44 = vpop.permute.xlu1 %702 }
  0xb2   : > { %5740 = vst [vmem:[#allocation32_spill] sm:$0xff] %v3956_v44  ;;  %v3960_v9 = vpop.permute.xlu2 %722  ;;  %v4347_v44 = vld [vmem:[%s3374_s30 + $0x100] sm:$0x3] }
  0xb3   : > { %5741 = vst [vmem:[#allocation33_spill] sm:$0xff] %v3960_v9 }
  0xb6   : > { %1187 = vrot.lane.b32.xlu0 %v3431_v21, %s3315_s8  ;;  %v5745_v21 = vld [vmem:[#allocation3_spill] sm:$0xff] }
  0xb7   : > { %905 = vrot.lane.b32.xlu1 %v840_v38, %s3316_s17  ;;  %v1116_v40 = vsel %vm593_vm0, %v5745_v21, %v1115_v23  ;;  %v5754_v38 = vld [vmem:[#allocation4_spill] sm:$0xff]  ;;  %v3039_v21 = vld [vmem:[%s3374_s30 + $0x70] sm:$0x3] }
  0xb8   : > { %v3971_v3 = vpop.permute.xlu0 %718  ;;  %907 = vrot.lane.b32.xlu2 %v843_v16, %s3316_s17  ;;  %v5755_v16 = vld [vmem:[#allocation7_spill] sm:$0xff] }
  0xb9   : > { %5742 = vst [vmem:[#allocation34_spill] sm:$0xff] %v3971_v3  ;;  %v3975_v61 = vpop.permute.xlu1 %708  ;;  %v1131_v23 = vsel %vm593_vm0, %v5755_v16, %v1130_v41  ;;  %v1127_v41 = vrot.slane %v4031_v36, 1 }
  0xba   : > { %5743 = vst [vmem:[#allocation35_spill] sm:$0xff] %v3975_v61  ;;  %v3981_v1 = vpop.permute.xlu2 %728 }
  0xbb   : > { %5746 = vst [vmem:[#allocation17_spill] sm:$0xff] %v3981_v1 }
  0xbe   : > { %1193 = vrot.lane.b32.xlu0 %v1116_v40, %s3315_s8  ;;  %v5757_v40 = vld [vmem:[#allocation6_spill] sm:$0xff] }
  0xbf   : > { %911 = vrot.lane.b32.xlu1 %v848_v2, %s3316_s17  ;;  %v1121_v2 = vsel %vm593_vm0, %v5757_v40, %v1120_v63  ;;  %v5763_v63 = vld [vmem:[#allocation16_spill] sm:$0xff]  ;;  %v1129_v40 = vsel %vm593_vm0, %v1127_v41, %v5755_v16  ;;  %v5768_v41 = vld [vmem:[#allocation14_spill] sm:$0xff] }
  0xc0   : > { %v3990_v57 = vpop.permute.xlu0 %724  ;;  %913 = vrot.lane.b32.xlu2 %v850_v28, %s3316_s17  ;;  %v5758_v28 = vld [vmem:[#allocation8_spill] sm:$0xff] }
  0xc1   : > { %5747 = vst [vmem:[#allocation3_spill] sm:$0xff] %v3990_v57  ;;  %v3993_v56 = vpop.permute.xlu1 %714  ;;  %v5771_v57 = vld [vmem:[#allocation15_spill] sm:$0xff] }
  0xc2   : > { %5748 = vst [vmem:[#allocation36_spill] sm:$0xff] %v3993_v56  ;;  %v3996_v59 = vpop.permute.xlu2 %734 }
  0xc3   : > { %5749 = vst [vmem:[#allocation37_spill] sm:$0xff] %v3996_v59 }
  0xc6   : > { %1199 = vrot.lane.b32.xlu0 %v5751_v58, %s3315_s8 }
  0xc7   : > { %1189 = vrot.lane.b32.xlu1 %v1111_v52, %s3315_s8  ;;  %v1125_v52 = vrot.slane %v3039_v21, 1 }
  0xc8   : > { %v4007_v22 = vpop.permute.xlu0 %730  ;;  %1191 = vrot.lane.b32.xlu2 %v5754_v38, %s3315_s8 }
  0xc9   : > { %5752 = vst [vmem:[#allocation5_spill] sm:$0xff] %v4007_v22  ;;  %v4009_v27 = vpop.permute.xlu1 %720 }
  0xca   : > { %5753 = vst [vmem:[#allocation11_spill] sm:$0xff] %v4009_v27  ;;  %v4015_v8 = vpop.permute.xlu2 %853 }
  0xcb   : > { %5756 = vst [vmem:[#allocation4_spill] sm:$0xff] %v4015_v8 }
  0xce   : > { %1205 = vrot.lane.b32.xlu0 %v1131_v23, %s3315_s8  ;;  %v5762_v23 = vld [vmem:[#allocation10_spill] sm:$0xff] }
  0xcf   : > { %1195 = vrot.lane.b32.xlu1 %v5758_v28, %s3315_s8  ;;  %v1126_v60 = vsel %vm593_vm0, %v5762_v23, %v1125_v52  ;;  %v4049_v28 = vld [vmem:[%s3374_s30 + $0xa0] sm:$0x3]  ;;  %v5766_v52 = vld [vmem:[#allocation13_spill] sm:$0xff] }
  0xd0   : > { %v4033_v19 = vpop.permute.xlu0 %736  ;;  %1197 = vrot.lane.b32.xlu2 %v1121_v2, %s3315_s8  ;;  %v1135_v59 = vrot.slane %v4049_v28, 1  ;;  %v5767_v23 = vld [vmem:[#allocation9_spill] sm:$0xff] }
  0xd1   : > { %5759 = vst [vmem:[#allocation7_spill] sm:$0xff] %v4033_v19  ;;  %v4035_v58 = vpop.permute.xlu1 %726 }
  0xd2   : > { %5760 = vst [vmem:[#allocation6_spill] sm:$0xff] %v4035_v58  ;;  %v4039_v38 = vpop.permute.xlu2 %859  ;;  %v1136_v16 = vsel %vm593_vm0, %v5767_v23, %v1135_v59  ;;  %v388_v59 = vld [vmem:[%s5656_s2] sm:$0x1] }
  0xd3   : > { %5761 = vst [vmem:[#allocation8_spill] sm:$0xff] %v4039_v38  ;;  %v5797_v38 = vld [vmem:[#allocation12_spill] sm:$0xff] }
  0xd6   : > { %1211 = vrot.lane.b32.xlu0 %v5763_v63, %s3315_s8 }
  0xd7   : > { %1201 = vrot.lane.b32.xlu1 %v1126_v60, %s3315_s8  ;;  %v4066_v60 = vld [vmem:[%s3374_s30 + $0xb8] sm:$0x3] }
  0xd8   : > { %v4051_v19 = vpop.permute.xlu0 %855  ;;  %1203 = vrot.lane.b32.xlu2 %v1129_v40, %s3315_s8  ;;  %v1140_v40 = vrot.slane %v4066_v60, 1 }
  0xd9   : > { %5764 = vst [vmem:[#allocation10_spill] sm:$0xff] %v4051_v19  ;;  %v4053_v2 = vpop.permute.xlu1 %732 }
  0xda   : > { %5765 = vst [vmem:[#allocation16_spill] sm:$0xff] %v4053_v2  ;;  %v4057_v22 = vpop.permute.xlu2 %865  ;;  %v1301_v2 = vrot.slane %v3039_v21, 2  ;;  %v1141_v21 = vsel %vm593_vm0, %v5771_v57, %v1140_v40  ;;  %v1286_v40 = vrot.slane %v3985_v48, 2  ;;  %v1291_v48 = vrot.slane %v3964_v11, 2 }
  0xde   : > { %1215 = vrot.lane.b32.xlu0 %v5766_v52, %s3315_s8  ;;  %v1302_v52 = vsel %vm770_vm2, %v3791_v5, %v1301_v2  ;;  %v1303_v5 = vrot.slane %v4031_v36, 2 }
  0xdf   : > { %1207 = vrot.lane.b32.xlu1 %v5768_v41, %s3315_s8 }
  0xe0   : > { %v4068_v63 = vpop.permute.xlu0 %861  ;;  %1209 = vrot.lane.b32.xlu2 %v1136_v16, %s3315_s8  ;;  %v1305_v57 = vsel %vm770_vm2, %v1303_v5, %v3812_v0 }
  0xe1   : > { %5769 = vst [vmem:[#allocation13_spill] sm:$0xff] %v4068_v63  ;;  %v4070_v1 = vpop.permute.xlu1 %851  ;;  %v4258_v63 = vld [vmem:[%s3374_s30 + $0xe0] sm:$0xff] }
  0xe2   : > { %5770 = vst [vmem:[#allocation9_spill] sm:$0xff] %v4070_v1  ;;  %v4074_v58 = vpop.permute.xlu2 %871 }
  0xe5   : > { %v409_v16 = vpop.f32.mrf.mxu0 }
  0xe6   : > { %2159 = vrot.lane.b32.xlu0 %v5768_v41, %s3315_s8  ;;  %v410_v27 = vadd.f32 %v409_v16, %v388_v59  ;;  %v3162_v16 = vld [vmem:[%s3374_s30 + $0xa0] sm:$0x3] }
  0xe7   : > { %1377 = vrot.lane.b32.xlu1 %v1302_v52, %s3316_s17 }
  0xe8   : > { %v4086_v9 = vpop.permute.xlu0 %867  ;;  %1213 = vrot.lane.b32.xlu2 %v1141_v21, %s3315_s8  ;;  %v412_v2 = vmax.f32 %v410_v27, 0.0  ;;  %v1306_v27 = vrot.slane %v4001_v46, 2  ;;  %v1287_v21 = vsel %vm770_vm2, %v3757_v26, %v1286_v40  ;;  %v2086_v46 = vrot.slane %v3162_v16, 1  ;;  %v3165_v40 = vld [vmem:[%s3374_s30 + $0xb8] sm:$0x3] }
  0xe9   : > { %v4088_v3 = vpop.permute.xlu1 %857  ;;  %v1292_v26 = vsel %vm770_vm2, %v3775_v47, %v1291_v48  ;;  %v2262_v47 = vrot.slane %v3162_v16, 2  ;;  %v2267_v49 = vrot.slane %v3165_v40, 2 }
  0xea   : > { %5772 = vst [vmem:[#allocation14_spill] sm:$0xff] %v4088_v3  ;;  %v4092_v32 = vpop.permute.xlu2 %877  ;;  %3027 = vmatmul.msk.f32.vlgmr.msra.gmra.mxu1 %vm415_vm4, %v412_v2  ;;  %v3270_v3 = vld [vmem:[%s3374_s30 + $0x18] sm:$0xff] }
  0xeb   : > { %5773 = vst [vmem:[#allocation15_spill] sm:$0xff] %v4092_v32 }
  0xee   : > { %2335 = vrot.lane.b32.xlu0 %v3875_v18, %s3316_s17 }
  0xef   : > { %1363 = vrot.lane.b32.xlu1 %v3767_v43, %s3316_s17  ;;  %v1307_v43 = vsel %vm770_vm2, %v3812_v0, %v1306_v27  ;;  %v2087_v0 = vsel %vm593_vm0, %v5767_v23, %v2086_v46  ;;  %v2091_v27 = vrot.slane %v3165_v40, 1 }
  0xf0   : > { %v4100_v41 = vpop.permute.xlu0 %873  ;;  %1379 = vrot.lane.b32.xlu2 %v1305_v57, %s3316_s17 }
  0xf1   : > { %v4103_v52 = vpop.permute.xlu1 %863 }
  0xf2   : > { %5774 = vst [vmem:[#allocation38_spill] sm:$0xff] %v4103_v52  ;;  %v4107_v59 = vpop.permute.xlu2 %883 }
  0xf3   : > { %5775 = vst [vmem:[#allocation39_spill] sm:$0xff] %v4107_v59 }
  0xf6   : > { %1383 = vrot.lane.b32.xlu0 %v3875_v18, %s3316_s17  ;;  %v4130_v18 = vld [vmem:[%s3374_s30 + $0xb0] sm:$0xff] }
  0xf7   : > { %1365 = vrot.lane.b32.xlu1 %v1287_v21, %s3316_s17  ;;  %v2089_v11 = vrot.slane %v4130_v18, 1  ;;  %v4137_v21 = vld [vmem:[%s3374_s30 + $0xa8] sm:$0xff]  ;;  %v2265_v16 = vrot.slane %v4130_v18, 2 }
  0xf8   : > { %v4118_v5 = vpop.permute.xlu0 %879  ;;  %1381 = vrot.lane.b32.xlu2 %v1307_v43, %s3316_s17  ;;  %v2088_v23 = vrot.slane %v4137_v21, 1 }
  0xf9   : > { %5776 = vst [vmem:[#allocation40_spill] sm:$0xff] %v4118_v5  ;;  %v4120_v2 = vpop.permute.xlu1 %869  ;;  %v2092_v46 = vsel %vm593_vm0, %v2089_v11, %v2091_v27  ;;  %v3272_v5 = vld [vmem:[%s3374_s30 + $0x30] sm:$0xff] }
  0xfa   : > { %v4125_v57 = vpop.permute.xlu2 %889  ;;  %v2090_v52 = vsel %vm593_vm0, %v2088_v23, %v2089_v11 }
  0xfb   : > { %5777 = vst [vmem:[#allocation41_spill] sm:$0xff] %v4125_v57  ;;  %v4255_v57 = vld [vmem:[%s3374_s30 + $0xd8] sm:$0xff] }
  0xfc   : > { %5796 = vst [vmem:[#allocation60_spill] sm:$0xff] %v4255_v57  ;;  %v2098_v33 = vrot.slane %v4255_v57, 1 }
  0xfe   : > { %1369 = vrot.lane.b32.xlu0 %v1292_v26, %s3316_s17 }
  0xff   : > { %2161 = vrot.lane.b32.xlu1 %v2087_v0, %s3315_s8  ;;  %v2263_v0 = vsel %vm770_vm2, %v3863_v15, %v2262_v47  ;;  %v2264_v47 = vrot.slane %v4137_v21, 2 }
 0x100   : > { %v4139_v43 = vpop.permute.xlu0 %885  ;;  %1367 = vrot.lane.b32.xlu2 %v3808_v54, %s3316_s17  ;;  %v1311_v54 = vrot.slane %v4049_v28, 2  ;;  %v1316_v28 = vrot.slane %v4066_v60, 2 }
 0x101   : > { %5778 = vst [vmem:[#allocation42_spill] sm:$0xff] %v4139_v43  ;;  %v4141_v48 = vpop.permute.xlu1 %875  ;;  %v2266_v40 = vsel %vm770_vm2, %v2264_v47, %v2265_v16 }
 0x102   : > { %5779 = vst [vmem:[#allocation43_spill] sm:$0xff] %v4141_v48  ;;  %v4147_v26 = vpop.permute.xlu2 %895  ;;  %v1312_v23 = vsel %vm770_vm2, %v3863_v15, %v1311_v54  ;;  %v4181_v15 = vld [vmem:[%s3374_s30 + $0xc0] sm:$0xff]  ;;  %v4184_v54 = vld [vmem:[%s3374_s30 + $0xc8] sm:$0xff] }
 0x103   : > { %5780 = vst [vmem:[#allocation44_spill] sm:$0xff] %v4147_v26  ;;  %v5681_v47 = vrot.slane %v4184_v54, 1  ;;  %v4433_v48 = vld [vmem:[%s3374_s30 + $0x68] sm:$0xff] }
 0x106   : > { %2165 = vrot.lane.b32.xlu0 %v2092_v46, %s3315_s8  ;;  %v2268_v46 = vsel %vm770_vm2, %v2265_v16, %v2267_v49  ;;  %v1317_v49 = vsel %vm770_vm2, %v3837_v10, %v1316_v28  ;;  %v2093_v16 = vrot.slane %v4181_v15, 1  ;;  %v1296_v10 = vrot.slane %v4021_v39, 2 }
 0x107   : > { %2337 = vrot.lane.b32.xlu1 %v2263_v0, %s3316_s17  ;;  %v5682_v39 = vrot.slane %v4184_v54, 2 }
 0x108   : > { %v4155_v56 = vpop.permute.xlu0 %891  ;;  %2163 = vrot.lane.b32.xlu2 %v2090_v52, %s3315_s8 }
 0x109   : > { %5781 = vst [vmem:[#allocation45_spill] sm:$0xff] %v4155_v56  ;;  %v4158_v27 = vpop.permute.xlu1 %881  ;;  %v3051_v56 = vld [vmem:[%s3374_s30 + $0xd0] sm:$0x3] }
 0x10a   : > { %5782 = vst [vmem:[#allocation46_spill] sm:$0xff] %v4158_v27  ;;  %v4163_v11 = vpop.permute.xlu2 %901  ;;  %v1145_v17 = vrot.slane %v3051_v56, 1 }
 0x10b   : > { %5783 = vst [vmem:[#allocation47_spill] sm:$0xff] %v4163_v11 }
 0x10c   : > { %v1146_v51 = vsel %vm593_vm0, %v5797_v38, %v1145_v17 }
 0x10e   : > { %2341 = vrot.lane.b32.xlu0 %v2268_v46, %s3316_s17 }
 0x10f   : > { %1385 = vrot.lane.b32.xlu1 %v1312_v23, %s3316_s17  ;;  %v2095_v23 = vsel %vm593_vm0, %v2093_v16, %v5681_v47 }
 0x110   : > { %v4171_v0 = vpop.permute.xlu0 %897  ;;  %2339 = vrot.lane.b32.xlu2 %v2266_v40, %s3316_s17 }
 0x111   : > { %5784 = vst [vmem:[#allocation48_spill] sm:$0xff] %v4171_v0  ;;  %v4173_v52 = vpop.permute.xlu1 %887 }
 0x112   : > { %5785 = vst [vmem:[#allocation49_spill] sm:$0xff] %v4173_v52  ;;  %v4178_v11 = vpop.permute.xlu2 %907  ;;  %v4262_v52 = vrot.slane %v4258_v63, 1 }
 0x113   : > { %5786 = vst [vmem:[#allocation50_spill] sm:$0xff] %v4178_v11 }
 0x114   : > { %v2100_v14 = vsel %vm593_vm0, %v2098_v33, %v4262_v52 }
 0x116   : > { %1389 = vrot.lane.b32.xlu0 %v1317_v49, %s3316_s17 }
 0x117   : > { %1371 = vrot.lane.b32.xlu1 %v3828_v25, %s3316_s17  ;;  %v1297_v25 = vsel %vm770_vm2, %v3817_v20, %v1296_v10 }
 0x118   : > { %v4189_v60 = vpop.permute.xlu0 %903  ;;  %1387 = vrot.lane.b32.xlu2 %v3844_v34, %s3316_s17  ;;  %v2269_v34 = vrot.slane %v4181_v15, 2 }
 0x119   : > { %5787 = vst [vmem:[#allocation51_spill] sm:$0xff] %v4189_v60  ;;  %v4193_v46 = vpop.permute.xlu1 %893 }
 0x11a   : > { %5788 = vst [vmem:[#allocation52_spill] sm:$0xff] %v4193_v46  ;;  %v4201_v40 = vpop.permute.xlu2 %913  ;;  %v2271_v16 = vsel %vm770_vm2, %v2269_v34, %v5682_v39 }
 0x11b   : > { %5789 = vst [vmem:[#allocation53_spill] sm:$0xff] %v4201_v40 }
 0x11e   : > { %1375 = vrot.lane.b32.xlu0 %v3798_v4, %s3316_s17 }
 0x11f   : > { %2167 = vrot.lane.b32.xlu1 %v2095_v23, %s3315_s8 }
 0x120   : > { %v4208_v28 = vpop.permute.xlu0 %909  ;;  %1373 = vrot.lane.b32.xlu2 %v1297_v25, %s3316_s17 }
 0x121   : > { %5790 = vst [vmem:[#allocation54_spill] sm:$0xff] %v4208_v28  ;;  %v4212_v49 = vpop.permute.xlu1 %899 }
 0x122   : > { %5791 = vst [vmem:[#allocation55_spill] sm:$0xff] %v4212_v49  ;;  %v1192_v4 = vpop.permute.xlu2 %1191 }
 0x126   : > { %1217 = vrot.lane.b32.xlu0 %v1146_v51, %s3315_s8 }
 0x127   : > { %2343 = vrot.lane.b32.xlu1 %v2271_v16, %s3316_s17 }
 0x128   : > { %v1188_v20 = vpop.permute.xlu0 %1187 }
 0x129   : > { %v4219_v10 = vpop.permute.xlu1 %905  ;;  %v1459_v13 = vsel %vm313_vm1, %v3270_v3, %v1188_v20  ;;  %v3168_v3 = vld [vmem:[%s3374_s30 + $0xd0] sm:$0x3] }
 0x12a   : > { %5792 = vst [vmem:[#allocation56_spill] sm:$0xff] %v4219_v10  ;;  %v4223_v23 = vpop.permute.xlu2 %1197  ;;  %v2272_v35 = vrot.slane %v3168_v3, 2 }
 0x12b   : > { %5793 = vst [vmem:[#allocation57_spill] sm:$0xff] %v4223_v23 }
 0x12f   : > { %1391 = vrot.lane.b32.xlu1 %v3899_v45, %s3316_s17 }
 0x130   : > { %v1194_v47 = vpop.permute.xlu0 %1193 }
 0x131   : > { %v4225_v40 = vpop.permute.xlu1 %911  ;;  %v1462_v30 = vsel %vm313_vm1, %v3271_v53, %v1194_v47  ;;  %v4307_v53 = vrot.slane %v4258_v63, 2 }
 0x132   : > { %5794 = vst [vmem:[#allocation58_spill] sm:$0xff] %v4225_v40  ;;  %v4231_v39 = vpop.permute.xlu2 %1203 }
 0x137   : > { %2171 = vrot.lane.b32.xlu1 %v2100_v14, %s3315_s8 }
 0x138   : > { %v4227_v25 = vpop.permute.xlu0 %1199 }
 0x139   : > { %5795 = vst [vmem:[#allocation59_spill] sm:$0xff] %v4227_v25  ;;  %v4229_v34 = vpop.permute.xlu1 %1189  ;;  %v2106_v25 = vrot.slane %v4347_v44, 1 }
 0x13a   : > { %v4237_v11 = vpop.permute.xlu2 %1209 }
 0x13f   : > { %1219 = vrot.lane.b32.xlu1 %v2100_v14, %s3315_s8 }
 0x140   : > { %v4233_v16 = vpop.permute.xlu0 %1205 }
 0x141   : > { %v4235_v28 = vpop.permute.xlu1 %1195 }
 0x142   : > { %v4243_v60 = vpop.permute.xlu2 %1213 }
 0x148   : > { %v4239_v45 = vpop.permute.xlu0 %1211 }
 0x149   : > { %v4241_v10 = vpop.permute.xlu1 %1201 }
 0x14a   : > { %v4249_v0 = vpop.permute.xlu2 %1379 }
 0x150   : > { %v4245_v40 = vpop.permute.xlu0 %1215 }
 0x151   : > { %v4247_v49 = vpop.permute.xlu1 %1207 }
 0x152   : > { %v1382_v38 = vpop.permute.xlu2 %1381 }
 0x158   : > { %v2160_v26 = vpop.permute.xlu0 %2159 }
 0x159   : > { %v4251_v46 = vpop.permute.xlu1 %1377  ;;  %v2423_v43 = vsel %vm313_vm1, %v3546_v42, %v2160_v26  ;;  %v414_v42 = vld [vmem:[%s5658_s4] sm:$0x1] }
 0x15a   : > { %v1368_v19 = vpop.permute.xlu2 %1367 }
 0x160   : > { %v2336_v61 = vpop.permute.xlu0 %2335 }
 0x161   : > { %v4275_v59 = vsel %vm470_vm5, %v2423_v43, %v2336_v61  ;;  %v1364_v17 = vpop.permute.xlu1 %1363  ;;  %v2096_v61 = vrot.slane %v3168_v3, 1  ;;  %v1321_v3 = vrot.slane %v3051_v56, 2 }
 0x162   : > { %v4278_v33 = vsel %vm470_vm5, %v1459_v13, %v1364_v17  ;;  %v5798_v13 = vrot.slane %v4184_v54, 1  ;;  %v4310_v47 = vpop.permute.xlu2 %2163 }
 0x164   : > { %v2097_v17 = vsel %vm593_vm0, %v5798_v13, %v2096_v61  ;;  %v5799_v61 = vrot.slane %v4184_v54, 2  ;;  %v3171_v13 = vld [vmem:[%s3374_s30 + $0xe8] sm:$0x3] }
 0x165   : > { %2169 = vrot.lane.b32.xlu2 %v2097_v17, %s3315_s8  ;;  %v1322_v17 = vsel %vm770_vm2, %v3856_v62, %v1321_v3  ;;  %v1467_v3 = vsel %vm313_vm1, %v4031_v36, %v4231_v39  ;;  %v2101_v1 = vrot.slane %v3171_v13, 1 }
 0x166   : > { %v4357_v39 = vsel %vm470_vm5, %v1467_v3, %v4249_v0 }
 0x167   : > { %v440_v43 = vpop.f32.mrf.mxu1  ;;  %v2102_v36 = vsel %vm593_vm0, %v4262_v52, %v2101_v1 }
 0x168   : > { %v4284_v51 = vpop.permute.xlu0 %1383  ;;  %v441_v20 = vadd.f32 %v440_v43, %v414_v42  ;;  %v1461_v42 = vsel %vm313_vm1, %v3272_v5, %v1192_v4 }
 0x169   : > { %v4287_v26 = vpop.permute.xlu1 %1365  ;;  %v4313_v5 = vsel %vm470_vm5, %v1461_v42, %v1368_v19 }
 0x16a   : > { %v443_v14 = vsub.f32 0.0, %v441_v20  ;;  %v2273_v20 = vsel %vm770_vm2, %v5799_v61, %v2272_v35  ;;  %v4327_v61 = vld [vmem:[%s3374_s30 + $0x80] sm:$0xff]  ;;  %v4332_v56 = vpop.permute.xlu2 %2339 }
 0x16c   : > { %v444_v27 = vmul.f32 1.442695, %v443_v14  ;;  %v3054_v14 = vld [vmem:[%s3374_s30 + $0xe8] sm:$0x3] }
 0x16d   : > { %2345 = vrot.lane.b32.xlu2 %v2273_v20, %s3316_s17  ;;  %v1326_v19 = vrot.slane %v3054_v14, 2  ;;  %v1468_v20 = vsel %vm313_vm1, %v4327_v61, %v4233_v16  ;;  %v4344_v16 = vld [vmem:[%s3374_s30 + $0xf8] sm:$0xff] }
 0x16e   : > { %3258 = vpow2.f32 %v444_v27  ;;  %v2277_v27 = vrot.slane %v3171_v13, 2  ;;  %v4350_v32 = vrot.slane %v4344_v16, 1  ;;  %v4363_v13 = vld [vmem:[%s3374_s30 + $0xa8] sm:$0xff] }
 0x16f   : > { %v1327_v42 = vsel %vm770_vm2, %v4307_v53, %v1326_v19  ;;  %5800 = vst [vmem:[#allocation12_spill] sm:$0xff] %v4363_v13 }
 0x170   : > { %v1370_v8 = vpop.permute.xlu0 %1369 }
 0x171   : > { %v4295_v6 = vpop.permute.xlu1 %2161  ;;  %v4300_v43 = vsel %vm470_vm5, %v1462_v30, %v1370_v8  ;;  %v2278_v30 = vsel %vm770_vm2, %v4307_v53, %v2277_v27 }
 0x172   : > { %2349 = vrot.lane.b32.xlu1 %v2278_v30, %s3316_s17  ;;  %v1388_v3 = vpop.permute.xlu2 %1387 }
 0x174   : > { %v3259_v8 = vpop.eup %3258 }
 0x175   : > { %v446_v35 = vadd.f32 1.0, %v3259_v8  ;;  %1393 = vrot.lane.b32.xlu2 %v1322_v17, %s3316_s17  ;;  %v4341_v17 = vsel %vm470_vm5, %v1468_v20, %v1382_v38  ;;  %v2107_v38 = vsel %vm593_vm0, %v4350_v32, %v2106_v25  ;;  %v1471_v20 = vsel %vm313_vm1, %v4363_v13, %v4239_v45  ;;  %v4372_v25 = vld [vmem:[%s3374_s30 + $0x98] sm:$0xff] }
 0x177   : > { %3260 = vrcp.f32 %v446_v35  ;;  %v458_v37 = vand.u32 2147483648, %v446_v35  ;;  %vm452_vm7 = vweird.f32 %v446_v35 }
 0x178   : > { %v4335_v27 = vpop.permute.xlu0 %2165 }
 0x179   : > { %v4318_v4 = vpop.permute.xlu1 %2337  ;;  %v459_v1 = vor.u32 1.1754944e-38, %v458_v37  ;;  %v1150_v37 = vrot.slane %v3054_v14, 1  ;;  %v4402_v14 = vld [vmem:[%s3374_s30 + $0xb0] sm:$0xff] }
 0x17a   : > { %1397 = vrot.lane.b32.xlu1 %v1327_v42, %s3316_s17  ;;  %v456_v42 = vand.u32 2147483647, %v446_v35  ;;  %5802 = vst [vmem:[#allocation62_spill] sm:$0xff] %v4402_v14 }
 0x17c   : > { %vm457_vm9 = vcmp.eq.f32.partialorder %v456_v42, 8.507059e+37 }
 0x17d   : > { %v3261_v62 = vpop.eup %3260  ;;  %2173 = vrot.lane.b32.xlu2 %v2102_v36, %s3315_s8  ;;  %v1470_v36 = vsel %vm313_vm1, %v4372_v25, %v4237_v11  ;;  %v1151_v11 = vsel %vm593_vm0, %v4262_v52, %v1150_v37  ;;  %v4408_v52 = vld [vmem:[%s3374_s30 + $0xf0] sm:$0xff] }
 0x17e   : > { %v448_v30 = vmul.f32 %v3261_v62, %v446_v35  ;;  %vm453_vm6 = vweird.f32 %v3261_v62  ;;  %v4382_v35 = vsel %vm470_vm5, %v1471_v20, %v1388_v3  ;;  %v4417_v3 = vld [vmem:[%s3374_s30 + $0x108] sm:$0xff] }
 0x17f   : > { %vm454_vm8 = vmor %vm452_vm7, %vm453_vm6  ;;  %5801 = vst [vmem:[#allocation61_spill] sm:$0xff] %v4382_v35  ;;  %v1466_v35 = vsel %vm313_vm1, %v4433_v48, %v4241_v10 }
 0x180   : > { %v449_v19 = vsub.f32 1.0, %v448_v30  ;;  %5803 = vst [vmem:[#allocation63_spill] sm:$0xff] %v4417_v3 }
 0x181   : > { %v1386_v8 = vpop.permute.xlu1 %1385 }
 0x182   : > { %v450_v24 = vmul.f32 %v3261_v62, %v449_v19  ;;  %2177 = vrot.lane.b32.xlu1 %v2107_v38, %s3315_s8  ;;  %v4393_v38 = vsel %vm470_vm5, %v1470_v36, %v1386_v8  ;;  %v2279_v8 = vrot.slane %v4408_v52, 2  ;;  %v4420_v36 = vld [vmem:[%s3374_s30 + $0x110] sm:$0xff] }
 0x183   : > { %5804 = vst [vmem:[#allocation64_spill] sm:$0xff] %v4420_v36 }
 0x184   : > { %v451_v30 = vadd.f32 %v3261_v62, %v450_v24  ;;  %v4377_v24 = vpop.permute.xlu0 %2341 }
 0x185   : > { %1221 = vrot.lane.b32.xlu2 %v1151_v11, %s3315_s8  ;;  %v2285_v11 = vrot.slane %v4420_v36, 2 }
 0x186   : > { %v455_v0 = vsel %vm454_vm8, %v3261_v62, %v451_v30  ;;  %v4387_v62 = vld [vmem:[%s3374_s30 + $0x100] sm:$0x3] }
 0x187   : > { %v4379_v45 = vsel %vm457_vm9, %v459_v1, %v455_v0  ;;  %v1155_v42 = vrot.slane %v4387_v62, 1  ;;  %v1472_v1 = vsel %vm313_vm1, %v4402_v14, %v4243_v60  ;;  %v4414_v0 = vrot.slane %v4344_v16, 2 }
 0x188   : > { %463 = vrot.lane.b32.xlu0 %v4379_v45, %s3315_s8  ;;  %v2284_v60 = vrot.slane %v4417_v3, 2 }
 0x189   : > { %v4369_v19 = vpop.permute.xlu1 %1371  ;;  %v1156_v20 = vsel %vm593_vm0, %v4350_v32, %v1155_v42  ;;  %v2274_v42 = vrot.slane %v4255_v57, 2 }
 0x18a   : > { %1225 = vrot.lane.b32.xlu1 %v1156_v20, %s3315_s8  ;;  %v2281_v20 = vsel %vm770_vm2, %v2279_v8, %v4414_v0  ;;  %v2286_v13 = vsel %vm770_vm2, %v2284_v60, %v2285_v11  ;;  %v4450_v8 = vld [vmem:[%s3374_s30 + $0xc0] sm:$0xff]  ;;  %v4472_v60 = vrot.slane %v4420_v36, 1 }
 0x18b   : > { %v2276_v7 = vsel %vm770_vm2, %v2274_v42, %v4307_v53  ;;  %5806 = vst [vmem:[#allocation66_spill] sm:$0xff] %v4450_v8  ;;  %v1473_v10 = vsel %vm313_vm1, %v4450_v8, %v4245_v40  ;;  %v2108_v40 = vrot.slane %v4417_v3, 1 }
 0x18c   : > { %v1390_v37 = vpop.permute.xlu0 %1389 }
 0x18d   : > { %v4428_v14 = vsel %vm470_vm5, %v1472_v1, %v1390_v37  ;;  %2351 = vrot.lane.b32.xlu2 %v2281_v20, %s3316_s17  ;;  %v4445_v1 = vsel %vm470_vm5, %v1466_v35, %v4251_v46  ;;  %v4456_v37 = vld [vmem:[%s3374_s30 + $0x90] sm:$0xff] }
 0x18e   : > { %5805 = vst [vmem:[#allocation65_spill] sm:$0xff] %v4428_v14  ;;  %v1469_v53 = vsel %vm313_vm1, %v4456_v37, %v4247_v49  ;;  %v2103_v49 = vrot.slane %v4408_v52, 1 }
 0x18f   : > { %5807 = vst [vmem:[#allocation67_spill] sm:$0xff] %v4456_v37  ;;  %v4464_v35 = vsel %vm470_vm5, %v1469_v53, %v4284_v51 }
 0x190   : > { %466 = vrot.lane.b32.xlu0 %v4379_v45, %s3316_s17  ;;  %v2105_v51 = vsel %vm593_vm0, %v2103_v49, %v4350_v32  ;;  %v3177_v32 = vld [vmem:[%s3374_s30 + $0x118] sm:$0x3]  ;;  %v2282_v49 = vrot.slane %v4347_v44, 2 }
 0x191   : > { %v4399_v30 = vpop.permute.xlu1 %2167 }
 0x192   : > { %2355 = vrot.lane.b32.xlu1 %v2286_v13, %s3316_s17 }
 0x194   : > { %v4546_v14 = vpop.permute.xlu0 %1375 }
 0x195   : > { %1399 = vrot.lane.b32.xlu2 %v2281_v20, %s3316_s17  ;;  %v4482_v20 = vld [vmem:[%s3374_s30 + $0x120] sm:$0xff]  ;;  %5814 = vst [vmem:[#allocation74_spill] sm:$0xff] %v4546_v14 }
 0x196   : > { %5809 = vst [vmem:[#allocation69_spill] sm:$0xff] %v4482_v20 }
 0x198   : > { %2347 = vrot.lane.b32.xlu0 %v2276_v7, %s3316_s17 }
 0x199   : > { %v4441_v23 = vpop.permute.xlu1 %2343 }
 0x19a   : > { %1403 = vrot.lane.b32.xlu1 %v2286_v13, %s3316_s17  ;;  %v2110_v13 = vsel %vm593_vm0, %v2108_v40, %v4472_v60  ;;  %v2287_v40 = vrot.slane %v3177_v32, 2 }
 0x19c   : > { %v2288_v8 = vsel %vm770_vm2, %v2285_v11, %v2287_v40  ;;  %v4518_v40 = vpop.permute.xlu2 %1373 }
 0x19d   : > { %2179 = vrot.lane.b32.xlu2 %v2110_v13, %s3315_s8  ;;  %5811 = vst [vmem:[#allocation71_spill] sm:$0xff] %v4518_v40 }
 0x1a0   : > { %1395 = vrot.lane.b32.xlu0 %v2276_v7, %s3316_s17  ;;  %v4485_v7 = vld [vmem:[%s3374_s30 + $0x128] sm:$0xff] }
 0x1a1   : > { %v1392_v46 = vpop.permute.xlu1 %1391  ;;  %5810 = vst [vmem:[#allocation70_spill] sm:$0xff] %v4485_v7  ;;  %v4489_v53 = vrot.slane %v4485_v7, 1  ;;  %v4509_v44 = vrot.slane %v4485_v7, 2 }
 0x1a2   : > { %v4467_v42 = vsel %vm470_vm5, %v1473_v10, %v1392_v46  ;;  %v2113_v10 = vrot.slane %v4482_v20, 1 }
 0x1a3   : > { %5808 = vst [vmem:[#allocation68_spill] sm:$0xff] %v4467_v42  ;;  %v2426_v42 = vsel %vm313_vm1, %v4130_v18, %v4335_v27  ;;  %v1331_v27 = vrot.slane %v4387_v62, 2  ;;  %v3063_v62 = vld [vmem:[%s3374_s30 + $0x130] sm:$0x3] }
 0x1a4   : > { %v2115_v46 = vsel %vm593_vm0, %v2113_v10, %v4489_v53  ;;  %v3060_v10 = vld [vmem:[%s3374_s30 + $0x118] sm:$0x3] }
 0x1a5   : > { %1227 = vrot.lane.b32.xlu2 %v2110_v13, %s3315_s8  ;;  %2183 = vrot.lane.b32.xlu1 %v2115_v46, %s3315_s8  ;;  %v2283_v13 = vsel %vm770_vm2, %v4414_v0, %v2282_v49  ;;  %v1336_v18 = vrot.slane %v3060_v10, 2  ;;  %v1160_v36 = vrot.slane %v3060_v10, 1 }
 0x1a8   : > { %2175 = vrot.lane.b32.xlu0 %v2105_v51, %s3315_s8 }
 0x1ad   : > { %2357 = vrot.lane.b32.xlu2 %v2288_v8, %s3316_s17  ;;  %1231 = vrot.lane.b32.xlu1 %v2115_v46, %s3315_s8  ;;  %v4513_v8 = vsel %vm470_vm5, %v2426_v42, %v4377_v24  ;;  %v1337_v46 = vsel %vm770_vm2, %v2285_v11, %v1336_v18  ;;  %v1332_v24 = vsel %vm770_vm2, %v4414_v0, %v1331_v27  ;;  %v4528_v42 = vld [vmem:[%s3374_s30 + $0x30] sm:$0xff]  ;;  %v2111_v11 = vrot.slane %v3177_v32, 1 }
 0x1ae   : > { %5812 = vst [vmem:[#allocation72_spill] sm:$0xff] %v4528_v42  ;;  %v2063_v18 = vrot.slane %v4528_v42, 1  ;;  %v2239_v27 = vrot.slane %v4528_v42, 2  ;;  %v4569_v42 = vpop.permute.xlu1 %2171 }
 0x1af   : > { %v2112_v32 = vsel %vm593_vm0, %v4472_v60, %v2111_v11  ;;  %v4554_v11 = vld [vmem:[%s3374_s30 + $0x138] sm:$0xff]  ;;  %5817 = vst [vmem:[#allocation77_spill] sm:$0xff] %v4569_v42 }
 0x1b0   : > { %1223 = vrot.lane.b32.xlu0 %v2105_v51, %s3315_s8  ;;  %v2289_v51 = vrot.slane %v4482_v20, 2  ;;  %5815 = vst [vmem:[#allocation75_spill] sm:$0xff] %v4554_v11  ;;  %v2294_v42 = vrot.slane %v4554_v11, 2 }
 0x1b2   : > { %v2291_v49 = vsel %vm770_vm2, %v2289_v51, %v4509_v44  ;;  %v1165_v51 = vrot.slane %v3063_v62, 1 }
 0x1b4   : > { %v1166_v0 = vsel %vm593_vm0, %v4489_v53, %v1165_v51 }
 0x1b5   : > { %1405 = vrot.lane.b32.xlu2 %v1337_v46, %s3316_s17  ;;  %1407 = vrot.lane.b32.xlu1 %v2291_v49, %s3316_s17 }
 0x1b8   : > { %2353 = vrot.lane.b32.xlu0 %v2283_v13, %s3316_s17  ;;  %v4531_v13 = vld [vmem:[%s3374_s30 + $0x38] sm:$0xff] }
 0x1b9   : > { %5813 = vst [vmem:[#allocation73_spill] sm:$0xff] %v4531_v13  ;;  %v2064_v7 = vrot.slane %v4531_v13, 1 }
 0x1bb   : > { %v2065_v46 = vsel %vm593_vm0, %v2063_v18, %v2064_v7  ;;  %v1341_v18 = vrot.slane %v3063_v62, 2  ;;  %v1161_v62 = vsel %vm593_vm0, %v4472_v60, %v1160_v36  ;;  %v4578_v60 = vld [vmem:[%s3374_s30 + $0xc8] sm:$0xff] }
 0x1bc   : > { %5819 = vst [vmem:[#allocation79_spill] sm:$0xff] %v4578_v60 }
 0x1bd   : > { %2143 = vrot.lane.b32.xlu2 %v2065_v46, %s3315_s8  ;;  %1233 = vrot.lane.b32.xlu1 %v1166_v0, %s3315_s8  ;;  %v1342_v46 = vsel %vm770_vm2, %v4509_v44, %v1341_v18 }
 0x1bf   : > { %v2170_v20 = vpop.permute.xlu2 %2169 }
 0x1c0   : > { %1401 = vrot.lane.b32.xlu0 %v1332_v24, %s3316_s17  ;;  %v2240_v24 = vrot.slane %v4531_v13, 2  ;;  %v2428_v10 = vsel %vm313_vm1, %v4184_v54, %v2170_v20 }
 0x1c2   : > { %v2241_v51 = vsel %vm770_vm2, %v2239_v27, %v2240_v24  ;;  %v2118_v27 = vrot.slane %v4554_v11, 1 }
 0x1c5   : > { %2319 = vrot.lane.b32.xlu2 %v2241_v51, %s3316_s17  ;;  %1409 = vrot.lane.b32.xlu1 %v1342_v46, %s3316_s17  ;;  %v3150_v51 = vld [vmem:[%s3374_s30 + $0x40] sm:$0x3]  ;;  %v1218_v46 = vpop.permute.xlu0 %1217 }
 0x1c6   : > { %v2066_v13 = vrot.slane %v3150_v51, 1  ;;  %v1474_v20 = vsel %vm313_vm1, %v4578_v60, %v1218_v46 }
 0x1c7   : > { %v2346_v0 = vpop.permute.xlu2 %2345 }
 0x1c8   : > { %2181 = vrot.lane.b32.xlu0 %v2112_v32, %s3315_s8  ;;  %v4557_v32 = vld [vmem:[%s3374_s30 + $0x140] sm:$0xff]  ;;  %v4572_v14 = vsel %vm470_vm5, %v2428_v10, %v2346_v0  ;;  %v2067_v54 = vsel %vm593_vm0, %v2064_v7, %v2066_v13  ;;  %v2242_v10 = vrot.slane %v3150_v51, 2 }
 0x1c9   : > { %5816 = vst [vmem:[#allocation76_spill] sm:$0xff] %v4557_v32  ;;  %v4565_v18 = vrot.slane %v4557_v32, 1  ;;  %v4587_v0 = vrot.slane %v4557_v32, 2  ;;  %v4600_v32 = vpop.permute.xlu1 %1219 }
 0x1ca   : > { %5818 = vst [vmem:[#allocation78_spill] sm:$0xff] %v4572_v14  ;;  %v2243_v46 = vsel %vm770_vm2, %v2240_v24, %v2242_v10  ;;  %v4613_v24 = vld [vmem:[%s3374_s30 + $0x48] sm:$0xff]  ;;  %v1475_v37 = vsel %vm313_vm1, %v4255_v57, %v4600_v32  ;;  %v480_v32 = vld [vmem:[%s5659_s5 + $0x40] sm:$0xff]  ;;  %v4815_v57 = vld [vmem:[%s3374_s30 + $0x170] sm:$0xff] }
 0x1cb   : > { %v2120_v36 = vsel %vm593_vm0, %v2118_v27, %v4565_v18  ;;  %v2296_v27 = vsel %vm770_vm2, %v2294_v42, %v4587_v0  ;;  %5823 = vst [vmem:[#allocation83_spill] sm:$0xff] %v4613_v24  ;;  %v2068_v51 = vrot.slane %v4613_v24, 1  ;;  %v477_v14 = vld [vmem:[%s5659_s5 + $0x28] sm:$0xff] }
 0x1cd   : > { %2145 = vrot.lane.b32.xlu2 %v2067_v54, %s3315_s8  ;;  %1235 = vrot.lane.b32.xlu1 %v2120_v36, %s3315_s8  ;;  %v2427_v54 = vsel %vm313_vm1, %v4181_v15, %v4399_v30  ;;  %v4616_v15 = vld [vmem:[%s3374_s30 + $0x50] sm:$0xff] }
 0x1ce   : > { %v4609_v42 = vsel %vm470_vm5, %v2427_v54, %v4441_v23  ;;  %5824 = vst [vmem:[#allocation84_spill] sm:$0xff] %v4616_v15 }
 0x1cf   : > { %v1394_v40 = vpop.permute.xlu2 %1393  ;;  %5822 = vst [vmem:[#allocation82_spill] sm:$0xff] %v4609_v42 }
 0x1d0   : > { %1229 = vrot.lane.b32.xlu0 %v1161_v62, %s3315_s8  ;;  %v3180_v62 = vld [vmem:[%s3374_s30 + $0x130] sm:$0x3]  ;;  %v4590_v7 = vsel %vm470_vm5, %v1474_v20, %v1394_v40  ;;  %v2069_v20 = vrot.slane %v4616_v15, 1 }
 0x1d1   : > { %5820 = vst [vmem:[#allocation80_spill] sm:$0xff] %v4590_v7  ;;  %v2116_v13 = vrot.slane %v3180_v62, 1  ;;  %v2292_v30 = vrot.slane %v3180_v62, 2 }
 0x1d2   : > { %v2070_v10 = vsel %vm593_vm0, %v2068_v51, %v2069_v20  ;;  %v2245_v51 = vrot.slane %v4616_v15, 2 }
 0x1d3   : > { %v2117_v40 = vsel %vm593_vm0, %v4489_v53, %v2116_v13  ;;  %v3066_v53 = vld [vmem:[%s3374_s30 + $0x148] sm:$0x3]  ;;  %v2293_v23 = vsel %vm770_vm2, %v4509_v44, %v2292_v30 }
 0x1d4   : > { %v1346_v11 = vrot.slane %v3066_v53, 2 }
 0x1d5   : > { %2321 = vrot.lane.b32.xlu2 %v2243_v46, %s3316_s17  ;;  %1411 = vrot.lane.b32.xlu1 %v2296_v27, %s3316_s17  ;;  %v1170_v46 = vrot.slane %v3066_v53, 1 }
 0x1d7   : > { %v1171_v62 = vsel %vm593_vm0, %v4565_v18, %v1170_v46 }
 0x1d8   : > { %2359 = vrot.lane.b32.xlu0 %v2291_v49, %s3316_s17  ;;  %v4605_v49 = vpop.permute.xlu2 %2173 }
 0x1d9   : > { %5821 = vst [vmem:[#allocation81_spill] sm:$0xff] %v4605_v49 }
 0x1dd   : > { %2147 = vrot.lane.b32.xlu2 %v2070_v10, %s3315_s8  ;;  %1237 = vrot.lane.b32.xlu1 %v1171_v62, %s3315_s8  ;;  %v4644_v62 = vld [vmem:[%s3374_s30 + $0x150] sm:$0xff] }
 0x1de   : > { %5827 = vst [vmem:[#allocation87_spill] sm:$0xff] %v4644_v62  ;;  %v2123_v53 = vrot.slane %v4644_v62, 1 }
 0x1e0   : > { %2185 = vrot.lane.b32.xlu0 %v2117_v40, %s3315_s8  ;;  %v1222_v13 = vpop.permute.xlu2 %1221  ;;  %v2244_v40 = vrot.slane %v4613_v24, 2 }
 0x1e1   : > { %v1476_v46 = vsel %vm313_vm1, %v4258_v63, %v1222_v13  ;;  %v3183_v13 = vld [vmem:[%s3374_s30 + $0x148] sm:$0x3] }
 0x1e2   : > { %v2246_v44 = vsel %vm770_vm2, %v2244_v40, %v2245_v51  ;;  %v4647_v40 = vld [vmem:[%s3374_s30 + $0x158] sm:$0xff] }
 0x1e3   : > { %5828 = vst [vmem:[#allocation88_spill] sm:$0xff] %v4647_v40  ;;  %v4655_v63 = vrot.slane %v4647_v40, 1 }
 0x1e4   : > { %v4625_v54 = vpop.permute.xlu1 %2349 }
 0x1e5   : > { %5825 = vst [vmem:[#allocation85_spill] sm:$0xff] %v4625_v54  ;;  %2323 = vrot.lane.b32.xlu2 %v2246_v44, %s3316_s17  ;;  %v3153_v44 = vld [vmem:[%s3374_s30 + $0x58] sm:$0x3] }
 0x1e6   : > { %v2071_v24 = vrot.slane %v3153_v44, 1  ;;  %v2247_v60 = vrot.slane %v3153_v44, 2 }
 0x1e8   : > { %2361 = vrot.lane.b32.xlu0 %v2293_v23, %s3316_s17  ;;  %v4635_v30 = vpop.permute.xlu2 %2351  ;;  %v1347_v23 = vsel %vm770_vm2, %v4587_v0, %v1346_v11 }
 0x1e9   : > { %5826 = vst [vmem:[#allocation86_spill] sm:$0xff] %v4635_v30  ;;  %1413 = vrot.lane.b32.xlu1 %v1347_v23, %s3316_s17 }
 0x1ec   : > { %v1398_v10 = vpop.permute.xlu1 %1397 }
 0x1ed   : > { %v4651_v15 = vsel %vm470_vm5, %v1476_v46, %v1398_v10  ;;  %v4667_v10 = vsel %vm593_vm0, %v2123_v53, %v4655_v63  ;;  %v2121_v46 = vrot.slane %v3183_v13, 1 }
 0x1ee   : > { %5829 = vst [vmem:[#allocation89_spill] sm:$0xff] %v4651_v15 }
 0x1f0   : > { %2187 = vrot.lane.b32.xlu0 %v2120_v36, %s3315_s8  ;;  %v2072_v36 = vsel %vm593_vm0, %v2069_v20, %v2071_v24  ;;  %v4660_v11 = vpop.permute.xlu2 %1399  ;;  %v2299_v24 = vrot.slane %v4644_v62, 2  ;;  %v4673_v20 = vrot.slane %v4647_v40, 2  ;;  %v2297_v40 = vrot.slane %v3183_v13, 2  ;;  %v483_v13 = vld [vmem:[%s5659_s5 + $0x58] sm:$0xff] }
 0x1f1   : > { %2149 = vrot.lane.b32.xlu2 %v2072_v36, %s3315_s8  ;;  %1239 = vrot.lane.b32.xlu1 %v4667_v10, %s3315_s8  ;;  %v2122_v36 = vsel %vm593_vm0, %v4565_v18, %v2121_v46  ;;  %v475_v46 = vld [vmem:[%s5659_s5 + $0x18] sm:$0xff] }
 0x1f2   : > { %v4686_v44 = vsel %vm770_vm2, %v2299_v24, %v4673_v20 }
 0x1f4   : > { %v4662_v23 = vpop.permute.xlu1 %2177 }
 0x1f5   : > { %5830 = vst [vmem:[#allocation90_spill] sm:$0xff] %v4662_v23 }
 0x1f8   : > { %2363 = vrot.lane.b32.xlu0 %v2296_v27, %s3316_s17  ;;  %v2248_v27 = vsel %vm770_vm2, %v2245_v51, %v2247_v60  ;;  %v4679_v53 = vpop.permute.xlu2 %2179  ;;  %v479_v51 = vld [vmem:[%s5659_s5 + $0x38] sm:$0xff] }
 0x1f9   : > { %2325 = vrot.lane.b32.xlu2 %v2248_v27, %s3316_s17  ;;  %5831 = vst [vmem:[#allocation91_spill] sm:$0xff] %v4679_v53  ;;  %1415 = vrot.lane.b32.xlu1 %v4686_v44, %s3316_s17  ;;  %v4706_v27 = vld [vmem:[%s3374_s30 + $0x68] sm:$0xff] }
 0x1fa   : > { %v464_v15 = vpop.permute.xlu0 %463  ;;  %v5704_v53 = vrot.slane %v4706_v27, 1 }
 0x1fb   : > { %v469_v18 = vsel %vm313_vm1, %v4379_v45, %v464_v15  ;;  %v2298_v15 = vsel %vm770_vm2, %v4587_v0, %v2297_v40  ;;  %v3069_v40 = vld [vmem:[%s3374_s30 + $0x160] sm:$0x3] }
 0x1fc   : > { %v4681_v23 = vpop.permute.xlu1 %1225 }
 0x200   : > { %2189 = vrot.lane.b32.xlu0 %v2122_v36, %s3315_s8  ;;  %v4703_v36 = vld [vmem:[%s3374_s30 + $0x60] sm:$0xff]  ;;  %v1228_v0 = vpop.permute.xlu2 %1227 }
 0x201   : > { %5832 = vst [vmem:[#allocation92_spill] sm:$0xff] %v4703_v36  ;;  %v2073_v62 = vrot.slane %v4703_v36, 1 }
 0x202   : > { %v467_v60 = vpop.permute.xlu0 %466 }
 0x203   : > { %v471_v24 = vsel %vm470_vm5, %v469_v18, %v467_v60 }
 0x204   : > { %v4708_v45 = vperm.slane %v471_v24, 0  ;;  %v4721_v7 = vpop.permute.xlu1 %2355  ;;  %v478_v24 = vld [vmem:[%s5659_s5 + $0x30] sm:$0xff] }
 0x205   : > { %5833 = vst [vmem:[#allocation93_spill] sm:$0xff] %v4721_v7 }
 0x206   : > { %v492_v18 = vmul.f32 %v4708_v45, %v479_v51  ;;  %v4716_v60 = vmul.f32 %v4708_v45, %v475_v46  ;;  %v4719_v30 = vmul.f32 %v4708_v45, %v483_v13  ;;  %v474_v51 = vld [vmem:[%s5659_s5 + $0x10] sm:$0xff]  ;;  %v1175_v46 = vrot.slane %v3069_v40, 1 }
 0x207   : > { %v482_v13 = vld [vmem:[%s5659_s5 + $0x50] sm:$0xff]  ;;  %v491_v54 = vmul.f32 %v4708_v45, %v478_v24  ;;  %v487_v49 = vmul.f32 %v4708_v45, %v474_v51  ;;  %v481_v51 = vld [vmem:[%s5659_s5 + $0x48] sm:$0xff] }
 0x208   : > { %2365 = vrot.lane.b32.xlu0 %v2298_v15, %s3316_s17  ;;  %3076 = vmatpush.xpose.msk.msrb.mxu0 %vm1523_vm10, %v492_v18  ;;  %v2075_v15 = vsel %vm593_vm0, %v2073_v62, %v5704_v53  ;;  %v2249_v62 = vrot.slane %v4703_v36, 2  ;;  %v5707_v53 = vrot.slane %v4706_v27, 2  ;;  %v4758_v24 = vmul.f32 %v4708_v45, %v482_v13 }
 0x209   : > { %3235 = vmatpush.xpose.msk.msra.mxu2 %vm1523_vm10, %v492_v18  ;;  %3239 = vmatpush.xpose.msk.msra.mxu3 %vm1523_vm10, %v4716_v60  ;;  %v1176_v18 = vsel %vm593_vm0, %v4655_v63, %v1175_v46  ;;  %v473_v46 = vld [vmem:[%s5659_s5 + $0x8] sm:$0xff] }
 0x20a   : > { %3243 = vmatpush.xpose.msk.msrb.mxu1 %vm1523_vm10, %v4719_v30  ;;  %v4743_v7 = vpop.permute.xlu0 %2347  ;;  %2151 = vrot.lane.b32.xlu2 %v2075_v15, %s3315_s8  ;;  %v490_v15 = vmul.f32 %v4708_v45, %v477_v14  ;;  %v486_v13 = vmul.f32 %v4708_v45, %v473_v46  ;;  %v2251_v36 = vsel %vm770_vm2, %v2249_v62, %v5707_v53  ;;  %v1351_v62 = vrot.slane %v3069_v40, 2 }
 0x20b   : > { %5834 = vst [vmem:[#allocation94_spill] sm:$0xff] %v4743_v7  ;;  %1241 = vrot.lane.b32.xlu1 %v1176_v18, %s3315_s8  ;;  %v476_v18 = vld [vmem:[%s5659_s5 + $0x20] sm:$0xff]  ;;  %v4787_v14 = vmul.f32 %v4708_v45, %v481_v51 }
 0x20c   : > { %3077 = vmatpush.xpose.msk.msrb.mxu0 %vm1523_vm10, %v491_v54  ;;  %v1404_v7 = vpop.permute.xlu1 %1403  ;;  %v489_v51 = vmul.f32 %v4708_v45, %v476_v18  ;;  %v1352_v40 = vsel %vm770_vm2, %v4673_v20, %v1351_v62  ;;  %v5836_v62 = vrot.slane %v4706_v27, 1 }
 0x20d   : > { %3236 = vmatpush.xpose.msk.msra.mxu2 %vm1523_vm10, %v491_v54  ;;  %3240 = vmatpush.xpose.msk.msra.mxu3 %vm1523_vm10, %v487_v49  ;;  %v1479_v54 = vsel %vm313_vm1, %v4417_v3, %v1228_v0  ;;  %v472_v0 = vld [vmem:[%s5659_s5] sm:$0xff] }
 0x20e   : > { %3244 = vmatpush.xpose.msk.msrb.mxu1 %vm1523_vm10, %v4758_v24  ;;  %v4807_v53 = vsel %vm470_vm5, %v1479_v54, %v1404_v7  ;;  %v485_v3 = vmul.f32 %v4708_v45, %v472_v0  ;;  %v4828_v54 = vmul.f32 %v4708_v45, %v480_v32  ;;  %v3186_v0 = vld [vmem:[%s3374_s30 + $0x160] sm:$0x3] }
 0x210   : > { %2191 = vrot.lane.b32.xlu0 %v4667_v10, %s3315_s8  ;;  %3078 = vmatpush.xpose.msk.msrb.mxu0 %vm1523_vm10, %v490_v15  ;;  %v4797_v10 = vpop.permute.xlu2 %2357 }
 0x211   : > { %3237 = vmatpush.xpose.msk.msra.mxu2 %vm1523_vm10, %v490_v15  ;;  %3241 = vmatpush.xpose.msk.msra.mxu3 %vm1523_vm10, %v486_v13  ;;  %5835 = vst [vmem:[#allocation95_spill] sm:$0xff] %v4797_v10  ;;  %v3156_v15 = vld [vmem:[%s3374_s30 + $0x70] sm:$0x3]  ;;  %v4812_v10 = vld [vmem:[%s3374_s30 + $0x168] sm:$0xff] }
 0x212   : > { %3245 = vmatpush.xpose.msk.msrb.mxu1 %vm1523_vm10, %v4787_v14  ;;  %v1396_v46 = vpop.permute.xlu0 %1395  ;;  %2327 = vrot.lane.b32.xlu2 %v2251_v36, %s3316_s17  ;;  %v2076_v42 = vrot.slane %v3156_v15, 1  ;;  %v4821_v36 = vld [vmem:[%s3374_s30 + $0x50] sm:$0xff] }
 0x213   : > { %1417 = vrot.lane.b32.xlu1 %v1352_v40, %s3316_s17  ;;  %v4818_v18 = vsel %vm470_vm5, %v1475_v37, %v1396_v46  ;;  %v954_v7 = vsel %vm313_vm1, %v4821_v36, %v3884_v12  ;;  %v2128_v37 = vrot.slane %v4812_v10, 1  ;;  %v4838_v12 = vrot.slane %v4815_v57, 1 }
 0x214   : > { %3079 = vmatpush.xpose.msk.msrb.mxu0 %vm1523_vm10, %v489_v51  ;;  %v986_v45 = vsel %vm470_vm5, %v954_v7, %v4057_v22  ;;  %v2077_v32 = vsel %vm593_vm0, %v5836_v62, %v2076_v42  ;;  %v4889_v7 = vrot.slane %v4815_v57, 2 }
 0x215   : > { %3238 = vmatpush.xpose.msk.msra.mxu2 %vm1523_vm10, %v489_v51  ;;  %3242 = vmatpush.xpose.msk.msra.mxu3 %vm1523_vm10, %v485_v3  ;;  %v2424_v51 = vsel %vm313_vm1, %v4372_v25, %v4295_v6  ;;  %v5837_v6 = vrot.slane %v4706_v27, 2 }
 0x216   : > { %3246 = vmatpush.xpose.msk.msrb.mxu1 %vm1523_vm10, %v4828_v54 }
 0x217   : > { %3080 = vmatmul.msk.f32.vlgmr.msrb.gmra.mxu0 %vm1523_vm10, %v4278_v33  ;;  %v2126_v33 = vrot.slane %v3186_v0, 1 }
 0x218   : > { %3112 = vmatpush.xpose.msk.msra.mxu0 %vm1523_vm10, %v4716_v60  ;;  %3087 = vmatmul.msk.f32.vlgmr.msra.gmra.mxu2 %vm1523_vm10, %v4445_v1  ;;  %v4860_v60 = vsel %vm593_vm0, %v2128_v37, %v4838_v12  ;;  %v4864_v1 = vld [vmem:[%s3374_s30 + $0x20] sm:$0xff]  ;;  %v4869_v42 = vpop.permute.xlu2 %1405  ;;  %v4910_v37 = vpop.permute.xlu1 %2183 }
 0x219   : > { %3123 = vmatmul.msk.f32.vlgmr.msra.gmra.mxu3 %vm1523_vm10, %v986_v45  ;;  %3208 = vmatmul.msk.f32.vlgmr.msrb.gmra.mxu1 %vm1523_vm10, %v4275_v59  ;;  %v1460_v59 = vsel %vm313_vm1, %v4864_v1, %v4229_v34  ;;  %v2127_v40 = vsel %vm593_vm0, %v4655_v63, %v2126_v33  ;;  %v4922_v45 = vld [vmem:[%s3374_s30 + $0x80] sm:$0xff] }
 0x21a   : > { %2367 = vrot.lane.b32.xlu0 %v4686_v44, %s3316_s17  ;;  %v4856_v22 = vpop.permute.xlu0 %2175  ;;  %2153 = vrot.lane.b32.xlu2 %v2077_v32, %s3315_s8  ;;  %v4874_v44 = vld [vmem:[%s3374_s30 + $0x60] sm:$0xff]  ;;  %v1492_v34 = vsel %vm470_vm5, %v1460_v59, %v4287_v26  ;;  %v2456_v26 = vsel %vm470_vm5, %v2424_v51, %v4318_v4  ;;  %v2079_v32 = vrot.slane %v4922_v45, 1  ;;  %v956_v59 = vsel %vm313_vm1, %v4433_v48, %v3871_v31 }
 0x21b   : > { %1243 = vrot.lane.b32.xlu1 %v4860_v60, %s3315_s8  ;;  %v955_v46 = vsel %vm313_vm1, %v4874_v44, %v3925_v50 }
 0x21c   : > { %3113 = vmatpush.xpose.msk.msra.mxu0 %vm1523_vm10, %v487_v49  ;;  %v2252_v49 = vrot.slane %v3156_v15, 2  ;;  %v2304_v15 = vrot.slane %v4812_v10, 2  ;;  %v987_v50 = vsel %vm470_vm5, %v955_v46, %v4086_v9 }
 0x21e   : > { %v4907_v63 = vsel %vm770_vm2, %v2304_v15, %v4889_v7  ;;  %v3159_v15 = vld [vmem:[%s3374_s30 + $0x88] sm:$0x3] }
 0x21f   : > { %3081 = vmatmul.msk.f32.gmra.mxu0 %vm1523_vm10, %v1492_v34 }
 0x220   : > { %3114 = vmatpush.xpose.msk.msra.mxu0 %vm1523_vm10, %v486_v13  ;;  %v2253_v13 = vsel %vm770_vm2, %v5837_v6, %v2252_v49  ;;  %3088 = vmatmul.msk.f32.gmra.mxu2 %vm1523_vm10, %v4357_v39  ;;  %v2302_v39 = vrot.slane %v3186_v0, 2  ;;  %v4933_v0 = vpop.permute.xlu2 %2143  ;;  %v2081_v6 = vrot.slane %v3159_v15, 1 }
 0x221   : > { %3124 = vmatmul.msk.f32.gmra.mxu3 %vm1523_vm10, %v987_v50  ;;  %3209 = vmatmul.msk.f32.gmra.mxu1 %vm1523_vm10, %v2456_v26 }
 0x222   : > { %2193 = vrot.lane.b32.xlu0 %v2127_v40, %s3315_s8  ;;  %v1224_v9 = vpop.permute.xlu0 %1223  ;;  %2329 = vrot.lane.b32.xlu2 %v2253_v13, %s3316_s17  ;;  %v2303_v49 = vsel %vm770_vm2, %v4673_v20, %v2302_v39  ;;  %v3284_v20 = vld [vmem:[%s3374_s30 + $0x78] sm:$0xff]  ;;  %v958_v13 = vsel %vm313_vm1, %v4327_v61, %v3942_v55  ;;  %v2082_v39 = vsel %vm593_vm0, %v2079_v32, %v2081_v6 }
 0x223   : > { %v1477_v4 = vsel %vm313_vm1, %v4408_v52, %v1224_v9  ;;  %1419 = vrot.lane.b32.xlu1 %v4907_v63, %s3316_s17  ;;  %v5838_v55 = vld [vmem:[#allocation82_spill] sm:$0xff] }
 0x224   : > { %3115 = vmatpush.xpose.msk.msra.mxu0 %vm1523_vm10, %v485_v3  ;;  %v4919_v3 = vld [vmem:[%s3374_s30 + $0x78] sm:$0xff]  ;;  %v4928_v33 = vsel %vm470_vm5, %v1477_v4, %v4660_v11 }
 0x225   : > { %v2078_v62 = vrot.slane %v4919_v3, 1  ;;  %v3072_v11 = vld [vmem:[%s3374_s30 + $0x178] sm:$0x3] }
 0x226   : > { %v1180_v48 = vrot.slane %v3072_v11, 1 }
 0x227   : > { %v2080_v46 = vsel %vm593_vm0, %v2078_v62, %v2079_v32  ;;  %3082 = vmatmul.msk.f32.gmra.mxu0 %vm1523_vm10, %v4313_v5  ;;  %v3189_v62 = vld [vmem:[%s3374_s30 + $0x178] sm:$0x3] }
 0x228   : > { %3196 = vmatpush.xpose.msk.msrb.mxu0 %vm1523_vm10, %v4719_v30  ;;  %v2425_v30 = vsel %vm313_vm1, %v4137_v21, %v4310_v47  ;;  %3089 = vmatmul.msk.f32.gmra.mxu2 %vm1523_vm10, %v4341_v17  ;;  %v988_v21 = vsel %vm470_vm5, %v956_v59, %v4120_v2  ;;  %v1181_v5 = vsel %vm593_vm0, %v4838_v12, %v1180_v48  ;;  %v4960_v17 = vpop.permute.xlu1 %1231  ;;  %v2254_v2 = vrot.slane %v4919_v3, 2  ;;  %v4972_v51 = vpop.permute.xlu2 %2319  ;;  %v5839_v59 = vld [vmem:[#allocation57_spill] sm:$0xff] }
 0x229   : > { %v2457_v31 = vsel %vm470_vm5, %v2425_v30, %v4332_v56  ;;  %3125 = vmatmul.msk.f32.gmra.mxu3 %vm1523_vm10, %v988_v21  ;;  %v2255_v56 = vrot.slane %v4922_v45, 2  ;;  %v2131_v32 = vrot.slane %v3189_v62, 1  ;;  %v2257_v30 = vrot.slane %v3159_v15, 2  ;;  %v5842_v21 = vld [vmem:[#allocation71_spill] sm:$0xff] }
 0x22a   : > { %3210 = vmatmul.msk.f32.gmra.mxu1 %vm1523_vm10, %v2457_v31  ;;  %2369 = vrot.lane.b32.xlu0 %v2303_v49, %s3316_s17  ;;  %v4955_v47 = vpop.permute.xlu0 %2353  ;;  %v1464_v49 = vsel %vm313_vm1, %v4821_v36, %v5839_v59  ;;  %v2307_v15 = vrot.slane %v3189_v62, 2  ;;  %v3075_v59 = vld [vmem:[%s3374_s30 + $0x190] sm:$0x3] }
 0x22b   : > { %2155 = vrot.lane.b32.xlu2 %v2080_v46, %s3315_s8  ;;  %1245 = vrot.lane.b32.xlu1 %v1181_v5, %s3315_s8  ;;  %v2256_v34 = vsel %vm770_vm2, %v2254_v2, %v2255_v56  ;;  %v5841_v46 = vld [vmem:[#allocation67_spill] sm:$0xff]  ;;  %v1496_v31 = vsel %vm470_vm5, %v1464_v49, %v5842_v21  ;;  %v2132_v48 = vsel %vm593_vm0, %v4838_v12, %v2131_v32  ;;  %v3192_v2 = vld [vmem:[%s3374_s30 + $0x190] sm:$0x3]  ;;  %v5851_v32 = vld [vmem:[#allocation74_spill] sm:$0xff] }
 0x22c   : > { %3197 = vmatpush.xpose.msk.msrb.mxu0 %vm1523_vm10, %v4758_v24  ;;  %v957_v24 = vsel %vm313_vm1, %v3284_v20, %v3904_v29  ;;  %v2258_v5 = vsel %vm770_vm2, %v2255_v56, %v2257_v30  ;;  %v5843_v20 = vld [vmem:[#allocation61_spill] sm:$0xff]  ;;  %v5853_v49 = vld [vmem:[#allocation15_spill] sm:$0xff] }
 0x22d   : > { %v989_v29 = vsel %vm470_vm5, %v957_v24, %v4074_v58  ;;  %v4996_v58 = vld [vmem:[%s3374_s30 + $0x180] sm:$0xff] }
 0x22e   : > { %v2133_v26 = vrot.slane %v4996_v58, 1  ;;  %v5844_v24 = vld [vmem:[#allocation43_spill] sm:$0xff] }
 0x22f   : > { %3083 = vmatmul.msk.f32.gmra.mxu0 %vm1523_vm10, %v4300_v43 }
 0x230   : > { %3198 = vmatpush.xpose.msk.msrb.mxu0 %vm1523_vm10, %v4787_v14  ;;  %v1478_v14 = vsel %vm313_vm1, %v4344_v16, %v4681_v23  ;;  %3090 = vmatmul.msk.f32.gmra.mxu2 %vm1523_vm10, %v4464_v35  ;;  %v4992_v40 = vpop.permute.xlu1 %1407  ;;  %v4999_v35 = vld [vmem:[%s3374_s30 + $0x188] sm:$0xff]  ;;  %v5030_v61 = vpop.permute.xlu2 %2145 }
 0x231   : > { %3126 = vmatmul.msk.f32.gmra.mxu3 %vm1523_vm10, %v989_v29  ;;  %v5016_v9 = vrot.slane %v4999_v35, 1  ;;  %v5845_v29 = vld [vmem:[#allocation78_spill] sm:$0xff] }
 0x232   : > { %3211 = vmatmul.msk.f32.gmra.mxu1 %vm1523_vm10, %v4513_v8  ;;  %2195 = vrot.lane.b32.xlu0 %v4860_v60, %s3315_s8  ;;  %v1402_v23 = vpop.permute.xlu0 %1401  ;;  %v5006_v60 = vld [vmem:[%s3374_s30 + $0x48] sm:$0xff] }
 0x233   : > { %2331 = vrot.lane.b32.xlu2 %v2256_v34, %s3316_s17  ;;  %v5003_v8 = vsel %vm470_vm5, %v1478_v14, %v1402_v23  ;;  %v1463_v50 = vsel %vm313_vm1, %v5006_v60, %v4235_v28  ;;  %v990_v28 = vsel %vm470_vm5, %v958_v13, %v4100_v41  ;;  %v5063_v34 = vrot.slane %v4999_v35, 2  ;;  %v5846_v23 = vld [vmem:[#allocation64_spill] sm:$0xff]  ;;  %v5847_v13 = vld [vmem:[#allocation27_spill] sm:$0xff] }
 0x234   : > { %3199 = vmatpush.xpose.msk.msrb.mxu0 %vm1523_vm10, %v4828_v54  ;;  %v1356_v54 = vrot.slane %v3072_v11, 2  ;;  %v1495_v4 = vsel %vm470_vm5, %v1463_v50, %v4369_v19  ;;  %v2312_v14 = vrot.slane %v3192_v2, 2 }
 0x236   : > { %v1357_v43 = vsel %vm770_vm2, %v4889_v7, %v1356_v54  ;;  %v2313_v56 = vsel %vm770_vm2, %v5063_v34, %v2312_v14 }
 0x237   : > { %1421 = vrot.lane.b32.xlu1 %v1357_v43, %s3316_s17  ;;  %3084 = vmatmul.msk.f32.gmra.mxu0 %vm1523_vm10, %v1495_v4  ;;  %v5848_v4 = vld [vmem:[#allocation77_spill] sm:$0xff] }
 0x238   : > { %3091 = vmatmul.msk.f32.gmra.mxu2 %vm1523_vm10, %v4393_v38  ;;  %v5038_v38 = vsel %vm593_vm0, %v2133_v26, %v5016_v9  ;;  %v5041_v41 = vpop.permute.xlu1 %1233  ;;  %v5076_v50 = vpop.permute.xlu2 %2321  ;;  %v960_v26 = vsel %vm313_vm1, %v4372_v25, %v5847_v13  ;;  %v5852_v25 = vld [vmem:[#allocation65_spill] sm:$0xff] }
 0x239   : > { %3127 = vmatmul.msk.f32.gmra.mxu3 %vm1523_vm10, %v990_v28 }
 0x23a   : > { %3212 = vmatmul.msk.f32.gmra.mxu1 %vm1523_vm10, %v5838_v55  ;;  %2371 = vrot.lane.b32.xlu0 %v4907_v63, %s3316_s17  ;;  %v5034_v19 = vpop.permute.xlu0 %2181  ;;  %v5840_v63 = vld [vmem:[#allocation24_spill] sm:$0xff]  ;;  %v5850_v55 = vld [vmem:[#allocation59_spill] sm:$0xff] }
 0x23b   : > { %2157 = vrot.lane.b32.xlu2 %v2082_v39, %s3315_s8  ;;  %v959_v11 = vsel %vm313_vm1, %v5841_v46, %v5840_v63  ;;  %v5849_v39 = vld [vmem:[#allocation60_spill] sm:$0xff]  ;;  %v1465_v62 = vsel %vm313_vm1, %v4874_v44, %v5850_v55  ;;  %v992_v63 = vsel %vm470_vm5, %v960_v26, %v5853_v49  ;;  %v5854_v46 = vld [vmem:[#allocation94_spill] sm:$0xff]  ;;  %v5862_v55 = vld [vmem:[#allocation85_spill] sm:$0xff] }
 0x23c   : > { %v991_v36 = vsel %vm470_vm5, %v959_v11, %v5844_v24  ;;  %v2429_v28 = vsel %vm313_vm1, %v5849_v39, %v5848_v4  ;;  %v1497_v30 = vsel %vm470_vm5, %v1465_v62, %v5851_v32  ;;  %v1361_v11 = vrot.slane %v3075_v59, 2  ;;  %v5856_v24 = vld [vmem:[#allocation32_spill] sm:$0xff]  ;;  %v5138_v32 = vld [vmem:[%s3374_s30 + $0x1a0] sm:$0xff] }
 0x23d   : > { %v2461_v44 = vsel %vm470_vm5, %v2429_v28, %v5854_v46  ;;  %v5128_v26 = vld [vmem:[%s3374_s30 + $0x1a8] sm:$0x3] }
 0x23e   : > { %v1362_v21 = vsel %vm770_vm2, %v5063_v34, %v1361_v11  ;;  %v5860_v4 = vld [vmem:[#allocation68_spill] sm:$0xff] }
 0x23f   : > { %1247 = vrot.lane.b32.xlu1 %v5038_v38, %s3315_s8  ;;  %3085 = vmatmul.msk.f32.gmra.mxu0 %vm1523_vm10, %v1496_v31  ;;  %v5861_v39 = vld [vmem:[#allocation40_spill] sm:$0xff] }
 0x240   : > { %3092 = vmatmul.msk.f32.gmra.mxu2 %vm1523_vm10, %v5843_v20  ;;  %v5072_v54 = vpop.permute.xlu1 %1409  ;;  %v3288_v11 = vld [vmem:[%s3374_s30 + $0x8] sm:$0xff] }
 0x241   : > { %3128 = vmatmul.msk.f32.gmra.mxu3 %vm1523_vm10, %v991_v36  ;;  %v5857_v36 = vld [vmem:[#allocation12_spill] sm:$0xff] }
 0x242   : > { %3213 = vmatmul.msk.f32.gmra.mxu1 %vm1523_vm10, %v5845_v29  ;;  %2197 = vrot.lane.b32.xlu0 %v2132_v48, %s3315_s8  ;;  %v1230_v12 = vpop.permute.xlu0 %1229  ;;  %v3286_v48 = vld [vmem:[%s3374_s30] sm:$0xff]  ;;  %v961_v14 = vsel %vm313_vm1, %v5857_v36, %v5856_v24  ;;  %v5866_v36 = vld [vmem:[#allocation4_spill] sm:$0xff] }
 0x243   : > { %2333 = vrot.lane.b32.xlu2 %v2258_v5, %s3316_s17  ;;  %v1480_v43 = vsel %vm313_vm1, %v5846_v23, %v1230_v12  ;;  %v5855_v5 = vld [vmem:[#allocation22_spill] sm:$0xff]  ;;  %v3287_v29 = vld [vmem:[%s3374_s30 + $0xe0] sm:$0xff]  ;;  %v5858_v12 = vld [vmem:[#allocation81_spill] sm:$0xff]  ;;  %v993_v28 = vsel %vm470_vm5, %v961_v14, %v5861_v39 }
 0x244   : > { %v5081_v6 = vsel %vm470_vm5, %v1480_v43, %v4869_v42  ;;  %v2308_v42 = vsel %vm770_vm2, %v4889_v7, %v2307_v15  ;;  %v947_v20 = vsel %vm313_vm1, %v3286_v48, %v5855_v5  ;;  %v5123_v43 = vpop.permute.xlu2 %2147  ;;  %v5859_v15 = vld [vmem:[#allocation9_spill] sm:$0xff]  ;;  %v5864_v5 = vld [vmem:[#allocation26_spill] sm:$0xff] }
 0x245   : > { %v979_v13 = vsel %vm470_vm5, %v947_v20, %v5859_v15  ;;  %v5865_v20 = vld [vmem:[#allocation62_spill] sm:$0xff] }
 0x246   : > { %v962_v24 = vsel %vm313_vm1, %v5865_v20, %v5864_v5  ;;  %v5868_v15 = vld [vmem:[#allocation46_spill] sm:$0xff] }
 0x247   : > { %2377 = vrot.lane.b32.xlu1 %v2313_v56, %s3316_s17  ;;  %3086 = vmatmul.msk.f32.gmra.mxu0 %vm1523_vm10, %v1497_v30  ;;  %v2430_v56 = vsel %vm313_vm1, %v3287_v29, %v5858_v12  ;;  %v2136_v30 = vrot.slane %v3192_v2, 1 }
 0x248   : > { %3093 = vmatmul.msk.f32.gmra.mxu2 %vm1523_vm10, %v5852_v25  ;;  %v5111_v31 = vpop.permute.xlu1 %1235  ;;  %v2462_v62 = vsel %vm470_vm5, %v2430_v56, %v5862_v55  ;;  %v2317_v25 = vrot.slane %v5128_v26, 2  ;;  %v5867_v56 = vld [vmem:[#allocation80_spill] sm:$0xff]  ;;  %v5871_v55 = vld [vmem:[#allocation66_spill] sm:$0xff] }
 0x249   : > { %3129 = vmatmul.msk.f32.gmra.mxu3 %vm1523_vm10, %v992_v63  ;;  %v2309_v63 = vrot.slane %v4996_v58, 2  ;;  %v2137_v46 = vsel %vm593_vm0, %v5016_v9, %v2136_v30  ;;  %v5872_v30 = vld [vmem:[#allocation90_spill] sm:$0xff] }
 0x24a   : > { %3214 = vmatmul.msk.f32.gmra.mxu1 %vm1523_vm10, %v2461_v44  ;;  %2373 = vrot.lane.b32.xlu0 %v2308_v42, %s3316_s17  ;;  %v5107_v7 = vpop.permute.xlu0 %2359  ;;  %v2315_v42 = vrot.slane %v5138_v32, 2 }
 0x24b   : > { %2201 = vrot.lane.b32.xlu2 %v2137_v46, %s3315_s8  ;;  %v2311_v29 = vsel %vm770_vm2, %v2309_v63, %v5063_v34  ;;  %v3289_v63 = vld [vmem:[%s3374_s30 + $0x18] sm:$0xff] }
 0x24c   : > { %v2318_v44 = vsel %vm770_vm2, %v2315_v42, %v2317_v25  ;;  %v5169_v12 = vpop.permute.xlu2 %2323  ;;  %v2432_v25 = vsel %vm313_vm1, %v4344_v16, %v5872_v30  ;;  %v5873_v46 = vld [vmem:[#allocation18_spill] sm:$0xff] }
 0x24d   : > { %v2464_v16 = vsel %vm470_vm5, %v2432_v25, %v4955_v47  ;;  %v5884_v25 = vld [vmem:[#allocation93_spill] sm:$0xff] }
 0x24f   : > { %1425 = vrot.lane.b32.xlu1 %v1362_v21, %s3316_s17  ;;  %3116 = vmatmul.msk.f32.vlgmr.msra.gmra.mxu0 %vm1523_vm10, %v979_v13  ;;  %v5863_v21 = vld [vmem:[#allocation23_spill] sm:$0xff] }
 0x250   : > { %3094 = vmatmul.msk.f32.gmra.mxu2 %vm1523_vm10, %v5860_v4  ;;  %v948_v2 = vsel %vm313_vm1, %v3288_v11, %v5863_v21  ;;  %v5157_v48 = vpop.permute.xlu1 %1411  ;;  %v1185_v4 = vrot.slane %v3075_v59, 1  ;;  %v949_v59 = vsel %vm313_vm1, %v3289_v63, %v5873_v46  ;;  %v5874_v11 = vld [vmem:[#allocation10_spill] sm:$0xff] }
 0x251   : > { %3130 = vmatmul.msk.f32.gmra.mxu3 %vm1523_vm10, %v993_v28  ;;  %v980_v14 = vsel %vm470_vm5, %v948_v2, %v5866_v36  ;;  %v5870_v28 = vld [vmem:[#allocation29_spill] sm:$0xff]  ;;  %v981_v21 = vsel %vm470_vm5, %v949_v59, %v5874_v11  ;;  %v2139_v36 = vrot.slane %v5138_v32, 1  ;;  %v2141_v59 = vrot.slane %v5128_v26, 1 }
 0x252   : > { %3215 = vmatmul.msk.f32.gmra.mxu1 %vm1523_vm10, %v2462_v62  ;;  %2199 = vrot.lane.b32.xlu0 %v5038_v38, %s3315_s8  ;;  %v5146_v49 = vpop.permute.xlu0 %2185  ;;  %v2431_v38 = vsel %vm313_vm1, %v4408_v52, %v4856_v22  ;;  %v994_v52 = vsel %vm470_vm5, %v962_v24, %v5868_v15  ;;  %v5869_v22 = vld [vmem:[#allocation86_spill] sm:$0xff]  ;;  %v1186_v39 = vsel %vm593_vm0, %v5016_v9, %v1185_v4  ;;  %v5875_v9 = vld [vmem:[#allocation39_spill] sm:$0xff] }
 0x253   : > { %v2463_v13 = vsel %vm470_vm5, %v2431_v38, %v5869_v22  ;;  %1249 = vrot.lane.b32.xlu2 %v1186_v39, %s3315_s8  ;;  %v963_v62 = vsel %vm313_vm1, %v5871_v55, %v5870_v28  ;;  %v5207_v38 = vld [vmem:[%s3374_s30 + $0x198] sm:$0xff]  ;;  %v5879_v22 = vld [vmem:[#allocation63_spill] sm:$0xff]  ;;  %v5882_v55 = vld [vmem:[#allocation89_spill] sm:$0xff]  ;;  %v2142_v26 = vsel %vm593_vm0, %v2139_v36, %v2141_v59 }
 0x254   : > { %v995_v2 = vsel %vm470_vm5, %v963_v62, %v5875_v9  ;;  %v5211_v5 = vpop.permute.xlu2 %2149  ;;  %v2314_v20 = vrot.slane %v5207_v38, 2  ;;  %v2138_v24 = vrot.slane %v5207_v38, 1  ;;  %v5881_v39 = vld [vmem:[#allocation14_spill] sm:$0xff]  ;;  %v5885_v9 = vld [vmem:[#allocation21_spill] sm:$0xff] }
 0x255   : > { %v5883_v62 = vld [vmem:[#allocation42_spill] sm:$0xff] }
 0x256   : > { %v2316_v47 = vsel %vm770_vm2, %v2314_v20, %v2315_v42  ;;  %v2140_v42 = vsel %vm593_vm0, %v2138_v24, %v2139_v36  ;;  %v3291_v20 = vld [vmem:[%s3374_s30 + $0xd8] sm:$0xff]  ;;  %v5886_v24 = vld [vmem:[#allocation28_spill] sm:$0xff] }
 0x257   : > { %2381 = vrot.lane.b32.xlu1 %v2318_v44, %s3316_s17  ;;  %3117 = vmatmul.msk.f32.gmra.mxu0 %vm1523_vm10, %v980_v14  ;;  %v5876_v14 = vld [vmem:[#allocation35_spill] sm:$0xff]  ;;  %v3292_v36 = vld [vmem:[%s3374_s30 + $0x38] sm:$0xff] }
 0x258   : > { %3095 = vmatmul.msk.f32.gmra.mxu2 %vm1523_vm10, %v5867_v56  ;;  %v5195_v44 = vpop.permute.xlu1 %1237  ;;  %v5877_v56 = vld [vmem:[#allocation79_spill] sm:$0xff] }
 0x259   : > { %3131 = vmatmul.msk.f32.gmra.mxu3 %vm1523_vm10, %v994_v52  ;;  %v964_v15 = vsel %vm313_vm1, %v5877_v56, %v5876_v14  ;;  %v5878_v52 = vld [vmem:[#allocation91_spill] sm:$0xff]  ;;  %v5887_v14 = vld [vmem:[#allocation8_spill] sm:$0xff] }
 0x25a   : > { %3216 = vmatmul.msk.f32.gmra.mxu1 %vm1523_vm10, %v2463_v13  ;;  %2375 = vrot.lane.b32.xlu0 %v2311_v29, %s3316_s17  ;;  %v5181_v34 = vpop.permute.xlu0 %2361  ;;  %v2433_v13 = vsel %vm313_vm1, %v5879_v22, %v5878_v52  ;;  %v996_v30 = vsel %vm470_vm5, %v964_v15, %v5883_v62  ;;  %v5888_v15 = vld [vmem:[#allocation49_spill] sm:$0xff]  ;;  %v5889_v22 = vld [vmem:[#allocation95_spill] sm:$0xff] }
 0x25b   : > { %2379 = vrot.lane.b32.xlu2 %v2316_v47, %s3316_s17  ;;  %v2465_v63 = vsel %vm470_vm5, %v2433_v13, %v5884_v25  ;;  %v965_v47 = vsel %vm313_vm1, %v3291_v20, %v5886_v24  ;;  %v5896_v20 = vld [vmem:[#allocation70_spill] sm:$0xff] }
 0x25c   : > { %v5246_v11 = vpop.permute.xlu2 %2325  ;;  %v997_v52 = vsel %vm470_vm5, %v965_v47, %v5888_v15  ;;  %v2436_v24 = vsel %vm313_vm1, %v5896_v20, %v5146_v49  ;;  %v5897_v47 = vld [vmem:[#allocation20_spill] sm:$0xff]  ;;  %v5899_v15 = vld [vmem:[#allocation45_spill] sm:$0xff] }
 0x25d   : > { %v2468_v49 = vsel %vm470_vm5, %v2436_v24, %v5181_v34  ;;  %v3297_v24 = vld [vmem:[%s3374_s30 + $0x128] sm:$0xff] }
 0x25f   : > { %3118 = vmatmul.msk.f32.gmra.mxu0 %vm1523_vm10, %v981_v21  ;;  %v3290_v21 = vld [vmem:[%s3374_s30 + $0x30] sm:$0xff] }
 0x260   : > { %3096 = vmatmul.msk.f32.gmra.mxu2 %vm1523_vm10, %v4818_v18  ;;  %v5240_v46 = vpop.permute.xlu1 %1413 }
 0x261   : > { %3132 = vmatmul.msk.f32.gmra.mxu3 %vm1523_vm10, %v995_v2  ;;  %v951_v2 = vsel %vm313_vm1, %v3290_v21, %v5885_v9 }
 0x262   : > { %3217 = vmatmul.msk.f32.gmra.mxu1 %vm1523_vm10, %v2464_v16  ;;  %1423 = vrot.lane.b32.xlu0 %v2311_v29, %s3316_s17  ;;  %v5215_v18 = vpop.permute.xlu0 %2187  ;;  %v5880_v29 = vld [vmem:[#allocation19_spill] sm:$0xff]  ;;  %v2434_v16 = vsel %vm313_vm1, %v5846_v23, %v5034_v19  ;;  %v983_v56 = vsel %vm470_vm5, %v951_v2, %v5887_v14  ;;  %v3294_v2 = vld [vmem:[%s3374_s30 + $0xf0] sm:$0xff]  ;;  %v5898_v14 = vld [vmem:[#allocation38_spill] sm:$0xff] }
 0x263   : > { %v950_v4 = vsel %vm313_vm1, %v4864_v1, %v5880_v29  ;;  %v2466_v19 = vsel %vm470_vm5, %v2434_v16, %v5889_v22  ;;  %v5895_v16 = vld [vmem:[#allocation36_spill] sm:$0xff] }
 0x264   : > { %v982_v28 = vsel %vm470_vm5, %v950_v4, %v5881_v39  ;;  %v3293_v4 = vld [vmem:[%s3374_s30 + $0xe0] sm:$0xff]  ;;  %v5281_v62 = vpop.permute.xlu2 %2151  ;;  %v5900_v22 = vld [vmem:[#allocation72_spill] sm:$0xff] }
 0x265   : > { %v5891_v39 = vld [vmem:[#allocation31_spill] sm:$0xff] }
 0x267   : > { %3119 = vmatmul.msk.f32.gmra.mxu0 %vm1523_vm10, %v982_v28  ;;  %v966_v28 = vsel %vm313_vm1, %v3293_v4, %v5891_v39  ;;  %v5902_v4 = vld [vmem:[#allocation30_spill] sm:$0xff] }
 0x268   : > { %3097 = vmatmul.msk.f32.gmra.mxu2 %vm1523_vm10, %v5882_v55  ;;  %v5270_v13 = vpop.permute.xlu1 %1239 }
 0x269   : > { %3133 = vmatmul.msk.f32.gmra.mxu3 %vm1523_vm10, %v996_v30  ;;  %v5893_v30 = vld [vmem:[#allocation13_spill] sm:$0xff] }
 0x26a   : > { %3218 = vmatmul.msk.f32.gmra.mxu1 %vm1523_vm10, %v2465_v63  ;;  %2203 = vrot.lane.b32.xlu0 %v2140_v42, %s3315_s8  ;;  %v2364_v1 = vpop.permute.xlu0 %2363  ;;  %v5892_v42 = vld [vmem:[#allocation69_spill] sm:$0xff] }
 0x26b   : > { %v2435_v55 = vsel %vm313_vm1, %v5892_v42, %v4910_v37  ;;  %v5894_v63 = vld [vmem:[#allocation41_spill] sm:$0xff] }
 0x26c   : > { %v998_v59 = vsel %vm470_vm5, %v966_v28, %v5894_v63  ;;  %v2467_v21 = vsel %vm470_vm5, %v2435_v55, %v5107_v7  ;;  %v953_v7 = vsel %vm313_vm1, %v5006_v60, %v5897_v47  ;;  %v5903_v28 = vld [vmem:[#allocation52_spill] sm:$0xff]  ;;  %v5908_v47 = vld [vmem:[#allocation83_spill] sm:$0xff] }
 0x26d   : > { %v3296_v63 = vld [vmem:[%s3374_s30 + $0x108] sm:$0xff] }
 0x26f   : > { %3120 = vmatmul.msk.f32.gmra.mxu0 %vm1523_vm10, %v983_v56  ;;  %v985_v56 = vsel %vm470_vm5, %v953_v7, %v5898_v14  ;;  %v2417_v7 = vsel %vm313_vm1, %v5908_v47, %v5123_v43 }
 0x270   : > { %3098 = vmatmul.msk.f32.gmra.mxu2 %vm1523_vm10, %v4928_v33  ;;  %v5890_v33 = vld [vmem:[#allocation25_spill] sm:$0xff]  ;;  %v5294_v9 = vpop.permute.xlu1 %1415 }
 0x271   : > { %3134 = vmatmul.msk.f32.gmra.mxu3 %vm1523_vm10, %v997_v52  ;;  %v952_v29 = vsel %vm313_vm1, %v3292_v36, %v5890_v33  ;;  %v5901_v36 = vld [vmem:[#allocation75_spill] sm:$0xff] }
 0x272   : > { %3219 = vmatmul.msk.f32.gmra.mxu1 %vm1523_vm10, %v2466_v19  ;;  %2205 = vrot.lane.b32.xlu0 %v2142_v26, %s3315_s8  ;;  %v2190_v23 = vpop.permute.xlu0 %2189  ;;  %v984_v25 = vsel %vm470_vm5, %v952_v29, %v5893_v30  ;;  %v5307_v26 = vpop.permute.xlu2 %2327  ;;  %v2415_v19 = vsel %vm313_vm1, %v5900_v22, %v4933_v0  ;;  %v3295_v29 = vld [vmem:[%s3374_s30 + $0xf8] sm:$0xff]  ;;  %s3234_s8 = sshll.u32 %s5932_s27, 6 }
 0x273   : > { %v968_v34 = vsel %vm313_vm1, %v3295_v29, %v5902_v4  ;;  %v2447_v39 = vsel %vm470_vm5, %v2415_v19, %v4972_v51  ;;  %v1481_v51 = vsel %vm313_vm1, %v5892_v42, %v4960_v17  ;;  %v5907_v17 = vld [vmem:[#allocation44_spill] sm:$0xff]  ;;  %s5627_s10 = scalar_lea.vmem %s5661_s7, %s3234_s8 }
 0x274   : > { %v1000_v0 = vsel %vm470_vm5, %v968_v34, %v5903_v28  ;;  %v5913_v28 = vld [vmem:[#allocation84_spill] sm:$0xff] }
 0x277   : > { %3121 = vmatmul.msk.f32.gmra.mxu0 %vm1523_vm10, %v984_v25 }
 0x278   : > { %3099 = vmatmul.msk.f32.gmra.mxu2 %vm1523_vm10, %v5003_v8  ;;  %v967_v8 = vsel %vm313_vm1, %v3294_v2, %v5895_v16  ;;  %v1513_v16 = vsel %vm470_vm5, %v1481_v51, %v4992_v40 }
 0x279   : > { %3135 = vmatmul.msk.f32.gmra.mxu3 %vm1523_vm10, %v998_v59  ;;  %v999_v52 = vsel %vm470_vm5, %v967_v8, %v5899_v15  ;;  %v5905_v59 = vld [vmem:[#allocation34_spill] sm:$0xff] }
 0x27a   : > { %3220 = vmatmul.msk.f32.gmra.mxu1 %vm1523_vm10, %v2467_v21  ;;  %v2366_v37 = vpop.permute.xlu0 %2365  ;;  %v5906_v21 = vld [vmem:[#allocation76_spill] sm:$0xff] }
 0x27b   : > { %v2438_v2 = vsel %vm313_vm1, %v5906_v21, %v2190_v23 }
 0x27d   : > { %v5324_v33 = vpop.permute.xlu1 %1241 }
 0x27f   : > { %3122 = vmatmul.msk.f32.gmra.mxu0 %vm1523_vm10, %v985_v56  ;;  %v5909_v56 = vld [vmem:[#allocation11_spill] sm:$0xff] }
 0x280   : > { %3100 = vmatmul.msk.f32.gmra.mxu2 %vm1523_vm10, %v4807_v53  ;;  %v2437_v53 = vsel %vm313_vm1, %v5901_v36, %v5215_v18  ;;  %v5339_v18 = vpop.permute.xlu2 %2153 }
 0x281   : > { %3136 = vmatmul.msk.f32.gmra.mxu3 %vm1523_vm10, %v999_v52  ;;  %v2469_v55 = vsel %vm470_vm5, %v2437_v53, %v2364_v1  ;;  %v969_v1 = vsel %vm313_vm1, %v3296_v63, %v5905_v59  ;;  %v5910_v52 = vld [vmem:[#allocation87_spill] sm:$0xff]  ;;  %v5911_v53 = vld [vmem:[#allocation48_spill] sm:$0xff]  ;;  %v5914_v59 = vld [vmem:[#allocation33_spill] sm:$0xff] }
 0x282   : > { %3221 = vmatmul.msk.f32.gmra.mxu1 %vm1523_vm10, %v2468_v49  ;;  %v2192_v60 = vpop.permute.xlu0 %2191  ;;  %v1001_v42 = vsel %vm470_vm5, %v969_v1, %v5907_v17  ;;  %v3299_v63 = vld [vmem:[%s3374_s30 + $0x120] sm:$0xff]  ;;  %v5916_v17 = vld [vmem:[#allocation92_spill] sm:$0xff] }
 0x283   : > { %v2439_v49 = vsel %vm313_vm1, %v5910_v52, %v2192_v60  ;;  %v971_v1 = vsel %vm313_vm1, %v3299_v63, %v5914_v59 }
 0x285   : > { %v5361_v20 = vpop.permute.xlu1 %1417 }
 0x287   : > { %3200 = vmatmul.msk.f32.vlgmr.msrb.gmra.mxu0 %vm1523_vm10, %v2447_v39  ;;  %v1483_v39 = vsel %vm313_vm1, %v5901_v36, %v5111_v31 }
 0x288   : > { %3101 = vmatmul.msk.f32.gmra.mxu2 %vm1523_vm10, %v5081_v6  ;;  %v5904_v6 = vld [vmem:[#allocation73_spill] sm:$0xff]  ;;  %v5365_v40 = vpop.permute.xlu2 %2329 }
 0x289   : > { %3137 = vmatmul.msk.f32.gmra.mxu3 %vm1523_vm10, %v1000_v0  ;;  %v2416_v25 = vsel %vm313_vm1, %v5904_v6, %v5030_v61  ;;  %v2470_v61 = vsel %vm470_vm5, %v2438_v2, %v2366_v37  ;;  %v3298_v37 = vld [vmem:[%s3374_s30 + $0x110] sm:$0xff]  ;;  %v2418_v0 = vsel %vm313_vm1, %v5913_v28, %v5211_v5  ;;  %v1515_v2 = vsel %vm470_vm5, %v1483_v39, %v5157_v48  ;;  %v5915_v5 = vld [vmem:[#allocation55_spill] sm:$0xff] }
 0x28a   : > { %3222 = vmatmul.msk.f32.gmra.mxu1 %vm1523_vm10, %v2469_v55  ;;  %v2448_v8 = vsel %vm470_vm5, %v2416_v25, %v5076_v50  ;;  %v1482_v50 = vsel %vm313_vm1, %v3297_v24, %v5041_v41  ;;  %v970_v15 = vsel %vm313_vm1, %v3298_v37, %v5909_v56  ;;  %v2449_v41 = vsel %vm470_vm5, %v2417_v7, %v5169_v12  ;;  %v5917_v24 = vld [vmem:[#allocation3_spill] sm:$0xff] }
 0x28b   : > { %v1514_v19 = vsel %vm470_vm5, %v1482_v50, %v5072_v54  ;;  %v1002_v43 = vsel %vm470_vm5, %v970_v15, %v5911_v53  ;;  %v5912_v54 = vld [vmem:[#allocation88_spill] sm:$0xff]  ;;  %v2450_v31 = vsel %vm470_vm5, %v2418_v0, %v5246_v11  ;;  %v1003_v36 = vsel %vm470_vm5, %v971_v1, %v5915_v5 }
 0x28c   : > { %v2368_v30 = vpop.permute.xlu0 %2367  ;;  %v1484_v48 = vsel %vm313_vm1, %v5906_v21, %v5195_v44  ;;  %v2419_v11 = vsel %vm313_vm1, %v5916_v17, %v5281_v62  ;;  %v5918_v21 = vld [vmem:[#allocation47_spill] sm:$0xff] }
 0x28d   : > { %v2471_v29 = vsel %vm470_vm5, %v2439_v49, %v2368_v30  ;;  %v5391_v60 = vpop.permute.xlu1 %1243  ;;  %v1516_v44 = vsel %vm470_vm5, %v1484_v48, %v5240_v46  ;;  %v2451_v62 = vsel %vm470_vm5, %v2419_v11, %v5307_v26  ;;  %v1485_v46 = vsel %vm313_vm1, %v5910_v52, %v5270_v13  ;;  %v5920_v52 = vld [vmem:[#allocation51_spill] sm:$0xff] }
 0x28e   : > { %v2420_v26 = vsel %vm313_vm1, %v4706_v27, %v5339_v18  ;;  %v1517_v13 = vsel %vm470_vm5, %v1485_v46, %v5294_v9  ;;  %v1486_v9 = vsel %vm313_vm1, %v5912_v54, %v5324_v33 }
 0x28f   : > { %3201 = vmatmul.msk.f32.gmra.mxu0 %vm1523_vm10, %v2448_v8  ;;  %v2452_v27 = vsel %vm470_vm5, %v2420_v26, %v5365_v40  ;;  %v1518_v11 = vsel %vm470_vm5, %v1486_v9, %v5361_v20  ;;  %v1487_v20 = vsel %vm313_vm1, %v4812_v10, %v5391_v60  ;;  %v5924_v60 = vld [vmem:[#allocation50_spill] sm:$0xff] }
 0x290   : > { %3102 = vmatmul.msk.f32.gmra.mxu2 %vm1523_vm10, %v1513_v16  ;;  %v2156_v51 = vpop.permute.xlu2 %2155 }
 0x291   : > { %3138 = vmatmul.msk.f32.gmra.mxu3 %vm1523_vm10, %v1001_v42  ;;  %v2421_v1 = vsel %vm313_vm1, %v4919_v3, %v2156_v51  ;;  %v5922_v3 = vld [vmem:[#allocation56_spill] sm:$0xff] }
 0x292   : > { %3223 = vmatmul.msk.f32.gmra.mxu1 %vm1523_vm10, %v2470_v61 }
 0x294   : > { %v2194_v23 = vpop.permute.xlu0 %2193  ;;  %v5373_v14 = vpop.f32.mrf.mxu0 }
 0x295   : > { %v2440_v4 = vsel %vm313_vm1, %v5912_v54, %v2194_v23  ;;  %v3300_v23 = vld [vmem:[%s3374_s30 + $0x128] sm:$0xff]  ;;  %v5432_v7 = vpop.permute.xlu1 %1419 }
 0x296   : > { %v2628_v22 = vpop.f32.mrf.mxu1  ;;  %v972_v50 = vsel %vm313_vm1, %v3300_v23, %v5917_v24 }
 0x297   : > { %3202 = vmatmul.msk.f32.gmra.mxu0 %vm1523_vm10, %v2449_v41  ;;  %v1004_v49 = vsel %vm470_vm5, %v972_v50, %v5918_v21 }
 0x298   : > { %3103 = vmatmul.msk.f32.gmra.mxu2 %vm1523_vm10, %v1514_v19  ;;  %v2332_v15 = vpop.permute.xlu2 %2331 }
 0x299   : > { %3139 = vmatmul.msk.f32.gmra.mxu3 %vm1523_vm10, %v1002_v43  ;;  %v3301_v43 = vld [vmem:[%s3374_s30 + $0x138] sm:$0xff]  ;;  %v2453_v33 = vsel %vm470_vm5, %v2421_v1, %v2332_v15  ;;  %v3303_v15 = vld [vmem:[%s3374_s30 + $0x150] sm:$0xff] }
 0x29a   : > { %3224 = vmatmul.msk.f32.gmra.mxu1 %vm1523_vm10, %v2471_v29  ;;  %v5919_v29 = vld [vmem:[#allocation6_spill] sm:$0xff] }
 0x29b   : > { %v5395_v12 = vpop.f32.mrf.mxu2 }
 0x29c   : > { %v5397_v34 = vpop.f32.mrf.mxu3  ;;  %v2370_v55 = vpop.permute.xlu0 %2369 }
 0x29d   : > { %v5405_v30 = vpop.f32.mrf.mxu0  ;;  %v2472_v25 = vsel %vm470_vm5, %v2440_v4, %v2370_v55  ;;  %v973_v4 = vsel %vm313_vm1, %v3301_v43, %v5919_v29  ;;  %v1246_v18 = vpop.permute.xlu1 %1245 }
 0x29e   : > { %v2631_v6 = vpop.f32.mrf.mxu1  ;;  %v1005_v63 = vsel %vm470_vm5, %v973_v4, %v5920_v52 }
 0x29f   : > { %3203 = vmatmul.msk.f32.gmra.mxu0 %vm1523_vm10, %v2450_v31 }
 0x2a0   : > { %3104 = vmatmul.msk.f32.gmra.mxu2 %vm1523_vm10, %v1515_v2  ;;  %v2158_v59 = vpop.permute.xlu2 %2157 }
 0x2a1   : > { %3140 = vmatmul.msk.f32.gmra.mxu3 %vm1523_vm10, %v1003_v36  ;;  %v2422_v24 = vsel %vm313_vm1, %v4922_v45, %v2158_v59 }
 0x2a2   : > { %3225 = vmatmul.msk.f32.gmra.mxu1 %vm1523_vm10, %v2472_v25 }
 0x2a3   : > { %v1673_v16 = vpop.f32.mrf.mxu2 }
 0x2a4   : > { %v1894_v8 = vpop.f32.mrf.mxu3  ;;  %v2196_v61 = vpop.permute.xlu0 %2195 }
 0x2a5   : > { %v1895_v42 = vadd.f32 %v1894_v8, %v1673_v16  ;;  %v5430_v47 = vpop.f32.mrf.mxu0  ;;  %v3302_v16 = vld [vmem:[%s3374_s30 + $0x140] sm:$0xff]  ;;  %v5921_v8 = vld [vmem:[#allocation17_spill] sm:$0xff] }
 0x2a6   : > { %v974_v48 = vsel %vm313_vm1, %v3302_v16, %v5921_v8 }
 0x2a7   : > { %v5434_v37 = vadd.f32 %v2628_v22, %v1895_v42  ;;  %v2634_v56 = vpop.f32.mrf.mxu1  ;;  %3204 = vmatmul.msk.f32.gmra.mxu0 %vm1523_vm10, %v2451_v62  ;;  %v2441_v22 = vsel %vm313_vm1, %v4812_v10, %v2196_v61  ;;  %v1006_v54 = vsel %vm470_vm5, %v974_v48, %v5922_v3  ;;  %v1519_v10 = vsel %vm470_vm5, %v1487_v20, %v5432_v7  ;;  %v5925_v7 = vld [vmem:[#allocation16_spill] sm:$0xff] }
 0x2a8   : > { %3105 = vmatmul.msk.f32.gmra.mxu2 %vm1523_vm10, %v1516_v44  ;;  %v2334_v61 = vpop.permute.xlu2 %2333  ;;  %v5923_v44 = vld [vmem:[#allocation5_spill] sm:$0xff]  ;;  %v3305_v48 = vld [vmem:[%s3374_s30 + $0x168] sm:$0xff] }
 0x2a9   : > { %3141 = vmatmul.msk.f32.gmra.mxu3 %vm1523_vm10, %v1004_v49  ;;  %v1422_v51 = vpop.permute.xlu1 %1421  ;;  %v975_v62 = vsel %vm313_vm1, %v3303_v15, %v5923_v44  ;;  %v2454_v45 = vsel %vm470_vm5, %v2422_v24, %v2334_v61  ;;  %v3306_v15 = vld [vmem:[%s3374_s30 + $0x170] sm:$0xff]  ;;  %v5929_v44 = vld [vmem:[#allocation7_spill] sm:$0xff] }
 0x2aa   : > { %v1007_v26 = vsel %vm470_vm5, %v975_v62, %v5924_v60  ;;  %v978_v62 = vsel %vm313_vm1, %v3306_v15, %v5929_v44 }
 0x2ab   : > { %v1676_v19 = vpop.f32.mrf.mxu2 }
 0x2ac   : > { %v1897_v41 = vpop.f32.mrf.mxu3  ;;  %v2372_v53 = vpop.permute.xlu0 %2371 }
 0x2ad   : > { %v1898_v39 = vadd.f32 %v1897_v41, %v1676_v19  ;;  %v5456_v28 = vpop.f32.mrf.mxu0  ;;  %v2473_v0 = vsel %vm470_vm5, %v2441_v22, %v2372_v53  ;;  %v1488_v41 = vsel %vm313_vm1, %v4815_v57, %v1246_v18 }
 0x2ae   : > { %3226 = vmatmul.msk.f32.gmra.mxu1 %vm1523_vm10, %v2473_v0 }
 0x2af   : > { %v2637_v55 = vpop.f32.mrf.mxu1  ;;  %v5460_v25 = vadd.f32 %v2631_v6, %v1898_v39  ;;  %3205 = vmatmul.msk.f32.gmra.mxu0 %vm1523_vm10, %v2452_v27  ;;  %v3304_v39 = vld [vmem:[%s3374_s30 + $0x158] sm:$0xff]  ;;  %v1520_v27 = vsel %vm470_vm5, %v1488_v41, %v1422_v51  ;;  %s2896_s30 = sld [smem:[#allocation2]] }
 0x2b0   : > { %3106 = vmatmul.msk.f32.gmra.mxu2 %vm1523_vm10, %v1517_v13  ;;  %v976_v0 = vsel %vm313_vm1, %v3304_v39, %v5925_v7  ;;  %v2202_v59 = vpop.permute.xlu2 %2201  ;;  %v5928_v51 = vld [vmem:[#allocation58_spill] sm:$0xff] }
 0x2b1   : > { %3142 = vmatmul.msk.f32.gmra.mxu3 %vm1523_vm10, %v1005_v63  ;;  %v1248_v43 = vpop.permute.xlu1 %1247 }
 0x2b3   : > { %v1679_v6 = vpop.f32.mrf.mxu2 }
 0x2b4   : > { %v1900_v40 = vpop.f32.mrf.mxu3  ;;  %v2198_v2 = vpop.permute.xlu0 %2197 }
 0x2b5   : > { %v1901_v31 = vadd.f32 %v1900_v40, %v1679_v6  ;;  %v5476_v5 = vpop.f32.mrf.mxu0  ;;  %v2442_v42 = vsel %vm313_vm1, %v4815_v57, %v2198_v2  ;;  %v5926_v57 = vld [vmem:[#allocation54_spill] sm:$0xff] }
 0x2b6   : > { %v1008_v18 = vsel %vm470_vm5, %v976_v0, %v5926_v57 }
 0x2b7   : > { %v2640_v36 = vpop.f32.mrf.mxu1  ;;  %v5481_v17 = vadd.f32 %v2634_v56, %v1901_v31  ;;  %3206 = vmatmul.msk.f32.gmra.mxu0 %vm1523_vm10, %v2453_v33 }
 0x2b8   : > { %3107 = vmatmul.msk.f32.gmra.mxu2 %vm1523_vm10, %v1518_v11  ;;  %v5927_v11 = vld [vmem:[#allocation37_spill] sm:$0xff]  ;;  %v1250_v61 = vpop.permute.xlu2 %1249 }
 0x2b9   : > { %3143 = vmatmul.msk.f32.gmra.mxu3 %vm1523_vm10, %v1006_v54  ;;  %v2378_v8 = vpop.permute.xlu1 %2377  ;;  %v977_v33 = vsel %vm313_vm1, %v3305_v48, %v5927_v11  ;;  %v2444_v54 = vsel %vm313_vm1, %v4999_v35, %v2202_v59 }
 0x2ba   : > { %v2476_v24 = vsel %vm470_vm5, %v2444_v54, %v2378_v8 }
 0x2bb   : > { %v1682_v23 = vpop.f32.mrf.mxu2 }
 0x2bc   : > { %v1903_v50 = vpop.f32.mrf.mxu3  ;;  %v2374_v56 = vpop.permute.xlu0 %2373 }
 0x2bd   : > { %v1904_v21 = vadd.f32 %v1903_v50, %v1682_v23  ;;  %v5501_v49 = vpop.f32.mrf.mxu0  ;;  %v2474_v22 = vsel %vm470_vm5, %v2442_v42, %v2374_v56  ;;  %v1009_v42 = vsel %vm470_vm5, %v977_v33, %v5928_v51  ;;  %v1489_v23 = vsel %vm313_vm1, %v4996_v58, %v1248_v43 }
 0x2be   : > { %3227 = vmatmul.msk.f32.gmra.mxu1 %vm1523_vm10, %v2474_v22 }
 0x2bf   : > { %v2643_v19 = vpop.f32.mrf.mxu1  ;;  %v5505_v46 = vadd.f32 %v2637_v55, %v1904_v21  ;;  %3207 = vmatmul.msk.f32.gmra.mxu0 %vm1523_vm10, %v2454_v45  ;;  %v5930_v45 = vld [vmem:[#allocation53_spill] sm:$0xff] }
 0x2c0   : > { %3108 = vmatmul.msk.f32.gmra.mxu2 %vm1523_vm10, %v1519_v10  ;;  %v1010_v60 = vsel %vm470_vm5, %v978_v62, %v5930_v45 }
 0x2c1   : > { %3144 = vmatmul.msk.f32.gmra.mxu3 %vm1523_vm10, %v1007_v26  ;;  %v1490_v26 = vsel %vm313_vm1, %v4999_v35, %v1250_v61  ;;  %v1426_v41 = vpop.permute.xlu1 %1425 }
 0x2c3   : > { %v1685_v53 = vpop.f32.mrf.mxu2 }
 0x2c4   : > { %v1906_v29 = vpop.f32.mrf.mxu3  ;;  %v2200_v4 = vpop.permute.xlu0 %2199 }
 0x2c5   : > { %v1907_v55 = vadd.f32 %v1906_v29, %v1685_v53  ;;  %v5520_v13 = vpop.f32.mrf.mxu0  ;;  %v2443_v6 = vsel %vm313_vm1, %v4996_v58, %v2200_v4  ;;  %v1522_v53 = vsel %vm470_vm5, %v1490_v26, %v1426_v41  ;;  %v2380_v29 = vpop.permute.xlu2 %2379 }
 0x2c7   : > { %v2646_v52 = vpop.f32.mrf.mxu1  ;;  %v5523_v63 = vadd.f32 %v2640_v36, %v1907_v55 }
 0x2c8   : > { %3109 = vmatmul.msk.f32.gmra.mxu2 %vm1523_vm10, %v1520_v27 }
 0x2c9   : > { %3145 = vmatmul.msk.f32.gmra.mxu3 %vm1523_vm10, %v1008_v18  ;;  %v2382_v57 = vpop.permute.xlu1 %2381 }
 0x2cb   : > { %v1688_v9 = vpop.f32.mrf.mxu2 }
 0x2cc   : > { %v1909_v1 = vpop.f32.mrf.mxu3  ;;  %v2376_v40 = vpop.permute.xlu0 %2375 }
 0x2cd   : > { %v1910_v2 = vadd.f32 %v1909_v1, %v1688_v9  ;;  %v5531_v31 = vpop.f32.mrf.mxu0  ;;  %v2475_v36 = vsel %vm470_vm5, %v2443_v6, %v2376_v40 }
 0x2ce   : > { %3228 = vmatmul.msk.f32.gmra.mxu1 %vm1523_vm10, %v2475_v36 }
 0x2cf   : > { %v2649_v16 = vpop.f32.mrf.mxu1  ;;  %v5538_v3 = vadd.f32 %v2643_v19, %v1910_v2 }
 0x2d1   : > { %3146 = vmatmul.msk.f32.gmra.mxu3 %vm1523_vm10, %v1009_v42 }
 0x2d3   : > { %v1691_v20 = vpop.f32.mrf.mxu2 }
 0x2d4   : > { %v1912_v50 = vpop.f32.mrf.mxu3  ;;  %v1424_v56 = vpop.permute.xlu0 %1423 }
 0x2d5   : > { %v1913_v21 = vadd.f32 %v1912_v50, %v1691_v20  ;;  %v1521_v22 = vsel %vm470_vm5, %v1489_v23, %v1424_v56  ;;  %v5552_v19 = vpop.f32.mrf.mxu0 }
 0x2d6   : > { %3110 = vmatmul.msk.f32.gmra.mxu2 %vm1523_vm10, %v1521_v22  ;;  %3229 = vmatmul.msk.f32.gmra.mxu1 %vm1523_vm10, %v2476_v24 }
 0x2d7   : > { %v2652_v10 = vpop.f32.mrf.mxu1  ;;  %v5556_v58 = vadd.f32 %v2646_v52, %v1913_v21  ;;  %v1871_v21 = vadd.f32 %v5531_v31, %v5373_v14 }
 0x2d9   : > { %3147 = vmatmul.msk.f32.gmra.mxu3 %vm1523_vm10, %v1010_v60 }
 0x2db   : > { %v1694_v43 = vpop.f32.mrf.mxu2 }
 0x2dc   : > { %v1915_v4 = vpop.f32.mrf.mxu3  ;;  %v2204_v39 = vpop.permute.xlu0 %2203 }
 0x2dd   : > { %v1916_v7 = vadd.f32 %v1915_v4, %v1694_v43  ;;  %v2445_v0 = vsel %vm313_vm1, %v5207_v38, %v2204_v39  ;;  %v1876_v55 = vpop.f32.mrf.mxu0  ;;  %v1874_v43 = vadd.f32 %v5552_v19, %v5405_v30 }
 0x2de   : > { %3111 = vmatmul.msk.f32.gmra.mxu2 %vm1523_vm10, %v1522_v53  ;;  %v2477_v52 = vsel %vm470_vm5, %v2445_v0, %v2380_v29  ;;  %v1877_v31 = vadd.f32 %v1876_v55, %v5430_v47 }
 0x2df   : > { %v2655_v27 = vpop.f32.mrf.mxu1  ;;  %v5568_v35 = vadd.f32 %v2649_v16, %v1916_v7  ;;  %3230 = vmatmul.msk.f32.gmra.mxu1 %vm1523_vm10, %v2477_v52 }
 0x2e3   : > { %v1697_v59 = vpop.f32.mrf.mxu2 }
 0x2e4   : > { %v1918_v18 = vpop.f32.mrf.mxu3  ;;  %v2206_v6 = vpop.permute.xlu0 %2205 }
 0x2e5   : > { %v1919_v9 = vadd.f32 %v1918_v18, %v1697_v59  ;;  %v2446_v1 = vsel %vm313_vm1, %v5138_v32, %v2206_v6  ;;  %v1879_v40 = vpop.f32.mrf.mxu0 }
 0x2e6   : > { %v2478_v38 = vsel %vm470_vm5, %v2446_v1, %v2382_v57  ;;  %v1880_v19 = vadd.f32 %v1879_v40, %v5456_v28 }
 0x2e7   : > { %v2716_v2 = vadd.f32 %v2652_v10, %v1919_v9  ;;  %3231 = vmatmul.msk.f32.gmra.mxu1 %vm1523_vm10, %v2478_v38  ;;  %v2658_v36 = vpop.f32.mrf.mxu1 }
 0x2e9   : > { %2764 = vxpose.xlu0.b32.start [1/16] (narrow) %v2716_v2, 32 }
 0x2eb   : > { %v1700_v16 = vpop.f32.mrf.mxu2 }
 0x2ec   : > { %v1921_v8 = vpop.f32.mrf.mxu3 }
 0x2ed   : > { %v1922_v48 = vadd.f32 %v1921_v8, %v1700_v16  ;;  %v1882_v11 = vpop.f32.mrf.mxu0 }
 0x2ee   : > { %v1883_v47 = vadd.f32 %v1882_v11, %v5476_v5 }
 0x2ef   : > { %v2717_v33 = vadd.f32 %v2655_v27, %v1922_v48  ;;  %v2661_v54 = vpop.f32.mrf.mxu1 }
 0x2f1   : > { %2765 = vxpose.xlu0.b32.cont [2/16] (narrow) %v2717_v33, 32 }
 0x2f3   : > { %v1703_v51 = vpop.f32.mrf.mxu2 }
 0x2f4   : > { %v1924_v42 = vpop.f32.mrf.mxu3 }
 0x2f5   : > { %v1925_v61 = vadd.f32 %v1924_v42, %v1703_v51  ;;  %v1885_v23 = vpop.f32.mrf.mxu0 }
 0x2f6   : > { %v1886_v28 = vadd.f32 %v1885_v23, %v5501_v49  ;;  %v1892_v23 = vadd.f32 %v5397_v34, %v5395_v12 }
 0x2f7   : > { %v2718_v32 = vadd.f32 %v2658_v36, %v1925_v61  ;;  %v2664_v24 = vpop.f32.mrf.mxu1 }
 0x2f9   : > { %2766 = vxpose.xlu0.b32.cont [3/16] (narrow) %v2718_v32, 32 }
 0x2fb   : > { %v1706_v20 = vpop.f32.mrf.mxu2 }
 0x2fc   : > { %v1927_v50 = vpop.f32.mrf.mxu3 }
 0x2fd   : > { %v1928_v56 = vadd.f32 %v1927_v50, %v1706_v20  ;;  %v5575_v15 = vpop.f32.mrf.mxu0 }
 0x2fe   : > { %v1889_v11 = vadd.f32 %v5575_v15, %v5520_v13 }
 0x2ff   : > { %v2719_v44 = vadd.f32 %v2661_v54, %v1928_v56  ;;  %v2667_v60 = vpop.f32.mrf.mxu1 }
 0x301   : > { %2767 = vxpose.xlu0.b32.cont [4/16] (narrow) %v2719_v44, 32 }
 0x303   : > { %v1709_v62 = vpop.f32.mrf.mxu2 }
 0x304   : > { %v1930_v22 = vpop.f32.mrf.mxu3 }
 0x305   : > { %v1931_v10 = vadd.f32 %v1930_v22, %v1709_v62  ;;  %v2604_v45 = vpop.f32.mrf.mxu0 }
 0x306   : > { %v2700_v26 = vadd.f32 %v2604_v45, %v1871_v21 }
 0x307   : > { %v2720_v41 = vadd.f32 %v2664_v24, %v1931_v10  ;;  %v2670_v27 = vpop.f32.mrf.mxu1 }
 0x308   : > { %2732 = vxpose.xlu2.b32.start [1/16] (narrow) %v2700_v26, 32 }
 0x309   : > { %2768 = vxpose.xlu0.b32.cont [5/16] (narrow) %v2720_v41, 32 }
 0x30b   : > { %v1712_v53 = vpop.f32.mrf.mxu2 }
 0x30c   : > { %v1933_v29 = vpop.f32.mrf.mxu3 }
 0x30d   : > { %v1934_v4 = vadd.f32 %v1933_v29, %v1712_v53  ;;  %v2607_v39 = vpop.f32.mrf.mxu0 }
 0x30e   : > { %v2701_v7 = vadd.f32 %v2607_v39, %v1874_v43 }
 0x30f   : > { %v2721_v0 = vadd.f32 %v2667_v60, %v1934_v4  ;;  %v2673_v9 = vpop.f32.mrf.mxu1 }
 0x310   : > { %2733 = vxpose.xlu2.b32.cont [2/16] (narrow) %v2701_v7, 32 }
 0x311   : > { %2769 = vxpose.xlu0.b32.cont [6/16] (narrow) %v2721_v0, 32 }
 0x313   : > { %v1715_v14 = vpop.f32.mrf.mxu2 }
 0x314   : > { %v1936_v52 = vpop.f32.mrf.mxu3 }
 0x315   : > { %v1937_v59 = vadd.f32 %v1936_v52, %v1715_v14  ;;  %v2610_v57 = vpop.f32.mrf.mxu0 }
 0x316   : > { %v2702_v18 = vadd.f32 %v2610_v57, %v1877_v31 }
 0x317   : > { %v2722_v6 = vadd.f32 %v2670_v27, %v1937_v59  ;;  %v2676_v55 = vpop.f32.mrf.mxu1 }
 0x318   : > { %2734 = vxpose.xlu2.b32.cont [3/16] (narrow) %v2702_v18, 32 }
 0x319   : > { %2770 = vxpose.xlu0.b32.cont [7/16] (narrow) %v2722_v6, 32 }
 0x31b   : > { %v1718_v30 = vpop.f32.mrf.mxu2 }
 0x31c   : > { %v1939_v1 = vpop.f32.mrf.mxu3 }
 0x31d   : > { %v1940_v38 = vadd.f32 %v1939_v1, %v1718_v30  ;;  %v2613_v2 = vpop.f32.mrf.mxu0 }
 0x31e   : > { %v2703_v36 = vadd.f32 %v2613_v2, %v1880_v19 }
 0x31f   : > { %v2723_v16 = vadd.f32 %v2673_v9, %v1940_v38  ;;  %v2679_v40 = vpop.f32.mrf.mxu1 }
 0x320   : > { %2735 = vxpose.xlu2.b32.cont [4/16] (narrow) %v2703_v36, 32 }
 0x321   : > { %2771 = vxpose.xlu0.b32.cont [8/16] (narrow) %v2723_v16, 32 }
 0x323   : > { %v1721_v8 = vpop.f32.mrf.mxu2 }
 0x324   : > { %v1942_v48 = vpop.f32.mrf.mxu3 }
 0x325   : > { %v1943_v33 = vadd.f32 %v1942_v48, %v1721_v8  ;;  %v2616_v54 = vpop.f32.mrf.mxu0 }
 0x326   : > { %v2704_v51 = vadd.f32 %v2616_v54, %v1883_v47 }
 0x327   : > { %v2724_v42 = vadd.f32 %v2676_v55, %v1943_v33 }
 0x328   : > { %2736 = vxpose.xlu2.b32.cont [5/16] (narrow) %v2704_v51, 32 }
 0x329   : > { %2772 = vxpose.xlu0.b32.cont [9/16] (narrow) %v2724_v42, 32 }
 0x32b   : > { %v1724_v61 = vpop.f32.mrf.mxu2  ;;  %v2682_v44 = vpop.f32.mrf.mxu1 }
 0x32c   : > { %v1945_v32 = vpop.f32.mrf.mxu3 }
 0x32d   : > { %v1946_v20 = vadd.f32 %v1945_v32, %v1724_v61  ;;  %v2619_v24 = vpop.f32.mrf.mxu0 }
 0x32e   : > { %v2705_v50 = vadd.f32 %v2619_v24, %v1886_v28 }
 0x32f   : > { %v2725_v56 = vadd.f32 %v2679_v40, %v1946_v20 }
 0x330   : > { %2737 = vxpose.xlu2.b32.cont [6/16] (narrow) %v2705_v50, 32 }
 0x331   : > { %2773 = vxpose.xlu0.b32.cont [10/16] (narrow) %v2725_v56, 32 }
 0x333   : > { %v1727_v5 = vpop.f32.mrf.mxu2 }
 0x334   : > { %v1948_v62 = vpop.f32.mrf.mxu3 }
 0x335   : > { %v1949_v21 = vadd.f32 %v1948_v62, %v1727_v5  ;;  %v2622_v22 = vpop.f32.mrf.mxu0 }
 0x336   : > { %v2706_v10 = vadd.f32 %v2622_v22, %v1889_v11 }
 0x337   : > { %v2726_v45 = vadd.f32 %v2682_v44, %v1949_v21 }
 0x338   : > { %2738 = vxpose.xlu2.b32.cont [7/16] (narrow) %v2706_v10, 32 }
 0x339   : > { %2774 = vxpose.xlu0.b32.cont [11/16] (narrow) %v2726_v45, 32 }
 0x33b   : > { %v1730_v49 = vpop.f32.mrf.mxu2  ;;  %v2685_v26 = vpop.f32.mrf.mxu1 }
 0x33c   : > { %v1951_v60 = vpop.f32.mrf.mxu3 }
 0x33d   : > { %v1952_v41 = vadd.f32 %v1951_v60, %v1730_v49  ;;  %v2625_v53 = vpop.f32.mrf.mxu0 }
 0x33e   : > { %v2707_v43 = vadd.f32 %v2625_v53, %v1892_v23 }
 0x33f   : > { %v2727_v29 = vadd.f32 %v2685_v26, %v1952_v41 }
 0x340   : > { %2739 = vxpose.xlu2.b32.cont [8/16] (narrow) %v2707_v43, 32 }
 0x341   : > { %2775 = vxpose.xlu0.b32.cont [12/16] (narrow) %v2727_v29, 32 }
 0x343   : > { %v1733_v15 = vpop.f32.mrf.mxu2 }
 0x344   : > { %v1954_v13 = vpop.f32.mrf.mxu3 }
 0x345   : > { %v1955_v4 = vadd.f32 %v1954_v13, %v1733_v15 }
 0x348   : > { %2740 = vxpose.xlu2.b32.cont [9/16] (narrow) %v5434_v37, 32 }
 0x34b   : > { %v2688_v39 = vpop.f32.mrf.mxu1  ;;  %v1736_v27 = vpop.f32.mrf.mxu2 }
 0x34c   : > { %v2728_v7 = vadd.f32 %v2688_v39, %v1955_v4  ;;  %v1957_v0 = vpop.f32.mrf.mxu3 }
 0x34d   : > { %v1958_v12 = vadd.f32 %v1957_v0, %v1736_v27 }
 0x34e   : > { %2776 = vxpose.xlu0.b32.cont [13/16] (narrow) %v2728_v7, 32 }
 0x350   : > { %2741 = vxpose.xlu2.b32.cont [10/16] (narrow) %v5460_v25, 32 }
 0x353   : > { %v2691_v34 = vpop.f32.mrf.mxu1 }
 0x354   : > { %v2729_v14 = vadd.f32 %v2691_v34, %v1958_v12  ;;  %v1960_v31 = vpop.f32.mrf.mxu3 }
 0x356   : > { %2777 = vxpose.xlu0.b32.cont [14/16] (narrow) %v2729_v14, 32 }
 0x358   : > { %2742 = vxpose.xlu2.b32.cont [11/16] (narrow) %v5481_v17, 32 }
 0x359   : > { %v1739_v52 = vpop.f32.mrf.mxu2 }
 0x35a   : > { %v1961_v59 = vadd.f32 %v1960_v31, %v1739_v52 }
 0x35c   : > { %v2694_v57 = vpop.f32.mrf.mxu1  ;;  %v1963_v37 = vpop.f32.mrf.mxu3 }
 0x35d   : > { %v2730_v18 = vadd.f32 %v2694_v57, %v1961_v59  ;;  %v5622_v57 = vstv %s2896_s30 }
 0x35f   : > { %2778 = vxpose.xlu0.b32.cont [15/16] (narrow) %v2730_v18, 32 }
 0x360   : > { %2743 = vxpose.xlu2.b32.cont [12/16] (narrow) %v5505_v46, 32 }
 0x361   : > { %v1742_v6 = vpop.f32.mrf.mxu2 }
 0x362   : > { %v1964_v9 = vadd.f32 %v1963_v37, %v1742_v6 }
 0x364   : > { %v2697_v30 = vpop.f32.mrf.mxu1 }
 0x365   : > { %v2731_v19 = vadd.f32 %v2697_v30, %v1964_v9 }
 0x367   : > { %2779 = vxpose.xlu0.b32.end [16/16] (narrow) %v2731_v19, 32 }
 0x368   : > { %2744 = vxpose.xlu2.b32.cont [13/16] (narrow) %v5523_v63, 32 }
 0x370   : > { %2745 = vxpose.xlu2.b32.cont [14/16] (narrow) %v5538_v3, 32 }
 0x378   : > { %2746 = vxpose.xlu2.b32.cont [15/16] (narrow) %v5556_v58, 32 }
 0x380   : > { %2747 = vxpose.xlu2.b32.end [16/16] (narrow) %v5568_v35, 32 }
 0x393   : > { %v2780_v25 = vpop.trf.xlu0 }
 0x39b   : > { %v2781_v38 = vpop.trf.xlu0 }
 0x3a1   : > { %v2748_v17 = vpop.trf.xlu2 }
 0x3a2   : > { %v2796_v1 = vadd.f32 %v2780_v25, %v2748_v17 }
 0x3a3   : > { %v2782_v36 = vpop.trf.xlu0 }
 0x3a4   : > { %2797 = vadd.xlane.f32.xlu1 %v2796_v1 }
 0x3a9   : > { %v2749_v46 = vpop.trf.xlu2 }
 0x3aa   : > { %v2799_v2 = vadd.f32 %v2781_v38, %v2749_v46 }
 0x3ab   : > { %v2783_v47 = vpop.trf.xlu0 }
 0x3ac   : > { %2800 = vadd.xlane.f32.xlu1 %v2799_v2 }
 0x3b1   : > { %v2750_v16 = vpop.trf.xlu2 }
 0x3b2   : > { %v2802_v8 = vadd.f32 %v2782_v36, %v2750_v16 }
 0x3b4   : > { %2803 = vadd.xlane.f32.xlu1 %v2802_v8 }
 0x3b9   : > { %v2751_v63 = vpop.trf.xlu2 }
 0x3ba   : > { %v2805_v55 = vadd.f32 %v2783_v47, %v2751_v63 }
 0x3bc   : > { %2806 = vadd.xlane.f32.xlu1 %v2805_v55 }
 0x417   : > { %v2798_v3 = vpop.xlane.xlu1 %2797 }
 0x418   : > { %v2808_v58 = vmul.f32 0.00390625, %v2798_v3 }
 0x41a   : > { %v2812_v48 = vsub.f32 %v2748_v17, %v2808_v58  ;;  %v2813_v35 = vsub.f32 %v2780_v25, %v2808_v58 }
 0x41c   : > { %v2820_v33 = vmul.f32 %v2812_v48, %v2812_v48  ;;  %v2821_v54 = vmul.f32 %v2813_v35, %v2813_v35 }
 0x41e   : > { %v2828_v51 = vadd.f32 %v2821_v54, %v2820_v33 }
 0x41f   : > { %v2801_v42 = vpop.xlane.xlu1 %2800 }
 0x420   : > { %v2809_v61 = vmul.f32 0.00390625, %v2801_v42  ;;  %2829 = vadd.xlane.f32.xlu1 %v2828_v51 }
 0x422   : > { %v5597_v28 = vsub.f32 %v2749_v46, %v2809_v61  ;;  %v5599_v40 = vsub.f32 %v2781_v38, %v2809_v61 }
 0x424   : > { %v2822_v32 = vmul.f32 %v5597_v28, %v5597_v28  ;;  %v2823_v20 = vmul.f32 %v5599_v40, %v5599_v40 }
 0x426   : > { %v2831_v24 = vadd.f32 %v2823_v20, %v2822_v32 }
 0x427   : > { %v2804_v50 = vpop.xlane.xlu1 %2803 }
 0x428   : > { %v2810_v56 = vmul.f32 0.00390625, %v2804_v50  ;;  %2832 = vadd.xlane.f32.xlu1 %v2831_v24 }
 0x42a   : > { %v5605_v5 = vsub.f32 %v2750_v16, %v2810_v56  ;;  %v5607_v11 = vsub.f32 %v2782_v36, %v2810_v56 }
 0x42c   : > { %v2824_v44 = vmul.f32 %v5605_v5, %v5605_v5  ;;  %v2825_v62 = vmul.f32 %v5607_v11, %v5607_v11 }
 0x42e   : > { %v2834_v21 = vadd.f32 %v2825_v62, %v2824_v44 }
 0x42f   : > { %v2807_v22 = vpop.xlane.xlu1 %2806 }
 0x430   : > { %v2811_v10 = vmul.f32 0.00390625, %v2807_v22  ;;  %2835 = vadd.xlane.f32.xlu1 %v2834_v21 }
 0x432   : > { %v5613_v45 = vsub.f32 %v2751_v63, %v2811_v10  ;;  %v5615_v49 = vsub.f32 %v2783_v47, %v2811_v10 }
 0x434   : > { %v2826_v23 = vmul.f32 %v5613_v45, %v5613_v45  ;;  %v2827_v60 = vmul.f32 %v5615_v49, %v5615_v49 }
 0x436   : > { %v2837_v26 = vadd.f32 %v2827_v60, %v2826_v23 }
 0x438   : > { %2838 = vadd.xlane.f32.xlu1 %v2837_v26 }
 0x493   : > { %v2830_v41 = vpop.xlane.xlu1 %2829 }
 0x494   : > { %v2840_v53 = vmul.f32 0.00390625, %v2830_v41 }
 0x496   : > { %v2844_v43 = vadd.f32 1e-05, %v2840_v53 }
 0x498   : > { %3262 = vrsqrt.f32 %v2844_v43  ;;  %vm2854_vm12 = vweird.f32 %v2844_v43 }
 0x49b   : > { %v2833_v29 = vpop.xlane.xlu1 %2832 }
 0x49c   : > { %v2841_v13 = vmul.f32 0.00390625, %v2833_v29 }
 0x49e   : > { %v3263_v15 = vpop.eup %3262  ;;  %v2845_v4 = vadd.f32 1e-05, %v2841_v13 }
 0x49f   : > { %v2849_v39 = vmul.f32 %v3263_v15, %v2844_v43  ;;  %vm2855_vm11 = vweird.f32 %v3263_v15 }
 0x4a0   : > { %3264 = vrsqrt.f32 %v2845_v4  ;;  %vm2856_vm13 = vmor %vm2854_vm12, %vm2855_vm11  ;;  %vm2864_vm1 = vweird.f32 %v2845_v4 }
 0x4a1   : > { %v2850_v7 = vmul.f32 %v3263_v15, %v2849_v39 }
 0x4a3   : > { %v2851_v0 = vmul.f32 0.5, %v2850_v7  ;;  %v2836_v27 = vpop.xlane.xlu1 %2835 }
 0x4a4   : > { %v2842_v12 = vmul.f32 0.00390625, %v2836_v27 }
 0x4a5   : > { %v2852_v34 = vsub.f32 1.5, %v2851_v0 }
 0x4a6   : > { %v3265_v14 = vpop.eup %3264  ;;  %v2846_v31 = vadd.f32 1e-05, %v2842_v12 }
 0x4a7   : > { %v2853_v52 = vmul.f32 %v3263_v15, %v2852_v34  ;;  %v2859_v59 = vmul.f32 %v3265_v14, %v2845_v4  ;;  %vm2865_vm0 = vweird.f32 %v3265_v14 }
 0x4a8   : > { %3266 = vrsqrt.f32 %v2846_v31  ;;  %vm2866_vm2 = vmor %vm2864_vm1, %vm2865_vm0  ;;  %vm2874_vm6 = vweird.f32 %v2846_v31 }
 0x4a9   : > { %v2857_v18 = vsel %vm2856_vm13, %v3263_v15, %v2853_v52  ;;  %v2860_v37 = vmul.f32 %v3265_v14, %v2859_v59 }
 0x4aa   : > { %v2888_v6 = vmul.f32 %v2857_v18, %v2812_v48  ;;  %v2889_v9 = vmul.f32 %v2857_v18, %v2813_v35 }
 0x4ab   : > { %v2861_v30 = vmul.f32 0.5, %v2860_v37  ;;  %v2839_v19 = vpop.xlane.xlu1 %2838 }
 0x4ac   : > { %vm2897_vm14 = vcmp.gt.f32.partialorder %v2888_v6, 0.0  ;;  %vm2898_vm15 = vcmp.gt.f32.partialorder %v2889_v9, 0.0  ;;  %v2906_v25 = vmul.f32 %v5622_v57, %v2888_v6  ;;  %v2907_v17 = vmul.f32 %v5622_v57, %v2889_v9 }
 0x4ad   : > { %v2862_v1 = vsub.f32 1.5, %v2861_v30  ;;  %v2843_v38 = vmul.f32 0.00390625, %v2839_v19 }
 0x4ae   : > { %v3267_v46 = vpop.eup %3266  ;;  %v2914_v2 = vsel %vm2897_vm14, %v2888_v6, %v2906_v25  ;;  %v2915_v36 = vsel %vm2898_vm15, %v2889_v9, %v2907_v17 }
 0x4af   : > { %2922 = vst [vmem:[%s5627_s10] sm:$0xff] %v2914_v2  ;;  %v2863_v16 = vmul.f32 %v3265_v14, %v2862_v1  ;;  %v2869_v8 = vmul.f32 %v3267_v46, %v2846_v31  ;;  %v2847_v47 = vadd.f32 1e-05, %v2843_v38  ;;  %vm2875_vm5 = vweird.f32 %v3267_v46 }
 0x4b0   : > { %2923 = vst [vmem:[%s5627_s10 + $0x8] sm:$0xff] %v2915_v36  ;;  %vm2876_vm7 = vmor %vm2874_vm6, %vm2875_vm5 }
 0x4b1   : > { %v2867_v63 = vsel %vm2866_vm2, %v3265_v14, %v2863_v16  ;;  %v2870_v55 = vmul.f32 %v3267_v46, %v2869_v8  ;;  %3268 = vrsqrt.f32 %v2847_v47  ;;  %vm2884_vm11 = vweird.f32 %v2847_v47 }
 0x4b2   : > { %v2890_v3 = vmul.f32 %v2867_v63, %v5597_v28  ;;  %v2891_v58 = vmul.f32 %v2867_v63, %v5599_v40 }
 0x4b3   : > { %v2871_v48 = vmul.f32 0.5, %v2870_v55 }
 0x4b4   : > { %vm2899_vm3 = vcmp.gt.f32.partialorder %v2890_v3, 0.0  ;;  %vm2900_vm4 = vcmp.gt.f32.partialorder %v2891_v58, 0.0  ;;  %v2908_v35 = vmul.f32 %v5622_v57, %v2890_v3  ;;  %v2909_v33 = vmul.f32 %v5622_v57, %v2891_v58 }
 0x4b5   : > { %v2872_v54 = vsub.f32 1.5, %v2871_v48 }
 0x4b6   : > { %v2916_v51 = vsel %vm2899_vm3, %v2890_v3, %v2908_v35  ;;  %v2917_v42 = vsel %vm2900_vm4, %v2891_v58, %v2909_v33 }
 0x4b7   : > { %v3269_v61 = vpop.eup %3268  ;;  %2924 = vst [vmem:[%s5627_s10 + $0x10] sm:$0xff] %v2916_v51  ;;  %v2873_v32 = vmul.f32 %v3267_v46, %v2872_v54 }
 0x4b8   : > { %2925 = vst [vmem:[%s5627_s10 + $0x18] sm:$0xff] %v2917_v42  ;;  %v2879_v28 = vmul.f32 %v3269_v61, %v2847_v47  ;;  %vm2885_vm10 = vweird.f32 %v3269_v61 }
 0x4b9   : > { %v2877_v40 = vsel %vm2876_vm7, %v3267_v46, %v2873_v32  ;;  %vm2886_vm12 = vmor %vm2884_vm11, %vm2885_vm10 }
 0x4ba   : > { %v2892_v20 = vmul.f32 %v2877_v40, %v5605_v5  ;;  %v2893_v24 = vmul.f32 %v2877_v40, %v5607_v11  ;;  %v2880_v50 = vmul.f32 %v3269_v61, %v2879_v28 }
 0x4bc   : > { %vm2901_vm8 = vcmp.gt.f32.partialorder %v2892_v20, 0.0  ;;  %vm2902_vm9 = vcmp.gt.f32.partialorder %v2893_v24, 0.0  ;;  %v2910_v56 = vmul.f32 %v5622_v57, %v2892_v20  ;;  %v2911_v44 = vmul.f32 %v5622_v57, %v2893_v24 }
 0x4bd   : > { %v2881_v62 = vmul.f32 0.5, %v2880_v50 }
 0x4be   : > { %v2918_v21 = vsel %vm2901_vm8, %v2892_v20, %v2910_v56  ;;  %v2919_v22 = vsel %vm2902_vm9, %v2893_v24, %v2911_v44 }
 0x4bf   : > { %2926 = vst [vmem:[%s5627_s10 + $0x20] sm:$0xff] %v2918_v21  ;;  %v2882_v10 = vsub.f32 1.5, %v2881_v62 }
 0x4c0   : > { %2927 = vst [vmem:[%s5627_s10 + $0x28] sm:$0xff] %v2919_v22 }
 0x4c1   : > { %v2883_v23 = vmul.f32 %v3269_v61, %v2882_v10 }
 0x4c3   : > { %v2887_v5 = vsel %vm2886_vm12, %v3269_v61, %v2883_v23 }
 0x4c4   : > { %v2894_v11 = vmul.f32 %v2887_v5, %v5613_v45  ;;  %v2895_v60 = vmul.f32 %v2887_v5, %v5615_v49 }
 0x4c6   : > { %vm2903_vm13 = vcmp.gt.f32.partialorder %v2894_v11, 0.0  ;;  %vm2904_vm14 = vcmp.gt.f32.partialorder %v2895_v60, 0.0  ;;  %v2912_v26 = vmul.f32 %v5622_v57, %v2894_v11  ;;  %v2913_v41 = vmul.f32 %v5622_v57, %v2895_v60 }
 0x4c8   : > { %v2920_v53 = vsel %vm2903_vm13, %v2894_v11, %v2912_v26  ;;  %v2921_v43 = vsel %vm2904_vm14, %v2895_v60, %v2913_v41 }
 0x4c9   : > { %2928 = vst [vmem:[%s5627_s10 + $0x30] sm:$0xff] %v2920_v53 }
 0x4ca   : > { %2929 = vst [vmem:[%s5627_s10 + $0x38] sm:$0xff] %v2921_v43 }
 0x4cb PF: > { %s18_s26 = sadd.s32 1, %s3313_s26  }
 0x4cc   : > { %p15_p4 = scmp.ge.s32.totalorder %s18_s26, 4  }
 0x4ce   :  { %17 = sbr.rel (!%p15_p4) target bundleno = 2 (0x2), region = 80 }

</bundles_post_ra>
